<compile_context>
chip_gen: v5e
topology: v5e:2x2
jax: 0.10.0
libtpu: 0.0.40
codegen_flags: <defaults>
</compile_context>

<pallas_src>
import math
from functools import partial

import jax
import jax.numpy as jnp
from jax.experimental import pallas as pl
from jax.experimental.pallas import tpu as pltpu


# ----------------------------- in-kernel helpers -----------------------------

def _mm(a, b):
    return jnp.dot(a, b, preferred_element_type=jnp.float32)


def _ln(x, g, b, eps=1e-5):
    mu = jnp.mean(x, axis=-1, keepdims=True)
    var = jnp.mean(jnp.square(x - mu), axis=-1, keepdims=True)
    return (x - mu) * jax.lax.rsqrt(var + eps) * g + b


def _softmax(s):
    s = s - jnp.max(s, axis=-1, keepdims=True)
    p = jnp.exp(s)
    return p * pl.reciprocal(jnp.sum(p, axis=-1, keepdims=True), approx=True)


# ------------------------- fully fused forward kernel ------------------------

def _forward_kernel(
        patches_ref, conv_w_ref, bb_vec_ref,                  # conv stem + BN
        dec_in_ref, pad_ref,                                   # decoder input / pad
        e_wv_ref, e_wo_ref, e_w1_ref, e_w2_ref, e_vec_ref, e_b1_ref,   # enc stack
        d_wqkv_ref, d_wo1_ref, d_wv_ref, d_wo2_ref,
        d_w1_ref, d_w2_ref, d_vec_ref, d_b1_ref,                        # dec stack
        fc_w_ref, fc_b_ref,                                    # padded vocab proj
        out_ref,
        *, B, S, P, num_heads):
    D = conv_w_ref.shape[1]
    L = e_wv_ref.shape[0]
    BS = B * S
    dk = D // num_heads
    scale = 1.0 / math.sqrt(dk)

    # ---- visual backbone: conv-as-matmul -> BN(eval) -> ReLU -> global avg
    # pool.  Per-batch mean via a 0/1 selector matmul (no 3-D reshapes).
    bb = bb_vec_ref[...]                                       # rows: g, b, mu, var
    feat = _mm(patches_ref[...], conv_w_ref[...])              # (B*P, D)
    feat = (feat - bb[2:3]) * jax.lax.rsqrt(bb[3:4] + 1e-5) * bb[0:1] + bb[1:2]
    feat = jnp.maximum(feat, 0.0)
    pr = jax.lax.broadcasted_iota(jnp.int32, (B, B * P), 0)
    pc = jax.lax.broadcasted_iota(jnp.int32, (B, B * P), 1)
    pool = jnp.where((pc >= pr * P) & (pc < (pr + 1) * P), 1.0 / P, 0.0)
    enc = _mm(pool, feat)                                      # (B, D) visual tokens

    # ---- encoder stack.  Source seq length == 1, so per-head softmax over the
    # single un-masked key is exactly 1 and self-attention == V-projection.
    for l in range(L):
        ev = e_vec_ref[l]                                      # (7, D) packed vectors
        v = _mm(enc, e_wv_ref[l]) + ev[0:1]
        attn = _mm(v, e_wo_ref[l]) + ev[1:2]
        h = _ln(enc + attn, ev[2:3], ev[3:4])
        f = jnp.maximum(_mm(h, e_w1_ref[l]) + e_b1_ref[l], 0.0)
        f = _mm(f, e_w2_ref[l]) + ev[4:5]
        enc = _ln(h + f, ev[5:6], ev[6:7])

    # ---- decoder: batch folded into rows r = b*S + i ----
    # batch selector sel[r, b] = 1 iff row r belongs to batch b (reused for the
    # block-diagonal mask and for broadcasting the cross-attention output).
    sr = jax.lax.broadcasted_iota(jnp.int32, (BS, B), 0)
    sb = jax.lax.broadcasted_iota(jnp.int32, (BS, B), 1)
    sel = jnp.where((sr >= sb * S) & (sr < (sb + 1) * S), 1.0, 0.0)    # (BS, B)
    tb = jax.lax.broadcasted_iota(jnp.int32, (B, BS), 0)
    tr = jax.lax.broadcasted_iota(jnp.int32, (B, BS), 1)
    selT = jnp.where((tr >= tb * S) & (tr < (tb + 1) * S), 1.0, 0.0)   # (B, BS)
    same_b = _mm(sel, selT) > 0.5                                      # block-diagonal

    qr = jax.lax.broadcasted_iota(jnp.int32, (BS, BS), 0)
    kc = jax.lax.broadcasted_iota(jnp.int32, (BS, BS), 1)
    # PyTorch: tgt_mask = (tgt != 0).unsqueeze(1).unsqueeze(3) & nopeak -> the
    # padding term broadcasts over keys, i.e. it masks padded QUERY rows.
    causal_pad = (kc <= qr) & (pad_ref[...] > 0.5)                     # (BS, BS)

    x = dec_in_ref[...]                                                # (BS, D)
    for l in range(L):
        dv = d_vec_ref[l]                                              # (13, D)

        # masked multi-head self-attention: one QKV matmul, scale folded into Q
        qkv = _mm(x, d_wqkv_ref[l])                                    # (BS, 3D)
        q = (qkv[:, 0:D] + dv[0:1]) * scale
        k = qkv[:, D:2 * D] + dv[1:2]
        v = qkv[:, 2 * D:3 * D] + dv[2:3]
        heads = []
        for hh in range(num_heads):
            hs = slice(hh * dk, (hh + 1) * dk)
            s = jax.lax.dot_general(q[:, hs], k[:, hs], (((1,), (1,)), ((), ())),
                                    preferred_element_type=jnp.float32)
            s = jnp.where(causal_pad, s, -1e9)   # PyTorch masked_fill value
            s = jnp.where(same_b, s, -1e30)      # keep folded batches independent
            heads.append(_mm(_softmax(s), v[:, hs]))
        attn = _mm(jnp.concatenate(heads, axis=1), d_wo1_ref[l]) + dv[3:4]
        h1 = _ln(x + attn, dv[4:5], dv[5:6])

        # cross-attention over the single encoder token: softmax over one
        # un-masked key == 1, so output == (enc @ W_v + b_v) @ W_o + b_o,
        # broadcast to each batch's rows via the selector matmul.
        # (cross W_q / W_k are mathematically dead and never loaded.)
        u = _mm(_mm(enc, d_wv_ref[l]) + dv[6:7], d_wo2_ref[l]) + dv[7:8]   # (B, D)
        h2 = _ln(h1 + _mm(sel, u), dv[8:9], dv[9:10])

        # position-wise feed-forward
        f = jnp.maximum(_mm(h2, d_w1_ref[l]) + d_b1_ref[l], 0.0)
        f = _mm(f, d_w2_ref[l]) + dv[10:11]
        x = _ln(h2 + f, dv[11:12], dv[12:13])

    # ---- final vocab projection: the model's only HBM store, lane-dense ----
    out_ref[...] = _mm(x, fc_w_ref[...]) + fc_b_ref[...]


# --------------------------------- wrappers ----------------------------------

def _im2col(img, kh=3, kw=3, stride=2, pad=3):
    """NCHW (B,1,H,W) -> im2col patches (B*P, C*kh*kw); cheap XLA glue."""
    B, C, H, W = img.shape
    Ho = (H + 2 * pad - kh) // stride + 1
    Wo = (W + 2 * pad - kw) // stride + 1
    xp = jnp.pad(img, ((0, 0), (0, 0), (pad, pad), (pad, pad)))
    cols = []
    for di in range(kh):
        for dj in range(kw):
            cols.append(xp[:, :, di:di + stride * (Ho - 1) + 1:stride,
                               dj:dj + stride * (Wo - 1) + 1:stride])
    p = jnp.stack(cols, axis=2)                       # (B, C, kh*kw, Ho, Wo)
    p = p.reshape(B, C * kh * kw, Ho * Wo)            # (B, KC, P)
    p = p.transpose(0, 2, 1).reshape(B * Ho * Wo, C * kh * kw)   # (B*P, KC)
    return p, Ho * Wo


def transformer_forward(params, src_img, tgt, num_heads, tgt_vocab):
    B, S = tgt.shape
    D = params['emb'].shape[1]
    Vp = params['fc_w'].shape[1]

    # im2col for the conv stem (XLA glue; all backbone math runs in the kernel)
    patches, P = _im2col(src_img)

    # decoder token embedding + positional encoding (dropout == identity, eval);
    # the embedding gather stays as a tiny XLA take().
    dec_in = (jnp.take(params['emb'], tgt, axis=0)
              + params['pe'][:, :S]).reshape(B * S, D)

    # padded-query mask: one 64-byte DMA for the whole fused forward; the
    # causal / same-batch structure is built in-kernel.
    pad_q = (tgt != 0).astype(jnp.float32).reshape(B * S, 1)

    args = (patches, params['conv_w'], params['bb_vec'],
            dec_in, pad_q,
            params['e_wv'], params['e_wo'], params['e_w1'], params['e_w2'],
            params['e_vec'], params['e_b1'],
            params['d_wqkv'], params['d_wo1'], params['d_wv'], params['d_wo2'],
            params['d_w1'], params['d_w2'], params['d_vec'], params['d_b1'],
            params['fc_w'], params['fc_b'])

    def full_spec(a):
        return pl.BlockSpec(a.shape, lambda i, n=a.ndim: (0,) * n)

    out = pl.pallas_call(
        partial(_forward_kernel, B=B, S=S, P=P, num_heads=num_heads),
        out_shape=jax.ShapeDtypeStruct((B * S, Vp), jnp.float32),
        grid=(1,),
        in_specs=[full_spec(a) for a in args],
        out_specs=pl.BlockSpec((B * S, Vp), lambda i: (0, 0)),
        compiler_params=pltpu.CompilerParams(
            dimension_semantics=("arbitrary",)),
    )(*args)
    return out[:, :tgt_vocab].reshape(B, S, tgt_vocab)


# --------------------------- deterministic params ----------------------------

def make_positional_encoding(d_model, max_len):
    pos = jnp.arange(max_len, dtype=jnp.float32)[:, None]
    div = jnp.exp(jnp.arange(0, d_model, 2, dtype=jnp.float32)
                  * (-math.log(10000.0) / d_model))
    pe = jnp.zeros((max_len, d_model), jnp.float32)
    pe = pe.at[:, 0::2].set(jnp.sin(pos * div))
    pe = pe.at[:, 1::2].set(jnp.cos(pos * div))
    return pe[None]                                    # (1, max_len, D)


def init_params(key, d_model, num_layers, d_ff, tgt_vocab, max_seq):
    D, F, L, V = d_model, d_ff, num_layers, tgt_vocab
    keys = iter(jax.random.split(key, 1024))

    def rnd(shape, s=0.05):
        return s * jax.random.normal(next(keys), shape, jnp.float32)

    def gamma():
        return 1.0 + 0.02 * jax.random.normal(next(keys), (D,), jnp.float32)

    def bias():
        return 0.02 * jax.random.normal(next(keys), (D,), jnp.float32)

    # simplified conv stem weights stored im2col-ready as (C*KH*KW, D)
    conv = rnd((D, 1, 3, 3), 0.1)
    conv_w = conv.reshape(D, -1).T
    bb_vec = jnp.stack([jnp.ones(D), jnp.zeros(D),          # BN gamma, beta
                        jnp.zeros(D), jnp.ones(D)]).astype(jnp.float32)

    # encoder stack (only V / O projections needed: source seq length == 1)
    e_wv = rnd((L, D, D)); e_wo = rnd((L, D, D))
    e_w1 = rnd((L, D, F)); e_w2 = rnd((L, F, D))
    e_b1 = rnd((L, 1, F), 0.02)
    # packed rows: [b_v, b_o, ln1_g, ln1_b, ff_b2, ln2_g, ln2_b]
    e_vec = jnp.stack([jnp.stack([bias(), bias(), gamma(), bias(),
                                  bias(), gamma(), bias()]) for _ in range(L)])

    # decoder stack
    d_wqkv = rnd((L, D, 3 * D)); d_wo1 = rnd((L, D, D))
    d_wv = rnd((L, D, D)); d_wo2 = rnd((L, D, D))
    d_w1 = rnd((L, D, F)); d_w2 = rnd((L, F, D))
    d_b1 = rnd((L, 1, F), 0.02)
    # packed rows: [b_q, b_k, b_v_self, b_o1, ln1_g, ln1_b,
    #               b_v_cross, b_o2, ln2_g, ln2_b, ff_b2, ln3_g, ln3_b]
    d_vec = jnp.stack([jnp.stack([bias(), bias(), bias(), bias(), gamma(), bias(),
                                  bias(), bias(), gamma(), bias(),
                                  bias(), gamma(), bias()]) for _ in range(L)])

    # vocab projection zero-padded to a 128-lane-dense output block
    Vp = max(128, ((V + 127) // 128) * 128)
    fc_w = jnp.zeros((D, Vp), jnp.float32).at[:, :V].set(rnd((D, V)))
    fc_b = jnp.zeros((1, Vp), jnp.float32).at[:, :V].set(rnd((1, V), 0.02))

    return dict(conv_w=conv_w, bb_vec=bb_vec,
                emb=rnd((V, D)), pe=make_positional_encoding(D, max_seq),
                e_wv=e_wv, e_wo=e_wo, e_w1=e_w1, e_w2=e_w2, e_vec=e_vec, e_b1=e_b1,
                d_wqkv=d_wqkv, d_wo1=d_wo1, d_wv=d_wv, d_wo2=d_wo2,
                d_w1=d_w1, d_w2=d_w2, d_vec=d_vec, d_b1=d_b1,
                fc_w=fc_w, fc_b=fc_b)


# ----------------------------------- main ------------------------------------

if __name__ == "__main__":
    d_model, num_heads, num_layers, d_ff = 32, 4, 2, 64
    tgt_vocab, max_seq = 20, 16
    B, S, H, W = 2, 8, 16, 16

    key = jax.random.PRNGKey(0)
    kp, ki, kt = jax.random.split(key, 3)

    params = init_params(kp, d_model, num_layers, d_ff, tgt_vocab, max_seq)
    src_img = jax.random.normal(ki, (B, 1, H, W), jnp.float32)   # NCHW like PyTorch
    tgt = jax.random.randint(kt, (B, S), 1, tgt_vocab)
    tgt = tgt.at[1, 6:].set(0)          # exercise the padding-mask path

    fwd = jax.jit(partial(transformer_forward,
                          num_heads=num_heads, tgt_vocab=tgt_vocab))
    out = jax.block_until_ready(fwd(params, src_img, tgt))

    assert out.shape == (B, S, tgt_vocab), out.shape
    assert bool(jnp.all(jnp.isfinite(out)))
    print("KERNEL_OK")
</pallas_src>

<mosaic_0001>
module attributes {stable_mosaic.version = 11 : i64} {
  func.func @_forward_kernel(%arg0: i32, %arg1: memref<200x9xf32, #tpu.memory_space<vmem>>, %arg2: memref<9x32xf32, #tpu.memory_space<vmem>>, %arg3: memref<4x32xf32, #tpu.memory_space<vmem>>, %arg4: memref<16x32xf32, #tpu.memory_space<vmem>>, %arg5: memref<16x1xf32, #tpu.memory_space<vmem>>, %arg6: memref<2x32x32xf32, #tpu.memory_space<vmem>>, %arg7: memref<2x32x32xf32, #tpu.memory_space<vmem>>, %arg8: memref<2x32x64xf32, #tpu.memory_space<vmem>>, %arg9: memref<2x64x32xf32, #tpu.memory_space<vmem>>, %arg10: memref<2x7x32xf32, #tpu.memory_space<vmem>>, %arg11: memref<2x1x64xf32, #tpu.memory_space<vmem>>, %arg12: memref<2x32x96xf32, #tpu.memory_space<vmem>>, %arg13: memref<2x32x32xf32, #tpu.memory_space<vmem>>, %arg14: memref<2x32x32xf32, #tpu.memory_space<vmem>>, %arg15: memref<2x32x32xf32, #tpu.memory_space<vmem>>, %arg16: memref<2x32x64xf32, #tpu.memory_space<vmem>>, %arg17: memref<2x64x32xf32, #tpu.memory_space<vmem>>, %arg18: memref<2x13x32xf32, #tpu.memory_space<vmem>>, %arg19: memref<2x1x64xf32, #tpu.memory_space<vmem>>, %arg20: memref<32x128xf32, #tpu.memory_space<vmem>>, %arg21: memref<1x128xf32, #tpu.memory_space<vmem>>, %arg22: memref<16x128xf32, #tpu.memory_space<vmem>>) attributes {dimension_semantics = [#tpu.dimension_semantics<arbitrary>], iteration_bounds = array<i64: 1>, scalar_prefetch = 0 : i64, scratch_operands = 0 : i64, tpu.core_type = #tpu.core_type<tc>, window_params = [{pipeline_mode = #tpu.pipeline_mode<synchronous>, transform_indices = @transform_0, window_bounds = array<i64: 200, 9>}, {pipeline_mode = #tpu.pipeline_mode<synchronous>, transform_indices = @transform_1, window_bounds = array<i64: 9, 32>}, {pipeline_mode = #tpu.pipeline_mode<synchronous>, transform_indices = @transform_2, window_bounds = array<i64: 4, 32>}, {pipeline_mode = #tpu.pipeline_mode<synchronous>, transform_indices = @transform_3, window_bounds = array<i64: 16, 32>}, {pipeline_mode = #tpu.pipeline_mode<synchronous>, transform_indices = @transform_4, window_bounds = array<i64: 16, 1>}, {pipeline_mode = #tpu.pipeline_mode<synchronous>, transform_indices = @transform_5, window_bounds = array<i64: 2, 32, 32>}, {pipeline_mode = #tpu.pipeline_mode<synchronous>, transform_indices = @transform_6, window_bounds = array<i64: 2, 32, 32>}, {pipeline_mode = #tpu.pipeline_mode<synchronous>, transform_indices = @transform_7, window_bounds = array<i64: 2, 32, 64>}, {pipeline_mode = #tpu.pipeline_mode<synchronous>, transform_indices = @transform_8, window_bounds = array<i64: 2, 64, 32>}, {pipeline_mode = #tpu.pipeline_mode<synchronous>, transform_indices = @transform_9, window_bounds = array<i64: 2, 7, 32>}, {pipeline_mode = #tpu.pipeline_mode<synchronous>, transform_indices = @transform_10, window_bounds = array<i64: 2, 1, 64>}, {pipeline_mode = #tpu.pipeline_mode<synchronous>, transform_indices = @transform_11, window_bounds = array<i64: 2, 32, 96>}, {pipeline_mode = #tpu.pipeline_mode<synchronous>, transform_indices = @transform_12, window_bounds = array<i64: 2, 32, 32>}, {pipeline_mode = #tpu.pipeline_mode<synchronous>, transform_indices = @transform_13, window_bounds = array<i64: 2, 32, 32>}, {pipeline_mode = #tpu.pipeline_mode<synchronous>, transform_indices = @transform_14, window_bounds = array<i64: 2, 32, 32>}, {pipeline_mode = #tpu.pipeline_mode<synchronous>, transform_indices = @transform_15, window_bounds = array<i64: 2, 32, 64>}, {pipeline_mode = #tpu.pipeline_mode<synchronous>, transform_indices = @transform_16, window_bounds = array<i64: 2, 64, 32>}, {pipeline_mode = #tpu.pipeline_mode<synchronous>, transform_indices = @transform_17, window_bounds = array<i64: 2, 13, 32>}, {pipeline_mode = #tpu.pipeline_mode<synchronous>, transform_indices = @transform_18, window_bounds = array<i64: 2, 1, 64>}, {pipeline_mode = #tpu.pipeline_mode<synchronous>, transform_indices = @transform_19, window_bounds = array<i64: 32, 128>}, {pipeline_mode = #tpu.pipeline_mode<synchronous>, transform_indices = @transform_20, window_bounds = array<i64: 1, 128>}, {pipeline_mode = #tpu.pipeline_mode<synchronous>, transform_indices = @transform_21, window_bounds = array<i64: 16, 128>}]} {
    %c0 = arith.constant 0 : index
    %c0_0 = arith.constant 0 : index
    %0 = vector.load %arg3[%c0, %c0_0] : memref<4x32xf32, #tpu.memory_space<vmem>>, vector<4x32xf32>
    %c0_1 = arith.constant 0 : index
    %c0_2 = arith.constant 0 : index
    %1 = vector.load %arg1[%c0_1, %c0_2] : memref<200x9xf32, #tpu.memory_space<vmem>>, vector<200x9xf32>
    %c0_3 = arith.constant 0 : index
    %c0_4 = arith.constant 0 : index
    %2 = vector.load %arg2[%c0_3, %c0_4] : memref<9x32xf32, #tpu.memory_space<vmem>>, vector<9x32xf32>
    %cst = arith.constant dense<0.000000e+00> : vector<200x32xf32>
    %3 = tpu.matmul %1, %2, %cst {dimension_numbers = #tpu.dot_dimension_numbers<[1], [0], [0], [1], [0, 0, 1, 1], [], []>} : vector<200x9xf32>, vector<9x32xf32>, vector<200x32xf32> -> vector<200x32xf32>
    %4 = vector.extract_strided_slice %0 {offsets = [2, 0], sizes = [1, 32], strides = [1, 1]} : vector<4x32xf32> to vector<1x32xf32>
    %5 = vector.broadcast %4 : vector<1x32xf32> to vector<200x32xf32>
    %6 = arith.subf %3, %5 : vector<200x32xf32>
    %7 = vector.extract_strided_slice %0 {offsets = [3, 0], sizes = [1, 32], strides = [1, 1]} : vector<4x32xf32> to vector<1x32xf32>
    %cst_5 = arith.constant 9.99999974E-6 : f32
    %8 = vector.broadcast %cst_5 : f32 to vector<1x32xf32>
    %9 = arith.addf %7, %8 : vector<1x32xf32>
    %10 = math.rsqrt %9 : vector<1x32xf32>
    %11 = vector.broadcast %10 : vector<1x32xf32> to vector<200x32xf32>
    %12 = arith.mulf %6, %11 : vector<200x32xf32>
    %13 = vector.extract_strided_slice %0 {offsets = [0, 0], sizes = [1, 32], strides = [1, 1]} : vector<4x32xf32> to vector<1x32xf32>
    %14 = vector.broadcast %13 : vector<1x32xf32> to vector<200x32xf32>
    %15 = arith.mulf %12, %14 : vector<200x32xf32>
    %16 = vector.extract_strided_slice %0 {offsets = [1, 0], sizes = [1, 32], strides = [1, 1]} : vector<4x32xf32> to vector<1x32xf32>
    %17 = vector.broadcast %16 : vector<1x32xf32> to vector<200x32xf32>
    %18 = arith.addf %15, %17 : vector<200x32xf32>
    %cst_6 = arith.constant 0.000000e+00 : f32
    %19 = vector.broadcast %cst_6 : f32 to vector<200x32xf32>
    %20 = arith.maximumf %18, %19 : vector<200x32xf32>
    %21 = tpu.iota {dimensions = array<i32: 0>} : vector<2x200xi32>
    %22 = tpu.iota {dimensions = array<i32: 1>} : vector<2x200xi32>
    %c100_i32 = arith.constant 100 : i32
    %23 = vector.broadcast %c100_i32 : i32 to vector<2x200xi32>
    %24 = arith.muli %21, %23 : vector<2x200xi32>
    %25 = arith.cmpi sge, %22, %24 : vector<2x200xi32>
    %c1_i32 = arith.constant 1 : i32
    %26 = vector.broadcast %c1_i32 : i32 to vector<2x200xi32>
    %27 = arith.addi %21, %26 : vector<2x200xi32>
    %c100_i32_7 = arith.constant 100 : i32
    %28 = vector.broadcast %c100_i32_7 : i32 to vector<2x200xi32>
    %29 = arith.muli %27, %28 : vector<2x200xi32>
    %30 = arith.cmpi slt, %22, %29 : vector<2x200xi32>
    %31 = arith.andi %25, %30 : vector<2x200xi1>
    %cst_8 = arith.constant 0.00999999977 : f32
    %cst_9 = arith.constant 0.000000e+00 : f32
    %32 = vector.broadcast %cst_8 : f32 to vector<2x200xf32>
    %33 = vector.broadcast %cst_9 : f32 to vector<2x200xf32>
    %34 = arith.select %31, %32, %33 : vector<2x200xi1>, vector<2x200xf32>
    %cst_10 = arith.constant dense<0.000000e+00> : vector<2x32xf32>
    %35 = tpu.matmul %34, %20, %cst_10 {dimension_numbers = #tpu.dot_dimension_numbers<[1], [0], [0], [1], [0, 0, 1, 1], [], []>} : vector<2x200xf32>, vector<200x32xf32>, vector<2x32xf32> -> vector<2x32xf32>
    %c0_11 = arith.constant 0 : index
    %c0_12 = arith.constant 0 : index
    %c0_13 = arith.constant 0 : index
    %36 = vector.load %arg10[%c0_11, %c0_12, %c0_13] : memref<2x7x32xf32, #tpu.memory_space<vmem>>, vector<1x7x32xf32>
    %37 = vector.shape_cast %36 : vector<1x7x32xf32> to vector<7x32xf32>
    %c0_14 = arith.constant 0 : index
    %c0_15 = arith.constant 0 : index
    %c0_16 = arith.constant 0 : index
    %38 = vector.load %arg6[%c0_14, %c0_15, %c0_16] : memref<2x32x32xf32, #tpu.memory_space<vmem>>, vector<1x32x32xf32>
    %39 = vector.shape_cast %38 : vector<1x32x32xf32> to vector<32x32xf32>
    %cst_17 = arith.constant dense<0.000000e+00> : vector<2x32xf32>
    %40 = tpu.matmul %35, %39, %cst_17 {dimension_numbers = #tpu.dot_dimension_numbers<[1], [0], [0], [1], [0, 0, 1, 1], [], []>} : vector<2x32xf32>, vector<32x32xf32>, vector<2x32xf32> -> vector<2x32xf32>
    %41 = vector.extract_strided_slice %37 {offsets = [0, 0], sizes = [1, 32], strides = [1, 1]} : vector<7x32xf32> to vector<1x32xf32>
    %42 = vector.broadcast %41 : vector<1x32xf32> to vector<2x32xf32>
    %43 = arith.addf %40, %42 : vector<2x32xf32>
    %c0_18 = arith.constant 0 : index
    %c0_19 = arith.constant 0 : index
    %c0_20 = arith.constant 0 : index
    %44 = vector.load %arg7[%c0_18, %c0_19, %c0_20] : memref<2x32x32xf32, #tpu.memory_space<vmem>>, vector<1x32x32xf32>
    %45 = vector.shape_cast %44 : vector<1x32x32xf32> to vector<32x32xf32>
    %cst_21 = arith.constant dense<0.000000e+00> : vector<2x32xf32>
    %46 = tpu.matmul %43, %45, %cst_21 {dimension_numbers = #tpu.dot_dimension_numbers<[1], [0], [0], [1], [0, 0, 1, 1], [], []>} : vector<2x32xf32>, vector<32x32xf32>, vector<2x32xf32> -> vector<2x32xf32>
    %47 = vector.extract_strided_slice %37 {offsets = [1, 0], sizes = [1, 32], strides = [1, 1]} : vector<7x32xf32> to vector<1x32xf32>
    %48 = vector.broadcast %47 : vector<1x32xf32> to vector<2x32xf32>
    %49 = arith.addf %46, %48 : vector<2x32xf32>
    %50 = arith.addf %35, %49 : vector<2x32xf32>
    %51 = vector.extract_strided_slice %37 {offsets = [2, 0], sizes = [1, 32], strides = [1, 1]} : vector<7x32xf32> to vector<1x32xf32>
    %52 = vector.extract_strided_slice %37 {offsets = [3, 0], sizes = [1, 32], strides = [1, 1]} : vector<7x32xf32> to vector<1x32xf32>
    %cst_22 = arith.constant dense<0.000000e+00> : vector<2xf32>
    %53 = vector.multi_reduction <add>, %50, %cst_22 [1] : vector<2x32xf32> to vector<2xf32>
    %54 = vector.shape_cast %53 : vector<2xf32> to vector<2x1xf32>
    %cst_23 = arith.constant 3.200000e+01 : f32
    %55 = vector.broadcast %cst_23 : f32 to vector<2x1xf32>
    %56 = arith.divf %54, %55 : vector<2x1xf32>
    %57 = vector.broadcast %56 : vector<2x1xf32> to vector<2x32xf32>
    %58 = arith.subf %50, %57 : vector<2x32xf32>
    %59 = arith.mulf %58, %58 : vector<2x32xf32>
    %cst_24 = arith.constant dense<0.000000e+00> : vector<2xf32>
    %60 = vector.multi_reduction <add>, %59, %cst_24 [1] : vector<2x32xf32> to vector<2xf32>
    %61 = vector.shape_cast %60 : vector<2xf32> to vector<2x1xf32>
    %cst_25 = arith.constant 3.200000e+01 : f32
    %62 = vector.broadcast %cst_25 : f32 to vector<2x1xf32>
    %63 = arith.divf %61, %62 : vector<2x1xf32>
    %64 = vector.broadcast %56 : vector<2x1xf32> to vector<2x32xf32>
    %65 = arith.subf %50, %64 : vector<2x32xf32>
    %cst_26 = arith.constant 9.99999974E-6 : f32
    %66 = vector.broadcast %cst_26 : f32 to vector<2x1xf32>
    %67 = arith.addf %63, %66 : vector<2x1xf32>
    %68 = math.rsqrt %67 : vector<2x1xf32>
    %69 = vector.broadcast %68 : vector<2x1xf32> to vector<2x32xf32>
    %70 = arith.mulf %65, %69 : vector<2x32xf32>
    %71 = vector.broadcast %51 : vector<1x32xf32> to vector<2x32xf32>
    %72 = arith.mulf %70, %71 : vector<2x32xf32>
    %73 = vector.broadcast %52 : vector<1x32xf32> to vector<2x32xf32>
    %74 = arith.addf %72, %73 : vector<2x32xf32>
    %c0_27 = arith.constant 0 : index
    %c0_28 = arith.constant 0 : index
    %c0_29 = arith.constant 0 : index
    %75 = vector.load %arg8[%c0_27, %c0_28, %c0_29] : memref<2x32x64xf32, #tpu.memory_space<vmem>>, vector<1x32x64xf32>
    %76 = vector.shape_cast %75 : vector<1x32x64xf32> to vector<32x64xf32>
    %cst_30 = arith.constant dense<0.000000e+00> : vector<2x64xf32>
    %77 = tpu.matmul %74, %76, %cst_30 {dimension_numbers = #tpu.dot_dimension_numbers<[1], [0], [0], [1], [0, 0, 1, 1], [], []>} : vector<2x32xf32>, vector<32x64xf32>, vector<2x64xf32> -> vector<2x64xf32>
    %c0_31 = arith.constant 0 : index
    %c0_32 = arith.constant 0 : index
    %c0_33 = arith.constant 0 : index
    %78 = vector.load %arg11[%c0_31, %c0_32, %c0_33] : memref<2x1x64xf32, #tpu.memory_space<vmem>>, vector<1x1x64xf32>
    %79 = vector.shape_cast %78 : vector<1x1x64xf32> to vector<1x64xf32>
    %80 = vector.broadcast %79 : vector<1x64xf32> to vector<2x64xf32>
    %81 = arith.addf %77, %80 : vector<2x64xf32>
    %cst_34 = arith.constant 0.000000e+00 : f32
    %82 = vector.broadcast %cst_34 : f32 to vector<2x64xf32>
    %83 = arith.maximumf %81, %82 : vector<2x64xf32>
    %c0_35 = arith.constant 0 : index
    %c0_36 = arith.constant 0 : index
    %c0_37 = arith.constant 0 : index
    %84 = vector.load %arg9[%c0_35, %c0_36, %c0_37] : memref<2x64x32xf32, #tpu.memory_space<vmem>>, vector<1x64x32xf32>
    %85 = vector.shape_cast %84 : vector<1x64x32xf32> to vector<64x32xf32>
    %cst_38 = arith.constant dense<0.000000e+00> : vector<2x32xf32>
    %86 = tpu.matmul %83, %85, %cst_38 {dimension_numbers = #tpu.dot_dimension_numbers<[1], [0], [0], [1], [0, 0, 1, 1], [], []>} : vector<2x64xf32>, vector<64x32xf32>, vector<2x32xf32> -> vector<2x32xf32>
    %87 = vector.extract_strided_slice %37 {offsets = [4, 0], sizes = [1, 32], strides = [1, 1]} : vector<7x32xf32> to vector<1x32xf32>
    %88 = vector.broadcast %87 : vector<1x32xf32> to vector<2x32xf32>
    %89 = arith.addf %86, %88 : vector<2x32xf32>
    %90 = arith.addf %74, %89 : vector<2x32xf32>
    %91 = vector.extract_strided_slice %37 {offsets = [5, 0], sizes = [1, 32], strides = [1, 1]} : vector<7x32xf32> to vector<1x32xf32>
    %92 = vector.extract_strided_slice %37 {offsets = [6, 0], sizes = [1, 32], strides = [1, 1]} : vector<7x32xf32> to vector<1x32xf32>
    %cst_39 = arith.constant dense<0.000000e+00> : vector<2xf32>
    %93 = vector.multi_reduction <add>, %90, %cst_39 [1] : vector<2x32xf32> to vector<2xf32>
    %94 = vector.shape_cast %93 : vector<2xf32> to vector<2x1xf32>
    %cst_40 = arith.constant 3.200000e+01 : f32
    %95 = vector.broadcast %cst_40 : f32 to vector<2x1xf32>
    %96 = arith.divf %94, %95 : vector<2x1xf32>
    %97 = vector.broadcast %96 : vector<2x1xf32> to vector<2x32xf32>
    %98 = arith.subf %90, %97 : vector<2x32xf32>
    %99 = arith.mulf %98, %98 : vector<2x32xf32>
    %cst_41 = arith.constant dense<0.000000e+00> : vector<2xf32>
    %100 = vector.multi_reduction <add>, %99, %cst_41 [1] : vector<2x32xf32> to vector<2xf32>
    %101 = vector.shape_cast %100 : vector<2xf32> to vector<2x1xf32>
    %cst_42 = arith.constant 3.200000e+01 : f32
    %102 = vector.broadcast %cst_42 : f32 to vector<2x1xf32>
    %103 = arith.divf %101, %102 : vector<2x1xf32>
    %104 = vector.broadcast %96 : vector<2x1xf32> to vector<2x32xf32>
    %105 = arith.subf %90, %104 : vector<2x32xf32>
    %cst_43 = arith.constant 9.99999974E-6 : f32
    %106 = vector.broadcast %cst_43 : f32 to vector<2x1xf32>
    %107 = arith.addf %103, %106 : vector<2x1xf32>
    %108 = math.rsqrt %107 : vector<2x1xf32>
    %109 = vector.broadcast %108 : vector<2x1xf32> to vector<2x32xf32>
    %110 = arith.mulf %105, %109 : vector<2x32xf32>
    %111 = vector.broadcast %91 : vector<1x32xf32> to vector<2x32xf32>
    %112 = arith.mulf %110, %111 : vector<2x32xf32>
    %113 = vector.broadcast %92 : vector<1x32xf32> to vector<2x32xf32>
    %114 = arith.addf %112, %113 : vector<2x32xf32>
    %c1 = arith.constant 1 : index
    %c0_44 = arith.constant 0 : index
    %c0_45 = arith.constant 0 : index
    %115 = vector.load %arg10[%c1, %c0_44, %c0_45] : memref<2x7x32xf32, #tpu.memory_space<vmem>>, vector<1x7x32xf32>
    %116 = vector.shape_cast %115 : vector<1x7x32xf32> to vector<7x32xf32>
    %c1_46 = arith.constant 1 : index
    %c0_47 = arith.constant 0 : index
    %c0_48 = arith.constant 0 : index
    %117 = vector.load %arg6[%c1_46, %c0_47, %c0_48] : memref<2x32x32xf32, #tpu.memory_space<vmem>>, vector<1x32x32xf32>
    %118 = vector.shape_cast %117 : vector<1x32x32xf32> to vector<32x32xf32>
    %cst_49 = arith.constant dense<0.000000e+00> : vector<2x32xf32>
    %119 = tpu.matmul %114, %118, %cst_49 {dimension_numbers = #tpu.dot_dimension_numbers<[1], [0], [0], [1], [0, 0, 1, 1], [], []>} : vector<2x32xf32>, vector<32x32xf32>, vector<2x32xf32> -> vector<2x32xf32>
    %120 = vector.extract_strided_slice %116 {offsets = [0, 0], sizes = [1, 32], strides = [1, 1]} : vector<7x32xf32> to vector<1x32xf32>
    %121 = vector.broadcast %120 : vector<1x32xf32> to vector<2x32xf32>
    %122 = arith.addf %119, %121 : vector<2x32xf32>
    %c1_50 = arith.constant 1 : index
    %c0_51 = arith.constant 0 : index
    %c0_52 = arith.constant 0 : index
    %123 = vector.load %arg7[%c1_50, %c0_51, %c0_52] : memref<2x32x32xf32, #tpu.memory_space<vmem>>, vector<1x32x32xf32>
    %124 = vector.shape_cast %123 : vector<1x32x32xf32> to vector<32x32xf32>
    %cst_53 = arith.constant dense<0.000000e+00> : vector<2x32xf32>
    %125 = tpu.matmul %122, %124, %cst_53 {dimension_numbers = #tpu.dot_dimension_numbers<[1], [0], [0], [1], [0, 0, 1, 1], [], []>} : vector<2x32xf32>, vector<32x32xf32>, vector<2x32xf32> -> vector<2x32xf32>
    %126 = vector.extract_strided_slice %116 {offsets = [1, 0], sizes = [1, 32], strides = [1, 1]} : vector<7x32xf32> to vector<1x32xf32>
    %127 = vector.broadcast %126 : vector<1x32xf32> to vector<2x32xf32>
    %128 = arith.addf %125, %127 : vector<2x32xf32>
    %129 = arith.addf %114, %128 : vector<2x32xf32>
    %130 = vector.extract_strided_slice %116 {offsets = [2, 0], sizes = [1, 32], strides = [1, 1]} : vector<7x32xf32> to vector<1x32xf32>
    %131 = vector.extract_strided_slice %116 {offsets = [3, 0], sizes = [1, 32], strides = [1, 1]} : vector<7x32xf32> to vector<1x32xf32>
    %cst_54 = arith.constant dense<0.000000e+00> : vector<2xf32>
    %132 = vector.multi_reduction <add>, %129, %cst_54 [1] : vector<2x32xf32> to vector<2xf32>
    %133 = vector.shape_cast %132 : vector<2xf32> to vector<2x1xf32>
    %cst_55 = arith.constant 3.200000e+01 : f32
    %134 = vector.broadcast %cst_55 : f32 to vector<2x1xf32>
    %135 = arith.divf %133, %134 : vector<2x1xf32>
    %136 = vector.broadcast %135 : vector<2x1xf32> to vector<2x32xf32>
    %137 = arith.subf %129, %136 : vector<2x32xf32>
    %138 = arith.mulf %137, %137 : vector<2x32xf32>
    %cst_56 = arith.constant dense<0.000000e+00> : vector<2xf32>
    %139 = vector.multi_reduction <add>, %138, %cst_56 [1] : vector<2x32xf32> to vector<2xf32>
    %140 = vector.shape_cast %139 : vector<2xf32> to vector<2x1xf32>
    %cst_57 = arith.constant 3.200000e+01 : f32
    %141 = vector.broadcast %cst_57 : f32 to vector<2x1xf32>
    %142 = arith.divf %140, %141 : vector<2x1xf32>
    %143 = vector.broadcast %135 : vector<2x1xf32> to vector<2x32xf32>
    %144 = arith.subf %129, %143 : vector<2x32xf32>
    %cst_58 = arith.constant 9.99999974E-6 : f32
    %145 = vector.broadcast %cst_58 : f32 to vector<2x1xf32>
    %146 = arith.addf %142, %145 : vector<2x1xf32>
    %147 = math.rsqrt %146 : vector<2x1xf32>
    %148 = vector.broadcast %147 : vector<2x1xf32> to vector<2x32xf32>
    %149 = arith.mulf %144, %148 : vector<2x32xf32>
    %150 = vector.broadcast %130 : vector<1x32xf32> to vector<2x32xf32>
    %151 = arith.mulf %149, %150 : vector<2x32xf32>
    %152 = vector.broadcast %131 : vector<1x32xf32> to vector<2x32xf32>
    %153 = arith.addf %151, %152 : vector<2x32xf32>
    %c1_59 = arith.constant 1 : index
    %c0_60 = arith.constant 0 : index
    %c0_61 = arith.constant 0 : index
    %154 = vector.load %arg8[%c1_59, %c0_60, %c0_61] : memref<2x32x64xf32, #tpu.memory_space<vmem>>, vector<1x32x64xf32>
    %155 = vector.shape_cast %154 : vector<1x32x64xf32> to vector<32x64xf32>
    %cst_62 = arith.constant dense<0.000000e+00> : vector<2x64xf32>
    %156 = tpu.matmul %153, %155, %cst_62 {dimension_numbers = #tpu.dot_dimension_numbers<[1], [0], [0], [1], [0, 0, 1, 1], [], []>} : vector<2x32xf32>, vector<32x64xf32>, vector<2x64xf32> -> vector<2x64xf32>
    %c1_63 = arith.constant 1 : index
    %c0_64 = arith.constant 0 : index
    %c0_65 = arith.constant 0 : index
    %157 = vector.load %arg11[%c1_63, %c0_64, %c0_65] : memref<2x1x64xf32, #tpu.memory_space<vmem>>, vector<1x1x64xf32>
    %158 = vector.shape_cast %157 : vector<1x1x64xf32> to vector<1x64xf32>
    %159 = vector.broadcast %158 : vector<1x64xf32> to vector<2x64xf32>
    %160 = arith.addf %156, %159 : vector<2x64xf32>
    %cst_66 = arith.constant 0.000000e+00 : f32
    %161 = vector.broadcast %cst_66 : f32 to vector<2x64xf32>
    %162 = arith.maximumf %160, %161 : vector<2x64xf32>
    %c1_67 = arith.constant 1 : index
    %c0_68 = arith.constant 0 : index
    %c0_69 = arith.constant 0 : index
    %163 = vector.load %arg9[%c1_67, %c0_68, %c0_69] : memref<2x64x32xf32, #tpu.memory_space<vmem>>, vector<1x64x32xf32>
    %164 = vector.shape_cast %163 : vector<1x64x32xf32> to vector<64x32xf32>
    %cst_70 = arith.constant dense<0.000000e+00> : vector<2x32xf32>
    %165 = tpu.matmul %162, %164, %cst_70 {dimension_numbers = #tpu.dot_dimension_numbers<[1], [0], [0], [1], [0, 0, 1, 1], [], []>} : vector<2x64xf32>, vector<64x32xf32>, vector<2x32xf32> -> vector<2x32xf32>
    %166 = vector.extract_strided_slice %116 {offsets = [4, 0], sizes = [1, 32], strides = [1, 1]} : vector<7x32xf32> to vector<1x32xf32>
    %167 = vector.broadcast %166 : vector<1x32xf32> to vector<2x32xf32>
    %168 = arith.addf %165, %167 : vector<2x32xf32>
    %169 = arith.addf %153, %168 : vector<2x32xf32>
    %170 = vector.extract_strided_slice %116 {offsets = [5, 0], sizes = [1, 32], strides = [1, 1]} : vector<7x32xf32> to vector<1x32xf32>
    %171 = vector.extract_strided_slice %116 {offsets = [6, 0], sizes = [1, 32], strides = [1, 1]} : vector<7x32xf32> to vector<1x32xf32>
    %cst_71 = arith.constant dense<0.000000e+00> : vector<2xf32>
    %172 = vector.multi_reduction <add>, %169, %cst_71 [1] : vector<2x32xf32> to vector<2xf32>
    %173 = vector.shape_cast %172 : vector<2xf32> to vector<2x1xf32>
    %cst_72 = arith.constant 3.200000e+01 : f32
    %174 = vector.broadcast %cst_72 : f32 to vector<2x1xf32>
    %175 = arith.divf %173, %174 : vector<2x1xf32>
    %176 = vector.broadcast %175 : vector<2x1xf32> to vector<2x32xf32>
    %177 = arith.subf %169, %176 : vector<2x32xf32>
    %178 = arith.mulf %177, %177 : vector<2x32xf32>
    %cst_73 = arith.constant dense<0.000000e+00> : vector<2xf32>
    %179 = vector.multi_reduction <add>, %178, %cst_73 [1] : vector<2x32xf32> to vector<2xf32>
    %180 = vector.shape_cast %179 : vector<2xf32> to vector<2x1xf32>
    %cst_74 = arith.constant 3.200000e+01 : f32
    %181 = vector.broadcast %cst_74 : f32 to vector<2x1xf32>
    %182 = arith.divf %180, %181 : vector<2x1xf32>
    %183 = vector.broadcast %175 : vector<2x1xf32> to vector<2x32xf32>
    %184 = arith.subf %169, %183 : vector<2x32xf32>
    %cst_75 = arith.constant 9.99999974E-6 : f32
    %185 = vector.broadcast %cst_75 : f32 to vector<2x1xf32>
    %186 = arith.addf %182, %185 : vector<2x1xf32>
    %187 = math.rsqrt %186 : vector<2x1xf32>
    %188 = vector.broadcast %187 : vector<2x1xf32> to vector<2x32xf32>
    %189 = arith.mulf %184, %188 : vector<2x32xf32>
    %190 = vector.broadcast %170 : vector<1x32xf32> to vector<2x32xf32>
    %191 = arith.mulf %189, %190 : vector<2x32xf32>
    %192 = vector.broadcast %171 : vector<1x32xf32> to vector<2x32xf32>
    %193 = arith.addf %191, %192 : vector<2x32xf32>
    %194 = tpu.iota {dimensions = array<i32: 0>} : vector<16x2xi32>
    %195 = tpu.iota {dimensions = array<i32: 1>} : vector<16x2xi32>
    %c8_i32 = arith.constant 8 : i32
    %196 = vector.broadcast %c8_i32 : i32 to vector<16x2xi32>
    %197 = arith.muli %195, %196 : vector<16x2xi32>
    %198 = arith.cmpi sge, %194, %197 : vector<16x2xi32>
    %c1_i32_76 = arith.constant 1 : i32
    %199 = vector.broadcast %c1_i32_76 : i32 to vector<16x2xi32>
    %200 = arith.addi %195, %199 : vector<16x2xi32>
    %c8_i32_77 = arith.constant 8 : i32
    %201 = vector.broadcast %c8_i32_77 : i32 to vector<16x2xi32>
    %202 = arith.muli %200, %201 : vector<16x2xi32>
    %203 = arith.cmpi slt, %194, %202 : vector<16x2xi32>
    %204 = arith.andi %198, %203 : vector<16x2xi1>
    %cst_78 = arith.constant 1.000000e+00 : f32
    %cst_79 = arith.constant 0.000000e+00 : f32
    %205 = vector.broadcast %cst_78 : f32 to vector<16x2xf32>
    %206 = vector.broadcast %cst_79 : f32 to vector<16x2xf32>
    %207 = arith.select %204, %205, %206 : vector<16x2xi1>, vector<16x2xf32>
    %208 = tpu.iota {dimensions = array<i32: 0>} : vector<2x16xi32>
    %209 = tpu.iota {dimensions = array<i32: 1>} : vector<2x16xi32>
    %c8_i32_80 = arith.constant 8 : i32
    %210 = vector.broadcast %c8_i32_80 : i32 to vector<2x16xi32>
    %211 = arith.muli %208, %210 : vector<2x16xi32>
    %212 = arith.cmpi sge, %209, %211 : vector<2x16xi32>
    %c1_i32_81 = arith.constant 1 : i32
    %213 = vector.broadcast %c1_i32_81 : i32 to vector<2x16xi32>
    %214 = arith.addi %208, %213 : vector<2x16xi32>
    %c8_i32_82 = arith.constant 8 : i32
    %215 = vector.broadcast %c8_i32_82 : i32 to vector<2x16xi32>
    %216 = arith.muli %214, %215 : vector<2x16xi32>
    %217 = arith.cmpi slt, %209, %216 : vector<2x16xi32>
    %218 = arith.andi %212, %217 : vector<2x16xi1>
    %cst_83 = arith.constant 1.000000e+00 : f32
    %cst_84 = arith.constant 0.000000e+00 : f32
    %219 = vector.broadcast %cst_83 : f32 to vector<2x16xf32>
    %220 = vector.broadcast %cst_84 : f32 to vector<2x16xf32>
    %221 = arith.select %218, %219, %220 : vector<2x16xi1>, vector<2x16xf32>
    %cst_85 = arith.constant dense<0.000000e+00> : vector<16x16xf32>
    %222 = tpu.matmul %207, %221, %cst_85 {dimension_numbers = #tpu.dot_dimension_numbers<[1], [0], [0], [1], [0, 0, 1, 1], [], []>} : vector<16x2xf32>, vector<2x16xf32>, vector<16x16xf32> -> vector<16x16xf32>
    %cst_86 = arith.constant 5.000000e-01 : f32
    %223 = vector.broadcast %cst_86 : f32 to vector<16x16xf32>
    %224 = arith.cmpf ogt, %222, %223 : vector<16x16xf32>
    %225 = tpu.iota {dimensions = array<i32: 0>} : vector<16x16xi32>
    %226 = tpu.iota {dimensions = array<i32: 1>} : vector<16x16xi32>
    %227 = arith.cmpi sle, %226, %225 : vector<16x16xi32>
    %c0_87 = arith.constant 0 : index
    %c0_88 = arith.constant 0 : index
    %228 = vector.load %arg5[%c0_87, %c0_88] : memref<16x1xf32, #tpu.memory_space<vmem>>, vector<16x1xf32>
    %cst_89 = arith.constant 5.000000e-01 : f32
    %229 = vector.broadcast %cst_89 : f32 to vector<16x1xf32>
    %230 = arith.cmpf ogt, %228, %229 : vector<16x1xf32>
    %231 = vector.broadcast %230 : vector<16x1xi1> to vector<16x16xi1>
    %232 = arith.andi %227, %231 : vector<16x16xi1>
    %c0_90 = arith.constant 0 : index
    %c0_91 = arith.constant 0 : index
    %233 = vector.load %arg4[%c0_90, %c0_91] : memref<16x32xf32, #tpu.memory_space<vmem>>, vector<16x32xf32>
    %c0_92 = arith.constant 0 : index
    %c0_93 = arith.constant 0 : index
    %c0_94 = arith.constant 0 : index
    %234 = vector.load %arg18[%c0_92, %c0_93, %c0_94] : memref<2x13x32xf32, #tpu.memory_space<vmem>>, vector<1x13x32xf32>
    %235 = vector.shape_cast %234 : vector<1x13x32xf32> to vector<13x32xf32>
    %c0_95 = arith.constant 0 : index
    %c0_96 = arith.constant 0 : index
    %c0_97 = arith.constant 0 : index
    %236 = vector.load %arg12[%c0_95, %c0_96, %c0_97] : memref<2x32x96xf32, #tpu.memory_space<vmem>>, vector<1x32x96xf32>
    %237 = vector.shape_cast %236 : vector<1x32x96xf32> to vector<32x96xf32>
    %cst_98 = arith.constant dense<0.000000e+00> : vector<16x96xf32>
    %238 = tpu.matmul %233, %237, %cst_98 {dimension_numbers = #tpu.dot_dimension_numbers<[1], [0], [0], [1], [0, 0, 1, 1], [], []>} : vector<16x32xf32>, vector<32x96xf32>, vector<16x96xf32> -> vector<16x96xf32>
    %239 = vector.extract_strided_slice %238 {offsets = [0, 0], sizes = [16, 32], strides = [1, 1]} : vector<16x96xf32> to vector<16x32xf32>
    %240 = vector.extract_strided_slice %235 {offsets = [0, 0], sizes = [1, 32], strides = [1, 1]} : vector<13x32xf32> to vector<1x32xf32>
    %241 = vector.broadcast %240 : vector<1x32xf32> to vector<16x32xf32>
    %242 = arith.addf %239, %241 : vector<16x32xf32>
    %cst_99 = arith.constant 0.353553385 : f32
    %243 = vector.broadcast %cst_99 : f32 to vector<16x32xf32>
    %244 = arith.mulf %242, %243 : vector<16x32xf32>
    %245 = vector.extract_strided_slice %238 {offsets = [0, 32], sizes = [16, 32], strides = [1, 1]} : vector<16x96xf32> to vector<16x32xf32>
    %246 = vector.extract_strided_slice %235 {offsets = [1, 0], sizes = [1, 32], strides = [1, 1]} : vector<13x32xf32> to vector<1x32xf32>
    %247 = vector.broadcast %246 : vector<1x32xf32> to vector<16x32xf32>
    %248 = arith.addf %245, %247 : vector<16x32xf32>
    %249 = vector.extract_strided_slice %238 {offsets = [0, 64], sizes = [16, 32], strides = [1, 1]} : vector<16x96xf32> to vector<16x32xf32>
    %250 = vector.extract_strided_slice %235 {offsets = [2, 0], sizes = [1, 32], strides = [1, 1]} : vector<13x32xf32> to vector<1x32xf32>
    %251 = vector.broadcast %250 : vector<1x32xf32> to vector<16x32xf32>
    %252 = arith.addf %249, %251 : vector<16x32xf32>
    %253 = vector.extract_strided_slice %244 {offsets = [0, 0], sizes = [16, 8], strides = [1, 1]} : vector<16x32xf32> to vector<16x8xf32>
    %254 = vector.extract_strided_slice %248 {offsets = [0, 0], sizes = [16, 8], strides = [1, 1]} : vector<16x32xf32> to vector<16x8xf32>
    %cst_100 = arith.constant dense<0.000000e+00> : vector<16x16xf32>
    %255 = tpu.matmul %253, %254, %cst_100 {dimension_numbers = #tpu.dot_dimension_numbers<[1], [1], [0], [0], [0, 0, 1, 0], [], []>} : vector<16x8xf32>, vector<16x8xf32>, vector<16x16xf32> -> vector<16x16xf32>
    %cst_101 = arith.constant -1.000000e+09 : f32
    %256 = vector.broadcast %cst_101 : f32 to vector<16x16xf32>
    %257 = arith.select %232, %255, %256 : vector<16x16xi1>, vector<16x16xf32>
    %cst_102 = arith.constant -1.000000e+30 : f32
    %258 = vector.broadcast %cst_102 : f32 to vector<16x16xf32>
    %259 = arith.select %224, %257, %258 : vector<16x16xi1>, vector<16x16xf32>
    %cst_103 = arith.constant dense<0xFF800000> : vector<16xf32>
    %260 = vector.multi_reduction <maximumf>, %259, %cst_103 [1] : vector<16x16xf32> to vector<16xf32>
    %261 = vector.shape_cast %260 : vector<16xf32> to vector<16x1xf32>
    %262 = vector.broadcast %261 : vector<16x1xf32> to vector<16x16xf32>
    %263 = arith.subf %259, %262 : vector<16x16xf32>
    %264 = math.exp %263 : vector<16x16xf32>
    %cst_104 = arith.constant dense<0.000000e+00> : vector<16xf32>
    %265 = vector.multi_reduction <add>, %264, %cst_104 [1] : vector<16x16xf32> to vector<16xf32>
    %266 = vector.shape_cast %265 : vector<16xf32> to vector<16x1xf32>
    %267 = tpu.reciprocal %266 {approx = true} : vector<16x1xf32> -> vector<16x1xf32>
    %268 = vector.broadcast %267 : vector<16x1xf32> to vector<16x16xf32>
    %269 = arith.mulf %264, %268 : vector<16x16xf32>
    %270 = vector.extract_strided_slice %252 {offsets = [0, 0], sizes = [16, 8], strides = [1, 1]} : vector<16x32xf32> to vector<16x8xf32>
    %cst_105 = arith.constant dense<0.000000e+00> : vector<16x8xf32>
    %271 = tpu.matmul %269, %270, %cst_105 {dimension_numbers = #tpu.dot_dimension_numbers<[1], [0], [0], [1], [0, 0, 1, 1], [], []>} : vector<16x16xf32>, vector<16x8xf32>, vector<16x8xf32> -> vector<16x8xf32>
    %272 = vector.extract_strided_slice %244 {offsets = [0, 8], sizes = [16, 8], strides = [1, 1]} : vector<16x32xf32> to vector<16x8xf32>
    %273 = vector.extract_strided_slice %248 {offsets = [0, 8], sizes = [16, 8], strides = [1, 1]} : vector<16x32xf32> to vector<16x8xf32>
    %cst_106 = arith.constant dense<0.000000e+00> : vector<16x16xf32>
    %274 = tpu.matmul %272, %273, %cst_106 {dimension_numbers = #tpu.dot_dimension_numbers<[1], [1], [0], [0], [0, 0, 1, 0], [], []>} : vector<16x8xf32>, vector<16x8xf32>, vector<16x16xf32> -> vector<16x16xf32>
    %cst_107 = arith.constant -1.000000e+09 : f32
    %275 = vector.broadcast %cst_107 : f32 to vector<16x16xf32>
    %276 = arith.select %232, %274, %275 : vector<16x16xi1>, vector<16x16xf32>
    %cst_108 = arith.constant -1.000000e+30 : f32
    %277 = vector.broadcast %cst_108 : f32 to vector<16x16xf32>
    %278 = arith.select %224, %276, %277 : vector<16x16xi1>, vector<16x16xf32>
    %cst_109 = arith.constant dense<0xFF800000> : vector<16xf32>
    %279 = vector.multi_reduction <maximumf>, %278, %cst_109 [1] : vector<16x16xf32> to vector<16xf32>
    %280 = vector.shape_cast %279 : vector<16xf32> to vector<16x1xf32>
    %281 = vector.broadcast %280 : vector<16x1xf32> to vector<16x16xf32>
    %282 = arith.subf %278, %281 : vector<16x16xf32>
    %283 = math.exp %282 : vector<16x16xf32>
    %cst_110 = arith.constant dense<0.000000e+00> : vector<16xf32>
    %284 = vector.multi_reduction <add>, %283, %cst_110 [1] : vector<16x16xf32> to vector<16xf32>
    %285 = vector.shape_cast %284 : vector<16xf32> to vector<16x1xf32>
    %286 = tpu.reciprocal %285 {approx = true} : vector<16x1xf32> -> vector<16x1xf32>
    %287 = vector.broadcast %286 : vector<16x1xf32> to vector<16x16xf32>
    %288 = arith.mulf %283, %287 : vector<16x16xf32>
    %289 = vector.extract_strided_slice %252 {offsets = [0, 8], sizes = [16, 8], strides = [1, 1]} : vector<16x32xf32> to vector<16x8xf32>
    %cst_111 = arith.constant dense<0.000000e+00> : vector<16x8xf32>
    %290 = tpu.matmul %288, %289, %cst_111 {dimension_numbers = #tpu.dot_dimension_numbers<[1], [0], [0], [1], [0, 0, 1, 1], [], []>} : vector<16x16xf32>, vector<16x8xf32>, vector<16x8xf32> -> vector<16x8xf32>
    %291 = vector.extract_strided_slice %244 {offsets = [0, 16], sizes = [16, 8], strides = [1, 1]} : vector<16x32xf32> to vector<16x8xf32>
    %292 = vector.extract_strided_slice %248 {offsets = [0, 16], sizes = [16, 8], strides = [1, 1]} : vector<16x32xf32> to vector<16x8xf32>
    %cst_112 = arith.constant dense<0.000000e+00> : vector<16x16xf32>
    %293 = tpu.matmul %291, %292, %cst_112 {dimension_numbers = #tpu.dot_dimension_numbers<[1], [1], [0], [0], [0, 0, 1, 0], [], []>} : vector<16x8xf32>, vector<16x8xf32>, vector<16x16xf32> -> vector<16x16xf32>
    %cst_113 = arith.constant -1.000000e+09 : f32
    %294 = vector.broadcast %cst_113 : f32 to vector<16x16xf32>
    %295 = arith.select %232, %293, %294 : vector<16x16xi1>, vector<16x16xf32>
    %cst_114 = arith.constant -1.000000e+30 : f32
    %296 = vector.broadcast %cst_114 : f32 to vector<16x16xf32>
    %297 = arith.select %224, %295, %296 : vector<16x16xi1>, vector<16x16xf32>
    %cst_115 = arith.constant dense<0xFF800000> : vector<16xf32>
    %298 = vector.multi_reduction <maximumf>, %297, %cst_115 [1] : vector<16x16xf32> to vector<16xf32>
    %299 = vector.shape_cast %298 : vector<16xf32> to vector<16x1xf32>
    %300 = vector.broadcast %299 : vector<16x1xf32> to vector<16x16xf32>
    %301 = arith.subf %297, %300 : vector<16x16xf32>
    %302 = math.exp %301 : vector<16x16xf32>
    %cst_116 = arith.constant dense<0.000000e+00> : vector<16xf32>
    %303 = vector.multi_reduction <add>, %302, %cst_116 [1] : vector<16x16xf32> to vector<16xf32>
    %304 = vector.shape_cast %303 : vector<16xf32> to vector<16x1xf32>
    %305 = tpu.reciprocal %304 {approx = true} : vector<16x1xf32> -> vector<16x1xf32>
    %306 = vector.broadcast %305 : vector<16x1xf32> to vector<16x16xf32>
    %307 = arith.mulf %302, %306 : vector<16x16xf32>
    %308 = vector.extract_strided_slice %252 {offsets = [0, 16], sizes = [16, 8], strides = [1, 1]} : vector<16x32xf32> to vector<16x8xf32>
    %cst_117 = arith.constant dense<0.000000e+00> : vector<16x8xf32>
    %309 = tpu.matmul %307, %308, %cst_117 {dimension_numbers = #tpu.dot_dimension_numbers<[1], [0], [0], [1], [0, 0, 1, 1], [], []>} : vector<16x16xf32>, vector<16x8xf32>, vector<16x8xf32> -> vector<16x8xf32>
    %310 = vector.extract_strided_slice %244 {offsets = [0, 24], sizes = [16, 8], strides = [1, 1]} : vector<16x32xf32> to vector<16x8xf32>
    %311 = vector.extract_strided_slice %248 {offsets = [0, 24], sizes = [16, 8], strides = [1, 1]} : vector<16x32xf32> to vector<16x8xf32>
    %cst_118 = arith.constant dense<0.000000e+00> : vector<16x16xf32>
    %312 = tpu.matmul %310, %311, %cst_118 {dimension_numbers = #tpu.dot_dimension_numbers<[1], [1], [0], [0], [0, 0, 1, 0], [], []>} : vector<16x8xf32>, vector<16x8xf32>, vector<16x16xf32> -> vector<16x16xf32>
    %cst_119 = arith.constant -1.000000e+09 : f32
    %313 = vector.broadcast %cst_119 : f32 to vector<16x16xf32>
    %314 = arith.select %232, %312, %313 : vector<16x16xi1>, vector<16x16xf32>
    %cst_120 = arith.constant -1.000000e+30 : f32
    %315 = vector.broadcast %cst_120 : f32 to vector<16x16xf32>
    %316 = arith.select %224, %314, %315 : vector<16x16xi1>, vector<16x16xf32>
    %cst_121 = arith.constant dense<0xFF800000> : vector<16xf32>
    %317 = vector.multi_reduction <maximumf>, %316, %cst_121 [1] : vector<16x16xf32> to vector<16xf32>
    %318 = vector.shape_cast %317 : vector<16xf32> to vector<16x1xf32>
    %319 = vector.broadcast %318 : vector<16x1xf32> to vector<16x16xf32>
    %320 = arith.subf %316, %319 : vector<16x16xf32>
    %321 = math.exp %320 : vector<16x16xf32>
    %cst_122 = arith.constant dense<0.000000e+00> : vector<16xf32>
    %322 = vector.multi_reduction <add>, %321, %cst_122 [1] : vector<16x16xf32> to vector<16xf32>
    %323 = vector.shape_cast %322 : vector<16xf32> to vector<16x1xf32>
    %324 = tpu.reciprocal %323 {approx = true} : vector<16x1xf32> -> vector<16x1xf32>
    %325 = vector.broadcast %324 : vector<16x1xf32> to vector<16x16xf32>
    %326 = arith.mulf %321, %325 : vector<16x16xf32>
    %327 = vector.extract_strided_slice %252 {offsets = [0, 24], sizes = [16, 8], strides = [1, 1]} : vector<16x32xf32> to vector<16x8xf32>
    %cst_123 = arith.constant dense<0.000000e+00> : vector<16x8xf32>
    %328 = tpu.matmul %326, %327, %cst_123 {dimension_numbers = #tpu.dot_dimension_numbers<[1], [0], [0], [1], [0, 0, 1, 1], [], []>} : vector<16x16xf32>, vector<16x8xf32>, vector<16x8xf32> -> vector<16x8xf32>
    %329 = tpu.concatenate %271, %290, %309, %328 in 1 : vector<16x8xf32>, vector<16x8xf32>, vector<16x8xf32>, vector<16x8xf32> -> vector<16x32xf32>
    %c0_124 = arith.constant 0 : index
    %c0_125 = arith.constant 0 : index
    %c0_126 = arith.constant 0 : index
    %330 = vector.load %arg13[%c0_124, %c0_125, %c0_126] : memref<2x32x32xf32, #tpu.memory_space<vmem>>, vector<1x32x32xf32>
    %331 = vector.shape_cast %330 : vector<1x32x32xf32> to vector<32x32xf32>
    %cst_127 = arith.constant dense<0.000000e+00> : vector<16x32xf32>
    %332 = tpu.matmul %329, %331, %cst_127 {dimension_numbers = #tpu.dot_dimension_numbers<[1], [0], [0], [1], [0, 0, 1, 1], [], []>} : vector<16x32xf32>, vector<32x32xf32>, vector<16x32xf32> -> vector<16x32xf32>
    %333 = vector.extract_strided_slice %235 {offsets = [3, 0], sizes = [1, 32], strides = [1, 1]} : vector<13x32xf32> to vector<1x32xf32>
    %334 = vector.broadcast %333 : vector<1x32xf32> to vector<16x32xf32>
    %335 = arith.addf %332, %334 : vector<16x32xf32>
    %336 = arith.addf %233, %335 : vector<16x32xf32>
    %337 = vector.extract_strided_slice %235 {offsets = [4, 0], sizes = [1, 32], strides = [1, 1]} : vector<13x32xf32> to vector<1x32xf32>
    %338 = vector.extract_strided_slice %235 {offsets = [5, 0], sizes = [1, 32], strides = [1, 1]} : vector<13x32xf32> to vector<1x32xf32>
    %cst_128 = arith.constant dense<0.000000e+00> : vector<16xf32>
    %339 = vector.multi_reduction <add>, %336, %cst_128 [1] : vector<16x32xf32> to vector<16xf32>
    %340 = vector.shape_cast %339 : vector<16xf32> to vector<16x1xf32>
    %cst_129 = arith.constant 3.200000e+01 : f32
    %341 = vector.broadcast %cst_129 : f32 to vector<16x1xf32>
    %342 = arith.divf %340, %341 : vector<16x1xf32>
    %343 = vector.broadcast %342 : vector<16x1xf32> to vector<16x32xf32>
    %344 = arith.subf %336, %343 : vector<16x32xf32>
    %345 = arith.mulf %344, %344 : vector<16x32xf32>
    %cst_130 = arith.constant dense<0.000000e+00> : vector<16xf32>
    %346 = vector.multi_reduction <add>, %345, %cst_130 [1] : vector<16x32xf32> to vector<16xf32>
    %347 = vector.shape_cast %346 : vector<16xf32> to vector<16x1xf32>
    %cst_131 = arith.constant 3.200000e+01 : f32
    %348 = vector.broadcast %cst_131 : f32 to vector<16x1xf32>
    %349 = arith.divf %347, %348 : vector<16x1xf32>
    %350 = vector.broadcast %342 : vector<16x1xf32> to vector<16x32xf32>
    %351 = arith.subf %336, %350 : vector<16x32xf32>
    %cst_132 = arith.constant 9.99999974E-6 : f32
    %352 = vector.broadcast %cst_132 : f32 to vector<16x1xf32>
    %353 = arith.addf %349, %352 : vector<16x1xf32>
    %354 = math.rsqrt %353 : vector<16x1xf32>
    %355 = vector.broadcast %354 : vector<16x1xf32> to vector<16x32xf32>
    %356 = arith.mulf %351, %355 : vector<16x32xf32>
    %357 = vector.broadcast %337 : vector<1x32xf32> to vector<16x32xf32>
    %358 = arith.mulf %356, %357 : vector<16x32xf32>
    %359 = vector.broadcast %338 : vector<1x32xf32> to vector<16x32xf32>
    %360 = arith.addf %358, %359 : vector<16x32xf32>
    %c0_133 = arith.constant 0 : index
    %c0_134 = arith.constant 0 : index
    %c0_135 = arith.constant 0 : index
    %361 = vector.load %arg14[%c0_133, %c0_134, %c0_135] : memref<2x32x32xf32, #tpu.memory_space<vmem>>, vector<1x32x32xf32>
    %362 = vector.shape_cast %361 : vector<1x32x32xf32> to vector<32x32xf32>
    %cst_136 = arith.constant dense<0.000000e+00> : vector<2x32xf32>
    %363 = tpu.matmul %193, %362, %cst_136 {dimension_numbers = #tpu.dot_dimension_numbers<[1], [0], [0], [1], [0, 0, 1, 1], [], []>} : vector<2x32xf32>, vector<32x32xf32>, vector<2x32xf32> -> vector<2x32xf32>
    %364 = vector.extract_strided_slice %235 {offsets = [6, 0], sizes = [1, 32], strides = [1, 1]} : vector<13x32xf32> to vector<1x32xf32>
    %365 = vector.broadcast %364 : vector<1x32xf32> to vector<2x32xf32>
    %366 = arith.addf %363, %365 : vector<2x32xf32>
    %c0_137 = arith.constant 0 : index
    %c0_138 = arith.constant 0 : index
    %c0_139 = arith.constant 0 : index
    %367 = vector.load %arg15[%c0_137, %c0_138, %c0_139] : memref<2x32x32xf32, #tpu.memory_space<vmem>>, vector<1x32x32xf32>
    %368 = vector.shape_cast %367 : vector<1x32x32xf32> to vector<32x32xf32>
    %cst_140 = arith.constant dense<0.000000e+00> : vector<2x32xf32>
    %369 = tpu.matmul %366, %368, %cst_140 {dimension_numbers = #tpu.dot_dimension_numbers<[1], [0], [0], [1], [0, 0, 1, 1], [], []>} : vector<2x32xf32>, vector<32x32xf32>, vector<2x32xf32> -> vector<2x32xf32>
    %370 = vector.extract_strided_slice %235 {offsets = [7, 0], sizes = [1, 32], strides = [1, 1]} : vector<13x32xf32> to vector<1x32xf32>
    %371 = vector.broadcast %370 : vector<1x32xf32> to vector<2x32xf32>
    %372 = arith.addf %369, %371 : vector<2x32xf32>
    %cst_141 = arith.constant dense<0.000000e+00> : vector<16x32xf32>
    %373 = tpu.matmul %207, %372, %cst_141 {dimension_numbers = #tpu.dot_dimension_numbers<[1], [0], [0], [1], [0, 0, 1, 1], [], []>} : vector<16x2xf32>, vector<2x32xf32>, vector<16x32xf32> -> vector<16x32xf32>
    %374 = arith.addf %360, %373 : vector<16x32xf32>
    %375 = vector.extract_strided_slice %235 {offsets = [8, 0], sizes = [1, 32], strides = [1, 1]} : vector<13x32xf32> to vector<1x32xf32>
    %376 = vector.extract_strided_slice %235 {offsets = [9, 0], sizes = [1, 32], strides = [1, 1]} : vector<13x32xf32> to vector<1x32xf32>
    %cst_142 = arith.constant dense<0.000000e+00> : vector<16xf32>
    %377 = vector.multi_reduction <add>, %374, %cst_142 [1] : vector<16x32xf32> to vector<16xf32>
    %378 = vector.shape_cast %377 : vector<16xf32> to vector<16x1xf32>
    %cst_143 = arith.constant 3.200000e+01 : f32
    %379 = vector.broadcast %cst_143 : f32 to vector<16x1xf32>
    %380 = arith.divf %378, %379 : vector<16x1xf32>
    %381 = vector.broadcast %380 : vector<16x1xf32> to vector<16x32xf32>
    %382 = arith.subf %374, %381 : vector<16x32xf32>
    %383 = arith.mulf %382, %382 : vector<16x32xf32>
    %cst_144 = arith.constant dense<0.000000e+00> : vector<16xf32>
    %384 = vector.multi_reduction <add>, %383, %cst_144 [1] : vector<16x32xf32> to vector<16xf32>
    %385 = vector.shape_cast %384 : vector<16xf32> to vector<16x1xf32>
    %cst_145 = arith.constant 3.200000e+01 : f32
    %386 = vector.broadcast %cst_145 : f32 to vector<16x1xf32>
    %387 = arith.divf %385, %386 : vector<16x1xf32>
    %388 = vector.broadcast %380 : vector<16x1xf32> to vector<16x32xf32>
    %389 = arith.subf %374, %388 : vector<16x32xf32>
    %cst_146 = arith.constant 9.99999974E-6 : f32
    %390 = vector.broadcast %cst_146 : f32 to vector<16x1xf32>
    %391 = arith.addf %387, %390 : vector<16x1xf32>
    %392 = math.rsqrt %391 : vector<16x1xf32>
    %393 = vector.broadcast %392 : vector<16x1xf32> to vector<16x32xf32>
    %394 = arith.mulf %389, %393 : vector<16x32xf32>
    %395 = vector.broadcast %375 : vector<1x32xf32> to vector<16x32xf32>
    %396 = arith.mulf %394, %395 : vector<16x32xf32>
    %397 = vector.broadcast %376 : vector<1x32xf32> to vector<16x32xf32>
    %398 = arith.addf %396, %397 : vector<16x32xf32>
    %c0_147 = arith.constant 0 : index
    %c0_148 = arith.constant 0 : index
    %c0_149 = arith.constant 0 : index
    %399 = vector.load %arg16[%c0_147, %c0_148, %c0_149] : memref<2x32x64xf32, #tpu.memory_space<vmem>>, vector<1x32x64xf32>
    %400 = vector.shape_cast %399 : vector<1x32x64xf32> to vector<32x64xf32>
    %cst_150 = arith.constant dense<0.000000e+00> : vector<16x64xf32>
    %401 = tpu.matmul %398, %400, %cst_150 {dimension_numbers = #tpu.dot_dimension_numbers<[1], [0], [0], [1], [0, 0, 1, 1], [], []>} : vector<16x32xf32>, vector<32x64xf32>, vector<16x64xf32> -> vector<16x64xf32>
    %c0_151 = arith.constant 0 : index
    %c0_152 = arith.constant 0 : index
    %c0_153 = arith.constant 0 : index
    %402 = vector.load %arg19[%c0_151, %c0_152, %c0_153] : memref<2x1x64xf32, #tpu.memory_space<vmem>>, vector<1x1x64xf32>
    %403 = vector.shape_cast %402 : vector<1x1x64xf32> to vector<1x64xf32>
    %404 = vector.broadcast %403 : vector<1x64xf32> to vector<16x64xf32>
    %405 = arith.addf %401, %404 : vector<16x64xf32>
    %cst_154 = arith.constant 0.000000e+00 : f32
    %406 = vector.broadcast %cst_154 : f32 to vector<16x64xf32>
    %407 = arith.maximumf %405, %406 : vector<16x64xf32>
    %c0_155 = arith.constant 0 : index
    %c0_156 = arith.constant 0 : index
    %c0_157 = arith.constant 0 : index
    %408 = vector.load %arg17[%c0_155, %c0_156, %c0_157] : memref<2x64x32xf32, #tpu.memory_space<vmem>>, vector<1x64x32xf32>
    %409 = vector.shape_cast %408 : vector<1x64x32xf32> to vector<64x32xf32>
    %cst_158 = arith.constant dense<0.000000e+00> : vector<16x32xf32>
    %410 = tpu.matmul %407, %409, %cst_158 {dimension_numbers = #tpu.dot_dimension_numbers<[1], [0], [0], [1], [0, 0, 1, 1], [], []>} : vector<16x64xf32>, vector<64x32xf32>, vector<16x32xf32> -> vector<16x32xf32>
    %411 = vector.extract_strided_slice %235 {offsets = [10, 0], sizes = [1, 32], strides = [1, 1]} : vector<13x32xf32> to vector<1x32xf32>
    %412 = vector.broadcast %411 : vector<1x32xf32> to vector<16x32xf32>
    %413 = arith.addf %410, %412 : vector<16x32xf32>
    %414 = arith.addf %398, %413 : vector<16x32xf32>
    %415 = vector.extract_strided_slice %235 {offsets = [11, 0], sizes = [1, 32], strides = [1, 1]} : vector<13x32xf32> to vector<1x32xf32>
    %416 = vector.extract_strided_slice %235 {offsets = [12, 0], sizes = [1, 32], strides = [1, 1]} : vector<13x32xf32> to vector<1x32xf32>
    %cst_159 = arith.constant dense<0.000000e+00> : vector<16xf32>
    %417 = vector.multi_reduction <add>, %414, %cst_159 [1] : vector<16x32xf32> to vector<16xf32>
    %418 = vector.shape_cast %417 : vector<16xf32> to vector<16x1xf32>
    %cst_160 = arith.constant 3.200000e+01 : f32
    %419 = vector.broadcast %cst_160 : f32 to vector<16x1xf32>
    %420 = arith.divf %418, %419 : vector<16x1xf32>
    %421 = vector.broadcast %420 : vector<16x1xf32> to vector<16x32xf32>
    %422 = arith.subf %414, %421 : vector<16x32xf32>
    %423 = arith.mulf %422, %422 : vector<16x32xf32>
    %cst_161 = arith.constant dense<0.000000e+00> : vector<16xf32>
    %424 = vector.multi_reduction <add>, %423, %cst_161 [1] : vector<16x32xf32> to vector<16xf32>
    %425 = vector.shape_cast %424 : vector<16xf32> to vector<16x1xf32>
    %cst_162 = arith.constant 3.200000e+01 : f32
    %426 = vector.broadcast %cst_162 : f32 to vector<16x1xf32>
    %427 = arith.divf %425, %426 : vector<16x1xf32>
    %428 = vector.broadcast %420 : vector<16x1xf32> to vector<16x32xf32>
    %429 = arith.subf %414, %428 : vector<16x32xf32>
    %cst_163 = arith.constant 9.99999974E-6 : f32
    %430 = vector.broadcast %cst_163 : f32 to vector<16x1xf32>
    %431 = arith.addf %427, %430 : vector<16x1xf32>
    %432 = math.rsqrt %431 : vector<16x1xf32>
    %433 = vector.broadcast %432 : vector<16x1xf32> to vector<16x32xf32>
    %434 = arith.mulf %429, %433 : vector<16x32xf32>
    %435 = vector.broadcast %415 : vector<1x32xf32> to vector<16x32xf32>
    %436 = arith.mulf %434, %435 : vector<16x32xf32>
    %437 = vector.broadcast %416 : vector<1x32xf32> to vector<16x32xf32>
    %438 = arith.addf %436, %437 : vector<16x32xf32>
    %c1_164 = arith.constant 1 : index
    %c0_165 = arith.constant 0 : index
    %c0_166 = arith.constant 0 : index
    %439 = vector.load %arg18[%c1_164, %c0_165, %c0_166] : memref<2x13x32xf32, #tpu.memory_space<vmem>>, vector<1x13x32xf32>
    %440 = vector.shape_cast %439 : vector<1x13x32xf32> to vector<13x32xf32>
    %c1_167 = arith.constant 1 : index
    %c0_168 = arith.constant 0 : index
    %c0_169 = arith.constant 0 : index
    %441 = vector.load %arg12[%c1_167, %c0_168, %c0_169] : memref<2x32x96xf32, #tpu.memory_space<vmem>>, vector<1x32x96xf32>
    %442 = vector.shape_cast %441 : vector<1x32x96xf32> to vector<32x96xf32>
    %cst_170 = arith.constant dense<0.000000e+00> : vector<16x96xf32>
    %443 = tpu.matmul %438, %442, %cst_170 {dimension_numbers = #tpu.dot_dimension_numbers<[1], [0], [0], [1], [0, 0, 1, 1], [], []>} : vector<16x32xf32>, vector<32x96xf32>, vector<16x96xf32> -> vector<16x96xf32>
    %444 = vector.extract_strided_slice %443 {offsets = [0, 0], sizes = [16, 32], strides = [1, 1]} : vector<16x96xf32> to vector<16x32xf32>
    %445 = vector.extract_strided_slice %440 {offsets = [0, 0], sizes = [1, 32], strides = [1, 1]} : vector<13x32xf32> to vector<1x32xf32>
    %446 = vector.broadcast %445 : vector<1x32xf32> to vector<16x32xf32>
    %447 = arith.addf %444, %446 : vector<16x32xf32>
    %cst_171 = arith.constant 0.353553385 : f32
    %448 = vector.broadcast %cst_171 : f32 to vector<16x32xf32>
    %449 = arith.mulf %447, %448 : vector<16x32xf32>
    %450 = vector.extract_strided_slice %443 {offsets = [0, 32], sizes = [16, 32], strides = [1, 1]} : vector<16x96xf32> to vector<16x32xf32>
    %451 = vector.extract_strided_slice %440 {offsets = [1, 0], sizes = [1, 32], strides = [1, 1]} : vector<13x32xf32> to vector<1x32xf32>
    %452 = vector.broadcast %451 : vector<1x32xf32> to vector<16x32xf32>
    %453 = arith.addf %450, %452 : vector<16x32xf32>
    %454 = vector.extract_strided_slice %443 {offsets = [0, 64], sizes = [16, 32], strides = [1, 1]} : vector<16x96xf32> to vector<16x32xf32>
    %455 = vector.extract_strided_slice %440 {offsets = [2, 0], sizes = [1, 32], strides = [1, 1]} : vector<13x32xf32> to vector<1x32xf32>
    %456 = vector.broadcast %455 : vector<1x32xf32> to vector<16x32xf32>
    %457 = arith.addf %454, %456 : vector<16x32xf32>
    %458 = vector.extract_strided_slice %449 {offsets = [0, 0], sizes = [16, 8], strides = [1, 1]} : vector<16x32xf32> to vector<16x8xf32>
    %459 = vector.extract_strided_slice %453 {offsets = [0, 0], sizes = [16, 8], strides = [1, 1]} : vector<16x32xf32> to vector<16x8xf32>
    %cst_172 = arith.constant dense<0.000000e+00> : vector<16x16xf32>
    %460 = tpu.matmul %458, %459, %cst_172 {dimension_numbers = #tpu.dot_dimension_numbers<[1], [1], [0], [0], [0, 0, 1, 0], [], []>} : vector<16x8xf32>, vector<16x8xf32>, vector<16x16xf32> -> vector<16x16xf32>
    %cst_173 = arith.constant -1.000000e+09 : f32
    %461 = vector.broadcast %cst_173 : f32 to vector<16x16xf32>
    %462 = arith.select %232, %460, %461 : vector<16x16xi1>, vector<16x16xf32>
    %cst_174 = arith.constant -1.000000e+30 : f32
    %463 = vector.broadcast %cst_174 : f32 to vector<16x16xf32>
    %464 = arith.select %224, %462, %463 : vector<16x16xi1>, vector<16x16xf32>
    %cst_175 = arith.constant dense<0xFF800000> : vector<16xf32>
    %465 = vector.multi_reduction <maximumf>, %464, %cst_175 [1] : vector<16x16xf32> to vector<16xf32>
    %466 = vector.shape_cast %465 : vector<16xf32> to vector<16x1xf32>
    %467 = vector.broadcast %466 : vector<16x1xf32> to vector<16x16xf32>
    %468 = arith.subf %464, %467 : vector<16x16xf32>
    %469 = math.exp %468 : vector<16x16xf32>
    %cst_176 = arith.constant dense<0.000000e+00> : vector<16xf32>
    %470 = vector.multi_reduction <add>, %469, %cst_176 [1] : vector<16x16xf32> to vector<16xf32>
    %471 = vector.shape_cast %470 : vector<16xf32> to vector<16x1xf32>
    %472 = tpu.reciprocal %471 {approx = true} : vector<16x1xf32> -> vector<16x1xf32>
    %473 = vector.broadcast %472 : vector<16x1xf32> to vector<16x16xf32>
    %474 = arith.mulf %469, %473 : vector<16x16xf32>
    %475 = vector.extract_strided_slice %457 {offsets = [0, 0], sizes = [16, 8], strides = [1, 1]} : vector<16x32xf32> to vector<16x8xf32>
    %cst_177 = arith.constant dense<0.000000e+00> : vector<16x8xf32>
    %476 = tpu.matmul %474, %475, %cst_177 {dimension_numbers = #tpu.dot_dimension_numbers<[1], [0], [0], [1], [0, 0, 1, 1], [], []>} : vector<16x16xf32>, vector<16x8xf32>, vector<16x8xf32> -> vector<16x8xf32>
    %477 = vector.extract_strided_slice %449 {offsets = [0, 8], sizes = [16, 8], strides = [1, 1]} : vector<16x32xf32> to vector<16x8xf32>
    %478 = vector.extract_strided_slice %453 {offsets = [0, 8], sizes = [16, 8], strides = [1, 1]} : vector<16x32xf32> to vector<16x8xf32>
    %cst_178 = arith.constant dense<0.000000e+00> : vector<16x16xf32>
    %479 = tpu.matmul %477, %478, %cst_178 {dimension_numbers = #tpu.dot_dimension_numbers<[1], [1], [0], [0], [0, 0, 1, 0], [], []>} : vector<16x8xf32>, vector<16x8xf32>, vector<16x16xf32> -> vector<16x16xf32>
    %cst_179 = arith.constant -1.000000e+09 : f32
    %480 = vector.broadcast %cst_179 : f32 to vector<16x16xf32>
    %481 = arith.select %232, %479, %480 : vector<16x16xi1>, vector<16x16xf32>
    %cst_180 = arith.constant -1.000000e+30 : f32
    %482 = vector.broadcast %cst_180 : f32 to vector<16x16xf32>
    %483 = arith.select %224, %481, %482 : vector<16x16xi1>, vector<16x16xf32>
    %cst_181 = arith.constant dense<0xFF800000> : vector<16xf32>
    %484 = vector.multi_reduction <maximumf>, %483, %cst_181 [1] : vector<16x16xf32> to vector<16xf32>
    %485 = vector.shape_cast %484 : vector<16xf32> to vector<16x1xf32>
    %486 = vector.broadcast %485 : vector<16x1xf32> to vector<16x16xf32>
    %487 = arith.subf %483, %486 : vector<16x16xf32>
    %488 = math.exp %487 : vector<16x16xf32>
    %cst_182 = arith.constant dense<0.000000e+00> : vector<16xf32>
    %489 = vector.multi_reduction <add>, %488, %cst_182 [1] : vector<16x16xf32> to vector<16xf32>
    %490 = vector.shape_cast %489 : vector<16xf32> to vector<16x1xf32>
    %491 = tpu.reciprocal %490 {approx = true} : vector<16x1xf32> -> vector<16x1xf32>
    %492 = vector.broadcast %491 : vector<16x1xf32> to vector<16x16xf32>
    %493 = arith.mulf %488, %492 : vector<16x16xf32>
    %494 = vector.extract_strided_slice %457 {offsets = [0, 8], sizes = [16, 8], strides = [1, 1]} : vector<16x32xf32> to vector<16x8xf32>
    %cst_183 = arith.constant dense<0.000000e+00> : vector<16x8xf32>
    %495 = tpu.matmul %493, %494, %cst_183 {dimension_numbers = #tpu.dot_dimension_numbers<[1], [0], [0], [1], [0, 0, 1, 1], [], []>} : vector<16x16xf32>, vector<16x8xf32>, vector<16x8xf32> -> vector<16x8xf32>
    %496 = vector.extract_strided_slice %449 {offsets = [0, 16], sizes = [16, 8], strides = [1, 1]} : vector<16x32xf32> to vector<16x8xf32>
    %497 = vector.extract_strided_slice %453 {offsets = [0, 16], sizes = [16, 8], strides = [1, 1]} : vector<16x32xf32> to vector<16x8xf32>
    %cst_184 = arith.constant dense<0.000000e+00> : vector<16x16xf32>
    %498 = tpu.matmul %496, %497, %cst_184 {dimension_numbers = #tpu.dot_dimension_numbers<[1], [1], [0], [0], [0, 0, 1, 0], [], []>} : vector<16x8xf32>, vector<16x8xf32>, vector<16x16xf32> -> vector<16x16xf32>
    %cst_185 = arith.constant -1.000000e+09 : f32
    %499 = vector.broadcast %cst_185 : f32 to vector<16x16xf32>
    %500 = arith.select %232, %498, %499 : vector<16x16xi1>, vector<16x16xf32>
    %cst_186 = arith.constant -1.000000e+30 : f32
    %501 = vector.broadcast %cst_186 : f32 to vector<16x16xf32>
    %502 = arith.select %224, %500, %501 : vector<16x16xi1>, vector<16x16xf32>
    %cst_187 = arith.constant dense<0xFF800000> : vector<16xf32>
    %503 = vector.multi_reduction <maximumf>, %502, %cst_187 [1] : vector<16x16xf32> to vector<16xf32>
    %504 = vector.shape_cast %503 : vector<16xf32> to vector<16x1xf32>
    %505 = vector.broadcast %504 : vector<16x1xf32> to vector<16x16xf32>
    %506 = arith.subf %502, %505 : vector<16x16xf32>
    %507 = math.exp %506 : vector<16x16xf32>
    %cst_188 = arith.constant dense<0.000000e+00> : vector<16xf32>
    %508 = vector.multi_reduction <add>, %507, %cst_188 [1] : vector<16x16xf32> to vector<16xf32>
    %509 = vector.shape_cast %508 : vector<16xf32> to vector<16x1xf32>
    %510 = tpu.reciprocal %509 {approx = true} : vector<16x1xf32> -> vector<16x1xf32>
    %511 = vector.broadcast %510 : vector<16x1xf32> to vector<16x16xf32>
    %512 = arith.mulf %507, %511 : vector<16x16xf32>
    %513 = vector.extract_strided_slice %457 {offsets = [0, 16], sizes = [16, 8], strides = [1, 1]} : vector<16x32xf32> to vector<16x8xf32>
    %cst_189 = arith.constant dense<0.000000e+00> : vector<16x8xf32>
    %514 = tpu.matmul %512, %513, %cst_189 {dimension_numbers = #tpu.dot_dimension_numbers<[1], [0], [0], [1], [0, 0, 1, 1], [], []>} : vector<16x16xf32>, vector<16x8xf32>, vector<16x8xf32> -> vector<16x8xf32>
    %515 = vector.extract_strided_slice %449 {offsets = [0, 24], sizes = [16, 8], strides = [1, 1]} : vector<16x32xf32> to vector<16x8xf32>
    %516 = vector.extract_strided_slice %453 {offsets = [0, 24], sizes = [16, 8], strides = [1, 1]} : vector<16x32xf32> to vector<16x8xf32>
    %cst_190 = arith.constant dense<0.000000e+00> : vector<16x16xf32>
    %517 = tpu.matmul %515, %516, %cst_190 {dimension_numbers = #tpu.dot_dimension_numbers<[1], [1], [0], [0], [0, 0, 1, 0], [], []>} : vector<16x8xf32>, vector<16x8xf32>, vector<16x16xf32> -> vector<16x16xf32>
    %cst_191 = arith.constant -1.000000e+09 : f32
    %518 = vector.broadcast %cst_191 : f32 to vector<16x16xf32>
    %519 = arith.select %232, %517, %518 : vector<16x16xi1>, vector<16x16xf32>
    %cst_192 = arith.constant -1.000000e+30 : f32
    %520 = vector.broadcast %cst_192 : f32 to vector<16x16xf32>
    %521 = arith.select %224, %519, %520 : vector<16x16xi1>, vector<16x16xf32>
    %cst_193 = arith.constant dense<0xFF800000> : vector<16xf32>
    %522 = vector.multi_reduction <maximumf>, %521, %cst_193 [1] : vector<16x16xf32> to vector<16xf32>
    %523 = vector.shape_cast %522 : vector<16xf32> to vector<16x1xf32>
    %524 = vector.broadcast %523 : vector<16x1xf32> to vector<16x16xf32>
    %525 = arith.subf %521, %524 : vector<16x16xf32>
    %526 = math.exp %525 : vector<16x16xf32>
    %cst_194 = arith.constant dense<0.000000e+00> : vector<16xf32>
    %527 = vector.multi_reduction <add>, %526, %cst_194 [1] : vector<16x16xf32> to vector<16xf32>
    %528 = vector.shape_cast %527 : vector<16xf32> to vector<16x1xf32>
    %529 = tpu.reciprocal %528 {approx = true} : vector<16x1xf32> -> vector<16x1xf32>
    %530 = vector.broadcast %529 : vector<16x1xf32> to vector<16x16xf32>
    %531 = arith.mulf %526, %530 : vector<16x16xf32>
    %532 = vector.extract_strided_slice %457 {offsets = [0, 24], sizes = [16, 8], strides = [1, 1]} : vector<16x32xf32> to vector<16x8xf32>
    %cst_195 = arith.constant dense<0.000000e+00> : vector<16x8xf32>
    %533 = tpu.matmul %531, %532, %cst_195 {dimension_numbers = #tpu.dot_dimension_numbers<[1], [0], [0], [1], [0, 0, 1, 1], [], []>} : vector<16x16xf32>, vector<16x8xf32>, vector<16x8xf32> -> vector<16x8xf32>
    %534 = tpu.concatenate %476, %495, %514, %533 in 1 : vector<16x8xf32>, vector<16x8xf32>, vector<16x8xf32>, vector<16x8xf32> -> vector<16x32xf32>
    %c1_196 = arith.constant 1 : index
    %c0_197 = arith.constant 0 : index
    %c0_198 = arith.constant 0 : index
    %535 = vector.load %arg13[%c1_196, %c0_197, %c0_198] : memref<2x32x32xf32, #tpu.memory_space<vmem>>, vector<1x32x32xf32>
    %536 = vector.shape_cast %535 : vector<1x32x32xf32> to vector<32x32xf32>
    %cst_199 = arith.constant dense<0.000000e+00> : vector<16x32xf32>
    %537 = tpu.matmul %534, %536, %cst_199 {dimension_numbers = #tpu.dot_dimension_numbers<[1], [0], [0], [1], [0, 0, 1, 1], [], []>} : vector<16x32xf32>, vector<32x32xf32>, vector<16x32xf32> -> vector<16x32xf32>
    %538 = vector.extract_strided_slice %440 {offsets = [3, 0], sizes = [1, 32], strides = [1, 1]} : vector<13x32xf32> to vector<1x32xf32>
    %539 = vector.broadcast %538 : vector<1x32xf32> to vector<16x32xf32>
    %540 = arith.addf %537, %539 : vector<16x32xf32>
    %541 = arith.addf %438, %540 : vector<16x32xf32>
    %542 = vector.extract_strided_slice %440 {offsets = [4, 0], sizes = [1, 32], strides = [1, 1]} : vector<13x32xf32> to vector<1x32xf32>
    %543 = vector.extract_strided_slice %440 {offsets = [5, 0], sizes = [1, 32], strides = [1, 1]} : vector<13x32xf32> to vector<1x32xf32>
    %cst_200 = arith.constant dense<0.000000e+00> : vector<16xf32>
    %544 = vector.multi_reduction <add>, %541, %cst_200 [1] : vector<16x32xf32> to vector<16xf32>
    %545 = vector.shape_cast %544 : vector<16xf32> to vector<16x1xf32>
    %cst_201 = arith.constant 3.200000e+01 : f32
    %546 = vector.broadcast %cst_201 : f32 to vector<16x1xf32>
    %547 = arith.divf %545, %546 : vector<16x1xf32>
    %548 = vector.broadcast %547 : vector<16x1xf32> to vector<16x32xf32>
    %549 = arith.subf %541, %548 : vector<16x32xf32>
    %550 = arith.mulf %549, %549 : vector<16x32xf32>
    %cst_202 = arith.constant dense<0.000000e+00> : vector<16xf32>
    %551 = vector.multi_reduction <add>, %550, %cst_202 [1] : vector<16x32xf32> to vector<16xf32>
    %552 = vector.shape_cast %551 : vector<16xf32> to vector<16x1xf32>
    %cst_203 = arith.constant 3.200000e+01 : f32
    %553 = vector.broadcast %cst_203 : f32 to vector<16x1xf32>
    %554 = arith.divf %552, %553 : vector<16x1xf32>
    %555 = vector.broadcast %547 : vector<16x1xf32> to vector<16x32xf32>
    %556 = arith.subf %541, %555 : vector<16x32xf32>
    %cst_204 = arith.constant 9.99999974E-6 : f32
    %557 = vector.broadcast %cst_204 : f32 to vector<16x1xf32>
    %558 = arith.addf %554, %557 : vector<16x1xf32>
    %559 = math.rsqrt %558 : vector<16x1xf32>
    %560 = vector.broadcast %559 : vector<16x1xf32> to vector<16x32xf32>
    %561 = arith.mulf %556, %560 : vector<16x32xf32>
    %562 = vector.broadcast %542 : vector<1x32xf32> to vector<16x32xf32>
    %563 = arith.mulf %561, %562 : vector<16x32xf32>
    %564 = vector.broadcast %543 : vector<1x32xf32> to vector<16x32xf32>
    %565 = arith.addf %563, %564 : vector<16x32xf32>
    %c1_205 = arith.constant 1 : index
    %c0_206 = arith.constant 0 : index
    %c0_207 = arith.constant 0 : index
    %566 = vector.load %arg14[%c1_205, %c0_206, %c0_207] : memref<2x32x32xf32, #tpu.memory_space<vmem>>, vector<1x32x32xf32>
    %567 = vector.shape_cast %566 : vector<1x32x32xf32> to vector<32x32xf32>
    %cst_208 = arith.constant dense<0.000000e+00> : vector<2x32xf32>
    %568 = tpu.matmul %193, %567, %cst_208 {dimension_numbers = #tpu.dot_dimension_numbers<[1], [0], [0], [1], [0, 0, 1, 1], [], []>} : vector<2x32xf32>, vector<32x32xf32>, vector<2x32xf32> -> vector<2x32xf32>
    %569 = vector.extract_strided_slice %440 {offsets = [6, 0], sizes = [1, 32], strides = [1, 1]} : vector<13x32xf32> to vector<1x32xf32>
    %570 = vector.broadcast %569 : vector<1x32xf32> to vector<2x32xf32>
    %571 = arith.addf %568, %570 : vector<2x32xf32>
    %c1_209 = arith.constant 1 : index
    %c0_210 = arith.constant 0 : index
    %c0_211 = arith.constant 0 : index
    %572 = vector.load %arg15[%c1_209, %c0_210, %c0_211] : memref<2x32x32xf32, #tpu.memory_space<vmem>>, vector<1x32x32xf32>
    %573 = vector.shape_cast %572 : vector<1x32x32xf32> to vector<32x32xf32>
    %cst_212 = arith.constant dense<0.000000e+00> : vector<2x32xf32>
    %574 = tpu.matmul %571, %573, %cst_212 {dimension_numbers = #tpu.dot_dimension_numbers<[1], [0], [0], [1], [0, 0, 1, 1], [], []>} : vector<2x32xf32>, vector<32x32xf32>, vector<2x32xf32> -> vector<2x32xf32>
    %575 = vector.extract_strided_slice %440 {offsets = [7, 0], sizes = [1, 32], strides = [1, 1]} : vector<13x32xf32> to vector<1x32xf32>
    %576 = vector.broadcast %575 : vector<1x32xf32> to vector<2x32xf32>
    %577 = arith.addf %574, %576 : vector<2x32xf32>
    %cst_213 = arith.constant dense<0.000000e+00> : vector<16x32xf32>
    %578 = tpu.matmul %207, %577, %cst_213 {dimension_numbers = #tpu.dot_dimension_numbers<[1], [0], [0], [1], [0, 0, 1, 1], [], []>} : vector<16x2xf32>, vector<2x32xf32>, vector<16x32xf32> -> vector<16x32xf32>
    %579 = arith.addf %565, %578 : vector<16x32xf32>
    %580 = vector.extract_strided_slice %440 {offsets = [8, 0], sizes = [1, 32], strides = [1, 1]} : vector<13x32xf32> to vector<1x32xf32>
    %581 = vector.extract_strided_slice %440 {offsets = [9, 0], sizes = [1, 32], strides = [1, 1]} : vector<13x32xf32> to vector<1x32xf32>
    %cst_214 = arith.constant dense<0.000000e+00> : vector<16xf32>
    %582 = vector.multi_reduction <add>, %579, %cst_214 [1] : vector<16x32xf32> to vector<16xf32>
    %583 = vector.shape_cast %582 : vector<16xf32> to vector<16x1xf32>
    %cst_215 = arith.constant 3.200000e+01 : f32
    %584 = vector.broadcast %cst_215 : f32 to vector<16x1xf32>
    %585 = arith.divf %583, %584 : vector<16x1xf32>
    %586 = vector.broadcast %585 : vector<16x1xf32> to vector<16x32xf32>
    %587 = arith.subf %579, %586 : vector<16x32xf32>
    %588 = arith.mulf %587, %587 : vector<16x32xf32>
    %cst_216 = arith.constant dense<0.000000e+00> : vector<16xf32>
    %589 = vector.multi_reduction <add>, %588, %cst_216 [1] : vector<16x32xf32> to vector<16xf32>
    %590 = vector.shape_cast %589 : vector<16xf32> to vector<16x1xf32>
    %cst_217 = arith.constant 3.200000e+01 : f32
    %591 = vector.broadcast %cst_217 : f32 to vector<16x1xf32>
    %592 = arith.divf %590, %591 : vector<16x1xf32>
    %593 = vector.broadcast %585 : vector<16x1xf32> to vector<16x32xf32>
    %594 = arith.subf %579, %593 : vector<16x32xf32>
    %cst_218 = arith.constant 9.99999974E-6 : f32
    %595 = vector.broadcast %cst_218 : f32 to vector<16x1xf32>
    %596 = arith.addf %592, %595 : vector<16x1xf32>
    %597 = math.rsqrt %596 : vector<16x1xf32>
    %598 = vector.broadcast %597 : vector<16x1xf32> to vector<16x32xf32>
    %599 = arith.mulf %594, %598 : vector<16x32xf32>
    %600 = vector.broadcast %580 : vector<1x32xf32> to vector<16x32xf32>
    %601 = arith.mulf %599, %600 : vector<16x32xf32>
    %602 = vector.broadcast %581 : vector<1x32xf32> to vector<16x32xf32>
    %603 = arith.addf %601, %602 : vector<16x32xf32>
    %c1_219 = arith.constant 1 : index
    %c0_220 = arith.constant 0 : index
    %c0_221 = arith.constant 0 : index
    %604 = vector.load %arg16[%c1_219, %c0_220, %c0_221] : memref<2x32x64xf32, #tpu.memory_space<vmem>>, vector<1x32x64xf32>
    %605 = vector.shape_cast %604 : vector<1x32x64xf32> to vector<32x64xf32>
    %cst_222 = arith.constant dense<0.000000e+00> : vector<16x64xf32>
    %606 = tpu.matmul %603, %605, %cst_222 {dimension_numbers = #tpu.dot_dimension_numbers<[1], [0], [0], [1], [0, 0, 1, 1], [], []>} : vector<16x32xf32>, vector<32x64xf32>, vector<16x64xf32> -> vector<16x64xf32>
    %c1_223 = arith.constant 1 : index
    %c0_224 = arith.constant 0 : index
    %c0_225 = arith.constant 0 : index
    %607 = vector.load %arg19[%c1_223, %c0_224, %c0_225] : memref<2x1x64xf32, #tpu.memory_space<vmem>>, vector<1x1x64xf32>
    %608 = vector.shape_cast %607 : vector<1x1x64xf32> to vector<1x64xf32>
    %609 = vector.broadcast %608 : vector<1x64xf32> to vector<16x64xf32>
    %610 = arith.addf %606, %609 : vector<16x64xf32>
    %cst_226 = arith.constant 0.000000e+00 : f32
    %611 = vector.broadcast %cst_226 : f32 to vector<16x64xf32>
    %612 = arith.maximumf %610, %611 : vector<16x64xf32>
    %c1_227 = arith.constant 1 : index
    %c0_228 = arith.constant 0 : index
    %c0_229 = arith.constant 0 : index
    %613 = vector.load %arg17[%c1_227, %c0_228, %c0_229] : memref<2x64x32xf32, #tpu.memory_space<vmem>>, vector<1x64x32xf32>
    %614 = vector.shape_cast %613 : vector<1x64x32xf32> to vector<64x32xf32>
    %cst_230 = arith.constant dense<0.000000e+00> : vector<16x32xf32>
    %615 = tpu.matmul %612, %614, %cst_230 {dimension_numbers = #tpu.dot_dimension_numbers<[1], [0], [0], [1], [0, 0, 1, 1], [], []>} : vector<16x64xf32>, vector<64x32xf32>, vector<16x32xf32> -> vector<16x32xf32>
    %616 = vector.extract_strided_slice %440 {offsets = [10, 0], sizes = [1, 32], strides = [1, 1]} : vector<13x32xf32> to vector<1x32xf32>
    %617 = vector.broadcast %616 : vector<1x32xf32> to vector<16x32xf32>
    %618 = arith.addf %615, %617 : vector<16x32xf32>
    %619 = arith.addf %603, %618 : vector<16x32xf32>
    %620 = vector.extract_strided_slice %440 {offsets = [11, 0], sizes = [1, 32], strides = [1, 1]} : vector<13x32xf32> to vector<1x32xf32>
    %621 = vector.extract_strided_slice %440 {offsets = [12, 0], sizes = [1, 32], strides = [1, 1]} : vector<13x32xf32> to vector<1x32xf32>
    %cst_231 = arith.constant dense<0.000000e+00> : vector<16xf32>
    %622 = vector.multi_reduction <add>, %619, %cst_231 [1] : vector<16x32xf32> to vector<16xf32>
    %623 = vector.shape_cast %622 : vector<16xf32> to vector<16x1xf32>
    %cst_232 = arith.constant 3.200000e+01 : f32
    %624 = vector.broadcast %cst_232 : f32 to vector<16x1xf32>
    %625 = arith.divf %623, %624 : vector<16x1xf32>
    %626 = vector.broadcast %625 : vector<16x1xf32> to vector<16x32xf32>
    %627 = arith.subf %619, %626 : vector<16x32xf32>
    %628 = arith.mulf %627, %627 : vector<16x32xf32>
    %cst_233 = arith.constant dense<0.000000e+00> : vector<16xf32>
    %629 = vector.multi_reduction <add>, %628, %cst_233 [1] : vector<16x32xf32> to vector<16xf32>
    %630 = vector.shape_cast %629 : vector<16xf32> to vector<16x1xf32>
    %cst_234 = arith.constant 3.200000e+01 : f32
    %631 = vector.broadcast %cst_234 : f32 to vector<16x1xf32>
    %632 = arith.divf %630, %631 : vector<16x1xf32>
    %633 = vector.broadcast %625 : vector<16x1xf32> to vector<16x32xf32>
    %634 = arith.subf %619, %633 : vector<16x32xf32>
    %cst_235 = arith.constant 9.99999974E-6 : f32
    %635 = vector.broadcast %cst_235 : f32 to vector<16x1xf32>
    %636 = arith.addf %632, %635 : vector<16x1xf32>
    %637 = math.rsqrt %636 : vector<16x1xf32>
    %638 = vector.broadcast %637 : vector<16x1xf32> to vector<16x32xf32>
    %639 = arith.mulf %634, %638 : vector<16x32xf32>
    %640 = vector.broadcast %620 : vector<1x32xf32> to vector<16x32xf32>
    %641 = arith.mulf %639, %640 : vector<16x32xf32>
    %642 = vector.broadcast %621 : vector<1x32xf32> to vector<16x32xf32>
    %643 = arith.addf %641, %642 : vector<16x32xf32>
    %c0_236 = arith.constant 0 : index
    %c0_237 = arith.constant 0 : index
    %644 = vector.load %arg20[%c0_236, %c0_237] : memref<32x128xf32, #tpu.memory_space<vmem>>, vector<32x128xf32>
    %cst_238 = arith.constant dense<0.000000e+00> : vector<16x128xf32>
    %645 = tpu.matmul %643, %644, %cst_238 {dimension_numbers = #tpu.dot_dimension_numbers<[1], [0], [0], [1], [0, 0, 1, 1], [], []>} : vector<16x32xf32>, vector<32x128xf32>, vector<16x128xf32> -> vector<16x128xf32>
    %c0_239 = arith.constant 0 : index
    %c0_240 = arith.constant 0 : index
    %646 = vector.load %arg21[%c0_239, %c0_240] : memref<1x128xf32, #tpu.memory_space<vmem>>, vector<1x128xf32>
    %647 = vector.broadcast %646 : vector<1x128xf32> to vector<16x128xf32>
    %648 = arith.addf %645, %647 : vector<16x128xf32>
    %c0_241 = arith.constant 0 : index
    %c0_242 = arith.constant 0 : index
    %649 = vector.load %arg22[%c0_241, %c0_242] : memref<16x128xf32, #tpu.memory_space<vmem>>, vector<16x128xf32>
    tpu.vector_store %arg22[%c0_241, %c0_242], %648 {strides = array<i32>} : memref<16x128xf32, #tpu.memory_space<vmem>>, vector<16x128xf32>,
    return
  }
  func.func @transform_0(%arg0: i32) -> (i32, i32) {
    %c0_i32 = arith.constant 0 : i32
    %c0_i32_0 = arith.constant 0 : i32
    %c0_i32_1 = arith.constant 0 : i32
    return %c0_i32, %c0_i32_0 : i32, i32
  }
  func.func @transform_1(%arg0: i32) -> (i32, i32) {
    %c0_i32 = arith.constant 0 : i32
    %c0_i32_0 = arith.constant 0 : i32
    %c0_i32_1 = arith.constant 0 : i32
    return %c0_i32, %c0_i32_0 : i32, i32
  }
  func.func @transform_2(%arg0: i32) -> (i32, i32) {
    %c0_i32 = arith.constant 0 : i32
    %c0_i32_0 = arith.constant 0 : i32
    %c0_i32_1 = arith.constant 0 : i32
    return %c0_i32, %c0_i32_0 : i32, i32
  }
  func.func @transform_3(%arg0: i32) -> (i32, i32) {
    %c0_i32 = arith.constant 0 : i32
    %c0_i32_0 = arith.constant 0 : i32
    %c0_i32_1 = arith.constant 0 : i32
    return %c0_i32, %c0_i32_0 : i32, i32
  }
  func.func @transform_4(%arg0: i32) -> (i32, i32) {
    %c0_i32 = arith.constant 0 : i32
    %c0_i32_0 = arith.constant 0 : i32
    %c0_i32_1 = arith.constant 0 : i32
    return %c0_i32, %c0_i32_0 : i32, i32
  }
  func.func @transform_5(%arg0: i32) -> (i32, i32, i32) {
    %c0_i32 = arith.constant 0 : i32
    %c0_i32_0 = arith.constant 0 : i32
    %c0_i32_1 = arith.constant 0 : i32
    %c0_i32_2 = arith.constant 0 : i32
    return %c0_i32, %c0_i32_0, %c0_i32_1 : i32, i32, i32
  }
  func.func @transform_6(%arg0: i32) -> (i32, i32, i32) {
    %c0_i32 = arith.constant 0 : i32
    %c0_i32_0 = arith.constant 0 : i32
    %c0_i32_1 = arith.constant 0 : i32
    %c0_i32_2 = arith.constant 0 : i32
    return %c0_i32, %c0_i32_0, %c0_i32_1 : i32, i32, i32
  }
  func.func @transform_7(%arg0: i32) -> (i32, i32, i32) {
    %c0_i32 = arith.constant 0 : i32
    %c0_i32_0 = arith.constant 0 : i32
    %c0_i32_1 = arith.constant 0 : i32
    %c0_i32_2 = arith.constant 0 : i32
    return %c0_i32, %c0_i32_0, %c0_i32_1 : i32, i32, i32
  }
  func.func @transform_8(%arg0: i32) -> (i32, i32, i32) {
    %c0_i32 = arith.constant 0 : i32
    %c0_i32_0 = arith.constant 0 : i32
    %c0_i32_1 = arith.constant 0 : i32
    %c0_i32_2 = arith.constant 0 : i32
    return %c0_i32, %c0_i32_0, %c0_i32_1 : i32, i32, i32
  }
  func.func @transform_9(%arg0: i32) -> (i32, i32, i32) {
    %c0_i32 = arith.constant 0 : i32
    %c0_i32_0 = arith.constant 0 : i32
    %c0_i32_1 = arith.constant 0 : i32
    %c0_i32_2 = arith.constant 0 : i32
    return %c0_i32, %c0_i32_0, %c0_i32_1 : i32, i32, i32
  }
  func.func @transform_10(%arg0: i32) -> (i32, i32, i32) {
    %c0_i32 = arith.constant 0 : i32
    %c0_i32_0 = arith.constant 0 : i32
    %c0_i32_1 = arith.constant 0 : i32
    %c0_i32_2 = arith.constant 0 : i32
    return %c0_i32, %c0_i32_0, %c0_i32_1 : i32, i32, i32
  }
  func.func @transform_11(%arg0: i32) -> (i32, i32, i32) {
    %c0_i32 = arith.constant 0 : i32
    %c0_i32_0 = arith.constant 0 : i32
    %c0_i32_1 = arith.constant 0 : i32
    %c0_i32_2 = arith.constant 0 : i32
    return %c0_i32, %c0_i32_0, %c0_i32_1 : i32, i32, i32
  }
  func.func @transform_12(%arg0: i32) -> (i32, i32, i32) {
    %c0_i32 = arith.constant 0 : i32
    %c0_i32_0 = arith.constant 0 : i32
    %c0_i32_1 = arith.constant 0 : i32
    %c0_i32_2 = arith.constant 0 : i32
    return %c0_i32, %c0_i32_0, %c0_i32_1 : i32, i32, i32
  }
  func.func @transform_13(%arg0: i32) -> (i32, i32, i32) {
    %c0_i32 = arith.constant 0 : i32
    %c0_i32_0 = arith.constant 0 : i32
    %c0_i32_1 = arith.constant 0 : i32
    %c0_i32_2 = arith.constant 0 : i32
    return %c0_i32, %c0_i32_0, %c0_i32_1 : i32, i32, i32
  }
  func.func @transform_14(%arg0: i32) -> (i32, i32, i32) {
    %c0_i32 = arith.constant 0 : i32
    %c0_i32_0 = arith.constant 0 : i32
    %c0_i32_1 = arith.constant 0 : i32
    %c0_i32_2 = arith.constant 0 : i32
    return %c0_i32, %c0_i32_0, %c0_i32_1 : i32, i32, i32
  }
  func.func @transform_15(%arg0: i32) -> (i32, i32, i32) {
    %c0_i32 = arith.constant 0 : i32
    %c0_i32_0 = arith.constant 0 : i32
    %c0_i32_1 = arith.constant 0 : i32
    %c0_i32_2 = arith.constant 0 : i32
    return %c0_i32, %c0_i32_0, %c0_i32_1 : i32, i32, i32
  }
  func.func @transform_16(%arg0: i32) -> (i32, i32, i32) {
    %c0_i32 = arith.constant 0 : i32
    %c0_i32_0 = arith.constant 0 : i32
    %c0_i32_1 = arith.constant 0 : i32
    %c0_i32_2 = arith.constant 0 : i32
    return %c0_i32, %c0_i32_0, %c0_i32_1 : i32, i32, i32
  }
  func.func @transform_17(%arg0: i32) -> (i32, i32, i32) {
    %c0_i32 = arith.constant 0 : i32
    %c0_i32_0 = arith.constant 0 : i32
    %c0_i32_1 = arith.constant 0 : i32
    %c0_i32_2 = arith.constant 0 : i32
    return %c0_i32, %c0_i32_0, %c0_i32_1 : i32, i32, i32
  }
  func.func @transform_18(%arg0: i32) -> (i32, i32, i32) {
    %c0_i32 = arith.constant 0 : i32
    %c0_i32_0 = arith.constant 0 : i32
    %c0_i32_1 = arith.constant 0 : i32
    %c0_i32_2 = arith.constant 0 : i32
    return %c0_i32, %c0_i32_0, %c0_i32_1 : i32, i32, i32
  }
  func.func @transform_19(%arg0: i32) -> (i32, i32) {
    %c0_i32 = arith.constant 0 : i32
    %c0_i32_0 = arith.constant 0 : i32
    %c0_i32_1 = arith.constant 0 : i32
    return %c0_i32, %c0_i32_0 : i32, i32
  }
  func.func @transform_20(%arg0: i32) -> (i32, i32) {
    %c0_i32 = arith.constant 0 : i32
    %c0_i32_0 = arith.constant 0 : i32
    %c0_i32_1 = arith.constant 0 : i32
    return %c0_i32, %c0_i32_0 : i32, i32
  }
  func.func @transform_21(%arg0: i32) -> (i32, i32) {
    %c0_i32 = arith.constant 0 : i32
    %c0_i32_0 = arith.constant 0 : i32
    %c0_i32_1 = arith.constant 0 : i32
    return %c0_i32, %c0_i32_0 : i32, i32
  }
}

</mosaic_0001>

<bundles_post_ra>
// kernel: transformer_forward.1
= control target key start
LH: loop header
LB: loop body
LE: loop exit
PB: predicated region body
PF: predicated region fallthrough
CT: control target
= control target key end

     0   :  { %vm172_vm0 = vcmask 1040384   ;;  %vm96_vm1 = vcmask 72704   ;;  %vm424_vm11 = vcmask 588800   ;;  %vm474_vm12 = vcmask 261120   ;;  %s4264_s28 = smov 8   ;;  %s2988_s23 = smov 24   ;;  %s4234_s1 = inlined_call_operand.vmem [shape: f32[9,32], index: 1, kind: input, shape index: {}]   ;;  %s4235_s0 = inlined_call_operand.vmem [shape: f32[200,9], index: 0, kind: input, shape index: {}]   ;;  %s4236_s2 = inlined_call_operand.vmem [shape: f32[4,32], index: 2, kind: input, shape index: {}]   ;;  %s4237_s5 = inlined_call_operand.vmem [shape: f32[2,32,32], index: 5, kind: input, shape index: {}]   ;;  %s4238_s6 = inlined_call_operand.vmem [shape: f32[2,32,32], index: 6, kind: input, shape index: {}]   ;;  %s4239_s9 = inlined_call_operand.vmem [shape: f32[2,7,32], index: 9, kind: input, shape index: {}]   ;;  %s4240_s10 = inlined_call_operand.vmem [shape: f32[2,1,64], index: 10, kind: input, shape index: {}]   ;;  %s4241_s7 = inlined_call_operand.vmem [shape: f32[2,32,64], index: 7, kind: input, shape index: {}]   ;;  %s4242_s8 = inlined_call_operand.vmem [shape: f32[2,64,32], index: 8, kind: input, shape index: {}]   ;;  %s4243_s11 = inlined_call_operand.vmem [shape: f32[2,32,96], index: 11, kind: input, shape index: {}]   ;;  %s4244_s17 = inlined_call_operand.vmem [shape: f32[2,13,32], index: 17, kind: input, shape index: {}]   ;;  %s4245_s3 = inlined_call_operand.vmem [shape: f32[16,32], index: 3, kind: input, shape index: {}]   ;;  %s4246_s4 = inlined_call_operand.vmem [shape: f32[16,1], index: 4, kind: input, shape index: {}]   ;;  %s4247_s13 = inlined_call_operand.vmem [shape: f32[2,32,32], index: 13, kind: input, shape index: {}]   ;;  %s4248_s14 = inlined_call_operand.vmem [shape: f32[2,32,32], index: 14, kind: input, shape index: {}]   ;;  %s4249_s12 = inlined_call_operand.vmem [shape: f32[2,32,32], index: 12, kind: input, shape index: {}]   ;;  %s4250_s18 = inlined_call_operand.vmem [shape: f32[2,1,64], index: 18, kind: input, shape index: {}]   ;;  %s4251_s15 = inlined_call_operand.vmem [shape: f32[2,32,64], index: 15, kind: input, shape index: {}]   ;;  %s4252_s16 = inlined_call_operand.vmem [shape: f32[2,64,32], index: 16, kind: input, shape index: {}]   ;;  %s4253_s19 = inlined_call_operand.vmem [shape: f32[32,128], index: 19, kind: input, shape index: {}]   ;;  %s4254_s20 = inlined_call_operand.vmem [shape: f32[1,128], index: 20, kind: input, shape index: {}]   ;;  %s4255_s21 = inlined_call_operand.vmem [shape: f32[16,128], index: 21, kind: output, shape index: {}]  }
   0x1   :  { %4267 = sst [smem:[#allocation2_spill]] %s4234_s1  ;;  %vm527_vm13 = vcmask 254976   ;;  %s4285_s30 = smov 16  }
   0x2   :  { %4268 = sst [smem:[#allocation3_spill]] %s4235_s0 }
   0x3   :  { %4269 = sst [smem:[#allocation4_spill]] %s4236_s2 }
   0x4   :  { %4270 = sst [smem:[#allocation5_spill]] %s4237_s5  ;;  %s4261_s5 = smov 40  }
   0x5   :  { %4271 = sst [smem:[#allocation6_spill]] %s4238_s6 }
   0x6   :  { %4272 = sst [smem:[#allocation7_spill]] %s4239_s9  ;;  %s2973_s9 = smov 32  }
   0x7   :  { %s4273_s26 = sld [smem:[#allocation2_spill]] }
   0x8   :  { %s4274_s1 = sld [smem:[#allocation3_spill]] }
   0x9   :  { %s4275_s25 = sld [smem:[#allocation4_spill]] }
   0xa   :  { %s4276_s27 = sld [smem:[#allocation5_spill]] }
   0xb   :  { %s4277_s0 = sld [smem:[#allocation6_spill]] }
   0xc   :  { %s4278_s6 = sld [smem:[#allocation7_spill]] }
   0xd   :  { %v95_v0 = vld [vmem:[%s4273_s26 + $0x8] sm:$0x1]  ;;  %v94_v1 = vld [vmem:[%s4273_s26] sm:$0xff]  ;;  %s2984_s26 = smov 48  }
   0xe   :  { %2629 = vmatpush.msk.msra.mxu0 %vm172_vm0, %v95_v0  ;;  %v69_v2 = vld [vmem:[%s4274_s1] sm:$0xff]  ;;  %v70_v3 = vld [vmem:[%s4274_s1 + $0x8] sm:$0xff]  ;;  %v71_v4 = vld [vmem:[%s4274_s1 + $0x10] sm:$0xff] }
   0xf   :  { %v72_v5 = vld [vmem:[%s4274_s1 + $0x18] sm:$0xff]  ;;  %v73_v6 = vld [vmem:[%s4274_s1 + $0x20] sm:$0xff]  ;;  %v74_v7 = vld [vmem:[%s4274_s1 + $0x28] sm:$0xff] }
  0x10   :  { %191 = vmatpush.msra.mxu0 %v94_v1  ;;  %v75_v8 = vld [vmem:[%s4274_s1 + $0x30] sm:$0xff]  ;;  %v76_v9 = vld [vmem:[%s4274_s1 + $0x38] sm:$0xff]  ;;  %v77_v10 = vld [vmem:[%s4274_s1 + $0x40] sm:$0xff] }
  0x11   :  { %2630 = vmatmul.msk.f32.vlgmr.msra.gmra.mxu0 %vm96_vm1, %v69_v2  ;;  %v78_v11 = vld [vmem:[%s4274_s1 + $0x48] sm:$0xff]  ;;  %v79_v12 = vld [vmem:[%s4274_s1 + $0x50] sm:$0xff]  ;;  %v80_v13 = vld [vmem:[%s4274_s1 + $0x58] sm:$0xff] }
  0x12   :  { %v81_v14 = vld [vmem:[%s4274_s1 + $0x60] sm:$0xff]  ;;  %v82_v15 = vld [vmem:[%s4274_s1 + $0x68] sm:$0xff]  ;;  %v83_v16 = vld [vmem:[%s4274_s1 + $0x70] sm:$0xff] }
  0x13   :  { %v84_v17 = vld [vmem:[%s4274_s1 + $0x78] sm:$0xff]  ;;  %v85_v19 = vld [vmem:[%s4274_s1 + $0x80] sm:$0xff]  ;;  %v86_v21 = vld [vmem:[%s4274_s1 + $0x88] sm:$0xff] }
  0x14   :  { %v87_v23 = vld [vmem:[%s4274_s1 + $0x90] sm:$0xff]  ;;  %v88_v25 = vld [vmem:[%s4274_s1 + $0x98] sm:$0xff]  ;;  %v89_v27 = vld [vmem:[%s4274_s1 + $0xa0] sm:$0xff] }
  0x15   :  { %v90_v29 = vld [vmem:[%s4274_s1 + $0xa8] sm:$0xff]  ;;  %v91_v31 = vld [vmem:[%s4274_s1 + $0xb0] sm:$0xff]  ;;  %v92_v33 = vld [vmem:[%s4274_s1 + $0xb8] sm:$0xff] }
  0x16   :  { %v93_v35 = vld [vmem:[%s4274_s1 + $0xc0] sm:$0xff]  ;;  %s2983_s1 = smov 104  }
  0x17   :  { %v68_v37 = vld [vmem:[%s4275_s25] sm:$0xf]  ;;  %s2980_s25 = smov 80  }
  0x18   :  { %v294_v39 = vadd.f32 1e-05, %v68_v37  ;;  %v3224_v50 = vperm.slane %v68_v37, 2  ;;  %v3235_v61 = vperm.slane %v68_v37, 0  ;;  %v3241_v2 = vperm.slane %v68_v37, 1 }
  0x19   :  { %2631 = vmatmul.msk.f32.gmra.mxu0 %vm96_vm1, %v70_v3 }
  0x1a   :  { %2870 = vrsqrt.f32 %v294_v39  ;;  %vm301_vm2 = vweird.f32 %v294_v39 }
  0x20   :  { %v2871_v41 = vpop.eup %2870 }
  0x21   :  { %2632 = vmatmul.msk.f32.gmra.mxu0 %vm96_vm1, %v71_v4  ;;  %v296_v42 = vmul.f32 %v2871_v41, %v294_v39  ;;  %vm302_vm3 = vweird.f32 %v2871_v41 }
  0x22   :  { %vm303_vm4 = vmor %vm301_vm2, %vm302_vm3  ;;  %vm602_vm2 = vcmask 523264  }
  0x23   :  { %v297_v44 = vmul.f32 %v2871_v41, %v296_v42 }
  0x25   :  { %v298_v45 = vmul.f32 0.5, %v297_v44 }
  0x27   :  { %v299_v47 = vsub.f32 1.5, %v298_v45 }
  0x29   :  { %2633 = vmatmul.msk.f32.gmra.mxu0 %vm96_vm1, %v72_v5  ;;  %v300_v48 = vmul.f32 %v2871_v41, %v299_v47 }
  0x2b   :  { %v304_v51 = vsel %vm303_vm4, %v2871_v41, %v300_v48 }
  0x2c   :  { %v3227_v53 = vperm.slane %v304_v51, 3 }
  0x31   :  { %2634 = vmatmul.msk.f32.gmra.mxu0 %vm96_vm1, %v73_v6 }
  0x39   :  { %2635 = vmatmul.msk.f32.gmra.mxu0 %vm96_vm1, %v74_v7 }
  0x41   :  { %2636 = vmatmul.msk.f32.gmra.mxu0 %vm96_vm1, %v75_v8 }
  0x49   :  { %2637 = vmatmul.msk.f32.gmra.mxu0 %vm96_vm1, %v76_v9 }
  0x51   :  { %2638 = vmatmul.msk.f32.gmra.mxu0 %vm96_vm1, %v77_v10 }
  0x59   :  { %2639 = vmatmul.msk.f32.gmra.mxu0 %vm96_vm1, %v78_v11 }
  0x61   :  { %2640 = vmatmul.msk.f32.gmra.mxu0 %vm96_vm1, %v79_v12 }
  0x69   :  { %2641 = vmatmul.msk.f32.gmra.mxu0 %vm96_vm1, %v80_v13 }
  0x71   :  { %2642 = vmatmul.msk.f32.gmra.mxu0 %vm96_vm1, %v81_v14 }
  0x79   :  { %2643 = vmatmul.msk.f32.gmra.mxu0 %vm96_vm1, %v82_v15 }
  0x81   :  { %2644 = vmatmul.msk.f32.gmra.mxu0 %vm96_vm1, %v83_v16 }
  0x89   :  { %2645 = vmatmul.msk.f32.gmra.mxu0 %vm96_vm1, %v84_v17 }
  0x8e   :  { %v3169_v18 = vpop.f32.mrf.mxu0 }
  0x91   :  { %2646 = vmatmul.msk.f32.gmra.mxu0 %vm96_vm1, %v85_v19 }
  0x96   :  { %v3175_v20 = vpop.f32.mrf.mxu0 }
  0x97   :  { %v270_v47 = vsub.f32 %v3175_v20, %v3224_v50 }
  0x99   :  { %2647 = vmatmul.msk.f32.gmra.mxu0 %vm96_vm1, %v86_v21 }
  0x9e   :  { %v3181_v22 = vpop.f32.mrf.mxu0 }
  0xa1   :  { %2648 = vmatmul.msk.f32.gmra.mxu0 %vm96_vm1, %v87_v23 }
  0xa6   :  { %v3187_v24 = vpop.f32.mrf.mxu0 }
  0xa9   :  { %2649 = vmatmul.msk.f32.gmra.mxu0 %vm96_vm1, %v88_v25 }
  0xae   :  { %v3193_v26 = vpop.f32.mrf.mxu0 }
  0xb1   :  { %2650 = vmatmul.msk.f32.gmra.mxu0 %vm96_vm1, %v89_v27 }
  0xb6   :  { %v3199_v28 = vpop.f32.mrf.mxu0 }
  0xb9   :  { %2651 = vmatmul.msk.f32.gmra.mxu0 %vm96_vm1, %v90_v29  ;;  %v274_v29 = vsub.f32 %v3199_v28, %v3224_v50  ;;  %v272_v28 = vsub.f32 %v3187_v24, %v3224_v50 }
  0xbb   :  { %v309_v48 = vmul.f32 %v3227_v53, %v272_v28 }
  0xbe   :  { %v3205_v30 = vpop.f32.mrf.mxu0 }
  0xbf   :  { %v275_v19 = vsub.f32 %v3205_v30, %v3224_v50  ;;  %v273_v30 = vsub.f32 %v3193_v26, %v3224_v50 }
  0xc1   :  { %2652 = vmatmul.msk.f32.gmra.mxu0 %vm96_vm1, %v91_v31  ;;  %v310_v44 = vmul.f32 %v3227_v53, %v273_v30  ;;  %v472_v30 = vld [vmem:[%s4276_s27 + $0x18] sm:$0xff] }
  0xc2   :  { %490 = vmatpush.msra.mxu3 %v472_v30 }
  0xc6   :  { %v3211_v32 = vpop.f32.mrf.mxu0 }
  0xc7   :  { %v276_v12 = vsub.f32 %v3211_v32, %v3224_v50 }
  0xc9   :  { %2653 = vmatmul.msk.f32.gmra.mxu0 %vm96_vm1, %v92_v33  ;;  %v313_v31 = vmul.f32 %v3227_v53, %v276_v12 }
  0xcb   :  { %v339_v26 = vmul.f32 %v3235_v61, %v313_v31 }
  0xcd   :  { %v365_v51 = vadd.f32 %v3241_v2, %v339_v26 }
  0xce   :  { %v217_v34 = vpop.f32.mrf.mxu0 }
  0xcf   :  { %v277_v7 = vsub.f32 %v217_v34, %v3224_v50 }
  0xd1   :  { %2654 = vmatmul.msk.f32.gmra.mxu0 %vm96_vm1, %v93_v35  ;;  %v314_v21 = vmul.f32 %v3227_v53, %v277_v7  ;;  %v312_v35 = vmul.f32 %v3227_v53, %v275_v19 }
  0xd3   :  { %v338_v24 = vmul.f32 %v3235_v61, %v312_v35  ;;  %v471_v35 = vld [vmem:[%s4276_s27 + $0x10] sm:$0xff] }
  0xd4   :  { %491 = vmatpush.msra.mxu3 %v471_v35 }
  0xd6   :  { %v220_v36 = vpop.f32.mrf.mxu0 }
  0xd7   :  { %v278_v3 = vsub.f32 %v220_v36, %v3224_v50 }
  0xd9   :  { %v315_v14 = vmul.f32 %v3227_v53, %v278_v3 }
  0xdb   :  { %v341_v34 = vmul.f32 %v3235_v61, %v315_v14 }
  0xdd   :  { %v367_v42 = vadd.f32 %v3241_v2, %v341_v34 }
  0xde   :  { %v223_v38 = vpop.f32.mrf.mxu0 }
  0xdf   :  { %v279_v62 = vsub.f32 %v223_v38, %v3224_v50  ;;  %v340_v38 = vmul.f32 %v3235_v61, %v314_v21 }
  0xe1   :  { %v316_v8 = vmul.f32 %v3227_v53, %v279_v62  ;;  %v335_v62 = vmul.f32 %v3235_v61, %v309_v48 }
  0xe3   :  { %v342_v27 = vmul.f32 %v3235_v61, %v316_v8 }
  0xe5   :  { %v368_v37 = vadd.f32 %v3241_v2, %v342_v27 }
  0xe6   :  { %v226_v40 = vpop.f32.mrf.mxu0 }
  0xe7   :  { %v280_v58 = vsub.f32 %v226_v40, %v3224_v50  ;;  %v311_v40 = vmul.f32 %v3227_v53, %v274_v29  ;;  %v393_v45 = vmax.f32 %v368_v37, 0.0  ;;  %v2970_v37 = vmov 0.01  }
  0xe9   :  { %v317_v4 = vmul.f32 %v3227_v53, %v280_v58  ;;  %v307_v58 = vmul.f32 %v3227_v53, %v270_v47 }
  0xeb   :  { %v343_v17 = vmul.f32 %v3235_v61, %v317_v4  ;;  %v361_v4 = vadd.f32 %v3241_v2, %v335_v62 }
  0xed   :  { %v369_v33 = vadd.f32 %v3241_v2, %v343_v17 }
  0xee   :  { %v229_v43 = vpop.f32.mrf.mxu0 }
  0xef   :  { %v281_v55 = vsub.f32 %v229_v43, %v3224_v50  ;;  %v394_v41 = vmax.f32 %v369_v33, 0.0  ;;  %v271_v43 = vsub.f32 %v3181_v22, %v3224_v50  ;;  %v269_v22 = vsub.f32 %v3169_v18, %v3224_v50 }
  0xf1   :  { %v318_v63 = vmul.f32 %v3227_v53, %v281_v55  ;;  %v306_v18 = vmul.f32 %v3227_v53, %v269_v22 }
  0xf3   :  { %v344_v11 = vmul.f32 %v3235_v61, %v318_v63  ;;  %v332_v8 = vmul.f32 %v3235_v61, %v306_v18 }
  0xf5   :  { %v370_v25 = vadd.f32 %v3241_v2, %v344_v11  ;;  %v358_v14 = vadd.f32 %v3241_v2, %v332_v8 }
  0xf6   :  { %v232_v46 = vpop.f32.mrf.mxu0 }
  0xf7   :  { %v282_v54 = vsub.f32 %v232_v46, %v3224_v50  ;;  %v395_v36 = vmax.f32 %v370_v25, 0.0  ;;  %v366_v46 = vadd.f32 %v3241_v2, %v340_v38 }
  0xf9   :  { %v319_v59 = vmul.f32 %v3227_v53, %v282_v54  ;;  %v308_v54 = vmul.f32 %v3227_v53, %v271_v43  ;;  %v391_v55 = vmax.f32 %v366_v46, 0.0 }
  0xfb   :  { %v345_v6 = vmul.f32 %v3235_v61, %v319_v59  ;;  %v390_v59 = vmax.f32 %v365_v51, 0.0 }
  0xfd   :  { %v371_v16 = vadd.f32 %v3241_v2, %v345_v6 }
  0xfe   :  { %v235_v49 = vpop.f32.mrf.mxu0 }
  0xff   :  { %v283_v52 = vsub.f32 %v235_v49, %v3224_v50  ;;  %v396_v32 = vmax.f32 %v371_v16, 0.0  ;;  %v392_v49 = vmax.f32 %v367_v42, 0.0  ;;  %v383_v16 = vmax.f32 %v358_v14, 0.0 }
 0x101   :  { %v320_v56 = vmul.f32 %v3227_v53, %v283_v52  ;;  %v337_v52 = vmul.f32 %v3235_v61, %v311_v40 }
 0x103   :  { %v346_v1 = vmul.f32 %v3235_v61, %v320_v56  ;;  %v364_v56 = vadd.f32 %v3241_v2, %v338_v24 }
 0x105   :  { %v372_v10 = vadd.f32 %v3241_v2, %v346_v1  ;;  %v389_v63 = vmax.f32 %v364_v56, 0.0  ;;  %v334_v1 = vmul.f32 %v3235_v61, %v308_v54 }
 0x106   :  { %v238_v57 = vpop.f32.mrf.mxu0 }
 0x107   :  { %v284_v60 = vsub.f32 %v238_v57, %v3224_v50  ;;  %v397_v23 = vmax.f32 %v372_v10, 0.0  ;;  %v336_v57 = vmul.f32 %v3235_v61, %v310_v44  ;;  %v360_v7 = vadd.f32 %v3241_v2, %v334_v1 }
 0x108   :  { %v386_v10 = vmax.f32 %v361_v4, 0.0 }
 0x109   :  { %v321_v0 = vmul.f32 %v3227_v53, %v284_v60  ;;  %v363_v60 = vadd.f32 %v3241_v2, %v337_v52  ;;  %v385_v12 = vmax.f32 %v360_v7, 0.0 }
 0x10b   :  { %v347_v5 = vmul.f32 %v3235_v61, %v321_v0  ;;  %v362_v0 = vadd.f32 %v3241_v2, %v336_v57  ;;  %v388_v3 = vmax.f32 %v363_v60, 0.0 }
 0x10d   :  { %v373_v9 = vadd.f32 %v3241_v2, %v347_v5  ;;  %v333_v5 = vmul.f32 %v3235_v61, %v307_v58  ;;  %v387_v6 = vmax.f32 %v362_v0, 0.0 }
 0x10e   :  { %v3254_v13 = vpop.f32.mrf.mxu0 }
 0x10f   :  { %v398_v15 = vmax.f32 %v373_v9, 0.0  ;;  %v359_v11 = vadd.f32 %v3241_v2, %v333_v5  ;;  %v285_v56 = vsub.f32 %v3254_v13, %v3224_v50 }
 0x111   :  { %428 = vmatpush.msra.mxu1 %v398_v15  ;;  %v384_v15 = vmax.f32 %v359_v11, 0.0 }
 0x113   :  { %429 = vmatpush.msra.mxu1 %v397_v23  ;;  %v408_v23 = vlaneseq }
 0x115   :  { %430 = vmatpush.msra.mxu1 %v396_v32  ;;  %v3310_v25 = vshrl.u32 %v408_v23, 7  ;;  %v3315_v31 = vand.u32 127, %v408_v23 }
 0x116   :  { %v3276_v39 = vpop.f32.mrf.mxu0 }
 0x117   :  { %431 = vmatpush.msra.mxu1 %v395_v36  ;;  %v3313_v27 = vadd.s32 1, %v3310_v25  ;;  %v413_v32 = vmul.u32 100, %v3310_v25  ;;  %v286_v51 = vsub.f32 %v3276_v39, %v3224_v50  ;;  %v412_v5 = vadd.s32 128, %v3315_v31 }
 0x119   :  { %432 = vmatpush.msra.mxu1 %v394_v41  ;;  %v417_v33 = vmul.u32 100, %v3313_v27  ;;  %vm414_vm5 = vcmp.ge.s32.totalorder %v3315_v31, %v413_v32  ;;  %v323_v39 = vmul.f32 %v3227_v53, %v286_v51  ;;  %vm415_vm8 = vcmp.ge.s32.totalorder %v412_v5, %v413_v32  ;;  %v499_v32 = vld [vmem:[%s4277_s0 + $0x8] sm:$0xff] }
 0x11b   :  { %433 = vmatpush.msra.mxu1 %v393_v45  ;;  %vm418_vm6 = vcmp.lt.s32.totalorder %v3315_v31, %v417_v33  ;;  %v349_v4 = vmul.f32 %v3235_v61, %v323_v39  ;;  %vm419_vm9 = vcmp.lt.s32.totalorder %v412_v5, %v417_v33  ;;  %v498_v33 = vld [vmem:[%s4277_s0] sm:$0xff] }
 0x11c   :  { %vm420_vm7 = vmand %vm414_vm5, %vm418_vm6 }
 0x11d   :  { %434 = vmatpush.msra.mxu1 %v392_v49  ;;  %vm421_vm10 = vmand %vm415_vm8, %vm419_vm9 }
 0x11e   :  { %v3296_v20 = vpop.f32.mrf.mxu0 }
 0x11f   :  { %435 = vmatpush.msra.mxu1 %v391_v55  ;;  %v287_v24 = vsub.f32 %v3296_v20, %v3224_v50 }
 0x121   :  { %436 = vmatpush.msra.mxu1 %v390_v59  ;;  %v324_v57 = vmul.f32 %v3227_v53, %v287_v24 }
 0x123   :  { %437 = vmatpush.msra.mxu1 %v389_v63  ;;  %v322_v63 = vmul.f32 %v3227_v53, %v285_v56  ;;  %v350_v13 = vmul.f32 %v3235_v61, %v324_v57  ;;  %v561_v56 = vld [vmem:[%s4241_s7] sm:$0xff]  ;;  %v600_v57 = vld [vmem:[%s4242_s8 + $0x38] sm:$0xff] }
 0x125   :  { %438 = vmatpush.msra.mxu1 %v388_v3  ;;  %v376_v7 = vadd.f32 %v3241_v2, %v350_v13 }
 0x126   :  { %v250_v9 = vpop.f32.mrf.mxu0 }
 0x127   :  { %439 = vmatpush.msra.mxu1 %v387_v6  ;;  %v288_v43 = vsub.f32 %v250_v9, %v3224_v50  ;;  %v375_v9 = vadd.f32 %v3241_v2, %v349_v4 }
 0x129   :  { %440 = vmatpush.msra.mxu1 %v386_v10  ;;  %v325_v52 = vmul.f32 %v3227_v53, %v288_v43  ;;  %v401_v10 = vmax.f32 %v376_v7, 0.0 }
 0x12b   :  { %441 = vmatpush.msra.mxu1 %v385_v12  ;;  %v351_v18 = vmul.f32 %v3235_v61, %v325_v52  ;;  %v400_v12 = vmax.f32 %v375_v9, 0.0  ;;  %v595_v9 = vld [vmem:[%s4242_s8 + $0x10] sm:$0xff] }
 0x12d   :  { %442 = vmatpush.msra.mxu1 %v384_v15  ;;  %v377_v3 = vadd.f32 %v3241_v2, %v351_v18  ;;  %v2971_v15 = vmov 0.0   ;;  %v596_v18 = vld [vmem:[%s4242_s8 + $0x18] sm:$0xff] }
 0x12e   :  { %v253_v17 = vpop.f32.mrf.mxu0 }
 0x12f   :  { %443 = vmatpush.msra.mxu1 %v383_v16  ;;  %v289_v41 = vsub.f32 %v253_v17, %v3224_v50  ;;  %v402_v8 = vmax.f32 %v377_v3, 0.0  ;;  %v423_v16 = vsel %vm421_vm10, 0.01, %v2971_v15  ;;  %v501_v17 = vld [vmem:[%s4277_s0 + $0x18] sm:$0xff] }
 0x130   :  { %2655 = vmatmul.msk.f32.vlgmr.msra.gmra.mxu1 %vm420_vm7, %v2970_v37 }
 0x131   :  { %v326_v47 = vmul.f32 %v3227_v53, %v289_v41 }
 0x133   :  { %v352_v59 = vmul.f32 %v3235_v61, %v326_v47 }
 0x136   :  { %v256_v19 = vpop.f32.mrf.mxu0 }
 0x137   :  { %v290_v38 = vsub.f32 %v256_v19, %v3224_v50  ;;  %v500_v19 = vld [vmem:[%s4277_s0 + $0x10] sm:$0xff] }
 0x139   :  { %v327_v44 = vmul.f32 %v3227_v53, %v290_v38 }
 0x13b   :  { %v353_v55 = vmul.f32 %v3235_v61, %v327_v44 }
 0x13d   :  { %v379_v62 = vadd.f32 %v3241_v2, %v353_v55  ;;  %v562_v55 = vld [vmem:[%s4241_s7 + $0x8] sm:$0xff] }
 0x13e   :  { %v259_v21 = vpop.f32.mrf.mxu0 }
 0x13f   :  { %v291_v36 = vsub.f32 %v259_v21, %v3224_v50  ;;  %v404_v1 = vmax.f32 %v379_v62, 0.0 }
 0x141   :  { %v328_v42 = vmul.f32 %v3227_v53, %v291_v36 }
 0x143   :  { %v354_v49 = vmul.f32 %v3235_v61, %v328_v42  ;;  %v2972_v42 = vmov 32.0  }
 0x144   :  { %2872 = vrcp.f32 %v2972_v42 }
 0x145   :  { %v380_v58 = vadd.f32 %v3241_v2, %v354_v49 }
 0x146   :  { %v262_v29 = vpop.f32.mrf.mxu0 }
 0x147   :  { %v292_v34 = vsub.f32 %v262_v29, %v3224_v50  ;;  %v405_v0 = vmax.f32 %v380_v58, 0.0  ;;  %v598_v58 = vld [vmem:[%s4242_s8 + $0x28] sm:$0xff] }
 0x149   :  { %v329_v28 = vmul.f32 %v3227_v53, %v292_v34  ;;  %v3390_v34 = vld [vmem:[%s4278_s6] sm:$0x7f] }
 0x14a   :  { %v473_v30 = vperm.slane %v3390_v34, 0  ;;  %v502_v37 = vperm.slane %v3390_v34, 1  ;;  %v557_v4 = vperm.slane %v3390_v34, 2  ;;  %v559_v7 = vperm.slane %v3390_v34, 3 }
 0x14b   :  { %v355_v46 = vmul.f32 %v3235_v61, %v329_v28 }
 0x14d   :  { %v381_v54 = vadd.f32 %v3241_v2, %v355_v46 }
 0x14e   :  { %v265_v40 = vpop.f32.mrf.mxu0 }
 0x14f   :  { %v293_v26 = vsub.f32 %v265_v40, %v3224_v50  ;;  %v406_v60 = vmax.f32 %v381_v54, 0.0  ;;  %v378_v50 = vadd.f32 %v3241_v2, %v352_v59  ;;  %v563_v54 = vld [vmem:[%s4241_s7 + $0x10] sm:$0xff] }
 0x151   :  { %v330_v45 = vmul.f32 %v3227_v53, %v293_v26  ;;  %v403_v6 = vmax.f32 %v378_v50, 0.0  ;;  %v348_v53 = vmul.f32 %v3235_v61, %v322_v63  ;;  %v2873_v26 = vpop.eup %2872 }
 0x152   :  { %v532_v43 = vmul.f32 32.0, %v2873_v26  ;;  %vm536_vm14 = vweird.f32 %v2873_v26 }
 0x153   :  { %v356_v48 = vmul.f32 %v3235_v61, %v330_v45  ;;  %v374_v11 = vadd.f32 %v3241_v2, %v348_v53  ;;  %v470_v61 = vld [vmem:[%s4276_s27 + $0x8] sm:$0xff] }
 0x154   :  { %492 = vmatpush.msra.mxu3 %v470_v61  ;;  %v533_v44 = vsub.f32 1.0, %v532_v43 }
 0x155   :  { %v382_v22 = vadd.f32 %v3241_v2, %v356_v48  ;;  %v399_v14 = vmax.f32 %v374_v11, 0.0  ;;  %v469_v2 = vld [vmem:[%s4276_s27] sm:$0xff] }
 0x156   :  { %493 = vmatpush.msra.mxu3 %v469_v2  ;;  %v534_v45 = vmul.f32 %v2873_v26, %v533_v44  ;;  %v593_v11 = vld [vmem:[%s4242_s8] sm:$0xff]  ;;  %v601_v2 = vperm.slane %v3390_v34, 4 }
 0x157   :  { %v407_v20 = vmax.f32 %v382_v22, 0.0  ;;  %v564_v22 = vld [vmem:[%s4241_s7 + $0x18] sm:$0xff] }
 0x158   :  { %518 = vmatpush.msrb.mxu3 %v501_v17  ;;  %v535_v46 = vadd.f32 %v2873_v26, %v534_v45 }
 0x159   :  { %455 = vmatpush.msra.mxu2 %v407_v20  ;;  %v599_v20 = vld [vmem:[%s4242_s8 + $0x30] sm:$0xff] }
 0x15a   :  { %519 = vmatpush.msrb.mxu3 %v500_v19  ;;  %v3396_v24 = vsel %vm536_vm14, %v2873_v26, %v535_v46  ;;  %vm859_vm14 = vcmask 1041408  }
 0x15b   :  { %456 = vmatpush.msra.mxu2 %v406_v60  ;;  %v597_v60 = vld [vmem:[%s4242_s8 + $0x20] sm:$0xff] }
 0x15c   :  { %520 = vmatpush.msrb.mxu3 %v499_v32 }
 0x15d   :  { %457 = vmatpush.msra.mxu2 %v405_v0 }
 0x15e   :  { %521 = vmatpush.msrb.mxu3 %v498_v33 }
 0x15f   :  { %458 = vmatpush.msra.mxu2 %v404_v1 }
 0x161   :  { %459 = vmatpush.msra.mxu2 %v403_v6 }
 0x163   :  { %460 = vmatpush.msra.mxu2 %v402_v8 }
 0x165   :  { %461 = vmatpush.msra.mxu2 %v401_v10  ;;  %v594_v10 = vld [vmem:[%s4242_s8 + $0x8] sm:$0xff] }
 0x167   :  { %462 = vmatpush.msra.mxu2 %v400_v12  ;;  %v2865_v12 = vld [vmem:[%s4240_s10] ss:$0 sm:$0xff] }
 0x169   :  { %463 = vmatpush.msra.mxu2 %v399_v14 }
 0x16a   :  { %2656 = vmatmul.msk.f32.vlgmr.msra.gmra.mxu2 %vm424_vm11, %v423_v16 }
 0x16b   :  { %614 = vmatpush.msrb.mxu2 %v600_v57  ;;  %v2668_v57 = vld [vmem:[%s4277_s0 + $0x28] sm:$0xff] }
 0x16d   :  { %615 = vmatpush.msrb.mxu2 %v599_v20  ;;  %v2667_v20 = vld [vmem:[%s4277_s0 + $0x20] sm:$0xff] }
 0x16f   :  { %616 = vmatpush.msrb.mxu2 %v598_v58  ;;  %v3479_v58 = vld [vmem:[%s4278_s6 + $0x8] sm:$0x7f]  ;;  %s2982_s6 = smov 112  }
 0x171   :  { %617 = vmatpush.msrb.mxu2 %v597_v60  ;;  %v689_v60 = vperm.slane %v3479_v58, 1 }
 0x173   :  { %618 = vmatpush.msrb.mxu2 %v596_v18 }
 0x175   :  { %619 = vmatpush.msrb.mxu2 %v595_v9  ;;  %v912_v9 = vld [vmem:[%s4243_s11 + $0x10] sm:$0xff] }
 0x177   :  { %620 = vmatpush.msrb.mxu2 %v594_v10  ;;  %v911_v10 = vld [vmem:[%s4243_s11 + $0x8] sm:$0xff] }
 0x179   :  { %621 = vmatpush.msrb.mxu2 %v593_v11 }
 0x1ad   :  { %v445_v21 = vpop.f32.mrf.mxu1 }
 0x1ed   :  { %v465_v23 = vpop.f32.mrf.mxu2 }
 0x1ee   :  { %v466_v29 = vadd.f32 %v465_v23, %v445_v21 }
 0x1f0   :  { %2657 = vmatmul.msk.f32.vlgmr.msra.gmra.mxu3 %vm474_vm12, %v466_v29 }
 0x1f1   :  { %584 = vmatpush.msra.mxu3 %v564_v22 }
 0x1f3   :  { %585 = vmatpush.msra.mxu3 %v563_v54  ;;  %v651_v54 = vperm.slane %v3390_v34, 6 }
 0x1f5   :  { %586 = vmatpush.msra.mxu3 %v562_v55 }
 0x1f7   :  { %587 = vmatpush.msra.mxu3 %v561_v56 }
 0x273   :  { %v495_v35 = vpop.f32.mrf.mxu3 }
 0x274   :  { %v496_v36 = vadd.f32 %v495_v35, %v473_v30 }
 0x276   :  { %2658 = vmatmul.msk.f32.vlgmr.msrb.gmra.mxu3 %vm474_vm12, %v496_v36  ;;  %v2665_v36 = vld [vmem:[%s4276_s27 + $0x38] sm:$0xff] }
 0x277   :  { %676 = vmatpush.msrb.mxu3 %v2665_v36  ;;  %v2681_v36 = vld [vmem:[%s4242_s8 + $0x58] sm:$0xff] }
 0x2f9   :  { %v523_v38 = vpop.f32.mrf.mxu3 }
 0x2fa   :  { %v524_v28 = vadd.f32 %v523_v38, %v502_v37  ;;  %v2664_v37 = vld [vmem:[%s4276_s27 + $0x30] sm:$0xff]  ;;  %v2663_v38 = vld [vmem:[%s4276_s27 + $0x28] sm:$0xff] }
 0x2fb   :  { %677 = vmatpush.msrb.mxu3 %v2664_v37 }
 0x2fc   :  { %v526_v40 = vadd.f32 %v524_v28, %v466_v29  ;;  %v2662_v28 = vld [vmem:[%s4276_s27 + $0x20] sm:$0xff]  ;;  %s2974_s27 = smov 96  }
 0x2fd   :  { %678 = vmatpush.msrb.mxu3 %v2663_v38  ;;  %v736_v38 = vperm.slane %v3479_v58, 2 }
 0x2fe   :  { %v528_v41 = vsel %vm527_vm13, %v526_v40, 0.0 }
 0x2ff   :  { %529 = vadd.xlane.f32.xlu0 %v528_v41  ;;  %679 = vmatpush.msrb.mxu3 %v2662_v28  ;;  %v2669_v41 = vld [vmem:[%s4277_s0 + $0x30] sm:$0xff] }
 0x372   :  { %v530_v47 = vpop.xlane.xlu0 %529 }
 0x373   :  { %v538_v48 = vmul.f32 %v3396_v24, %v530_v47 }
 0x375   :  { %v539_v49 = vsub.f32 %v526_v40, %v538_v48  ;;  %v2670_v40 = vld [vmem:[%s4277_s0 + $0x38] sm:$0xff]  ;;  %s2981_s0 = smov 72  }
 0x376   :  { %705 = vmatpush.msrb.mxu1 %v2670_v40 }
 0x377   :  { %v540_v51 = vmul.f32 %v539_v49, %v539_v49 }
 0x378   :  { %706 = vmatpush.msrb.mxu1 %v2669_v41  ;;  %v738_v41 = vperm.slane %v3479_v58, 3 }
 0x379   :  { %v541_v52 = vsel %vm527_vm13, %v540_v51, 0.0  ;;  %v649_v51 = vperm.slane %v3390_v34, 5  ;;  %v660_v34 = vperm.slane %v3479_v58, 0 }
 0x37a   :  { %542 = vadd.xlane.f32.xlu0 %v541_v52  ;;  %707 = vmatpush.msrb.mxu1 %v2668_v57 }
 0x37c   :  { %708 = vmatpush.msrb.mxu1 %v2667_v20 }
 0x3ed   :  { %v543_v59 = vpop.xlane.xlu0 %542 }
 0x3ee   :  { %v544_v39 = vmul.f32 %v543_v59, %v3396_v24 }
 0x3f0   :  { %v545_v62 = vadd.f32 1e-05, %v544_v39 }
 0x3f2   :  { %2874 = vrsqrt.f32 %v545_v62  ;;  %vm552_vm0 = vweird.f32 %v545_v62 }
 0x3f8   :  { %v2875_v63 = vpop.eup %2874 }
 0x3f9   :  { %v547_v0 = vmul.f32 %v2875_v63, %v545_v62  ;;  %vm553_vm15 = vweird.f32 %v2875_v63 }
 0x3fa   :  { %vm554_vm1 = vmor %vm552_vm0, %vm553_vm15 }
 0x3fb   :  { %v548_v50 = vmul.f32 %v2875_v63, %v547_v0 }
 0x3fd   :  { %v549_v13 = vmul.f32 0.5, %v548_v50 }
 0x3ff   :  { %v550_v1 = vsub.f32 1.5, %v549_v13 }
 0x401   :  { %v551_v3 = vmul.f32 %v2875_v63, %v550_v1 }
 0x403   :  { %v555_v5 = vsel %vm554_vm1, %v2875_v63, %v551_v3 }
 0x404   :  { %v556_v6 = vmul.f32 %v555_v5, %v539_v49  ;;  %v2675_v5 = vld [vmem:[%s4241_s7 + $0x38] sm:$0xff] }
 0x406   :  { %v558_v53 = vmul.f32 %v557_v4, %v556_v6  ;;  %v2674_v6 = vld [vmem:[%s4241_s7 + $0x30] sm:$0xff] }
 0x408   :  { %v560_v8 = vadd.f32 %v559_v7, %v558_v53  ;;  %v2673_v7 = vld [vmem:[%s4241_s7 + $0x28] sm:$0xff]  ;;  %v2672_v53 = vld [vmem:[%s4241_s7 + $0x20] sm:$0xff]  ;;  %s2979_s7 = smov 56  }
 0x40a   :  { %2659 = vmatmul.msk.f32.vlgmr.msra.gmra.mxu3 %vm474_vm12, %v560_v8 }
 0x40b   :  { %765 = vmatpush.msra.mxu3 %v2675_v5  ;;  %v2977_v5 = vmov 0  }
 0x40c   :  { %2823 = vset.pattern.permute.xlu1 %v2977_v5  ;;  %2822 = vset.pattern.permute.xlu2 %v2977_v5 }
 0x40d   :  { %766 = vmatpush.msra.mxu3 %v2674_v6  ;;  %2864 = vset.pattern.permute.xlu0 %v2977_v5 }
 0x40f   :  { %767 = vmatpush.msra.mxu3 %v2673_v7  ;;  %v890_v7 = vld [vmem:[%s4246_s4] sm:$0xff] }
 0x411   :  { %768 = vmatpush.msra.mxu3 %v2672_v53 }
 0x48d   :  { %v589_v14 = vpop.f32.mrf.mxu3 }
 0x48e   :  { %v590_v16 = vadd.f32 %v2865_v12, %v589_v14  ;;  %v910_v14 = vld [vmem:[%s4243_s11] sm:$0xff] }
 0x490   :  { %v592_v61 = vmax.f32 %v590_v16, 0.0 }
 0x492   :  { %2660 = vmatmul.msk.f32.vlgmr.msrb.gmra.mxu2 %vm602_vm2, %v592_v61 }
 0x515   :  { %v623_v17 = vpop.f32.mrf.mxu2 }
 0x516   :  { %v624_v19 = vadd.f32 %v623_v17, %v601_v2  ;;  %v3515_v17 = vld [vmem:[%s4244_s17] sm:$0xff] }
 0x517   :  { %v943_v57 = vperm.slane %v3515_v17, 0 }
 0x518   :  { %v626_v21 = vadd.f32 %v624_v19, %v560_v8  ;;  %v913_v8 = vld [vmem:[%s4243_s11 + $0x18] sm:$0xff] }
 0x519   :  { %v2685_v19 = vld [vmem:[%s4242_s8 + $0x78] sm:$0xff] }
 0x51a   :  { %v627_v23 = vsel %vm527_vm13, %v626_v21, 0.0  ;;  %795 = vmatpush.msra.mxu2 %v2685_v19 }
 0x51b   :  { %628 = vadd.xlane.f32.xlu1 %v627_v23  ;;  %v948_v23 = vperm.slane %v3515_v17, 1 }
 0x51d   :  { %950 = vrot.lane.b32.xlu0 %v948_v23, %s2973_s9 }
 0x58e   :  { %v629_v29 = vpop.xlane.xlu1 %628 }
 0x58f   :  { %v630_v32 = vmul.f32 %v629_v29, %v3396_v24  ;;  %v2684_v29 = vld [vmem:[%s4242_s8 + $0x70] sm:$0xff] }
 0x590   :  { %796 = vmatpush.msra.mxu2 %v2684_v29 }
 0x591   :  { %v631_v33 = vsub.f32 %v626_v21, %v630_v32  ;;  %v2683_v32 = vld [vmem:[%s4242_s8 + $0x68] sm:$0xff] }
 0x592   :  { %797 = vmatpush.msra.mxu2 %v2683_v32 }
 0x593   :  { %v632_v30 = vmul.f32 %v631_v33, %v631_v33 }
 0x595   :  { %v633_v35 = vsel %vm527_vm13, %v632_v30, 0.0  ;;  %v2682_v30 = vld [vmem:[%s4242_s8 + $0x60] sm:$0xff] }
 0x596   :  { %634 = vadd.xlane.f32.xlu1 %v633_v35  ;;  %798 = vmatpush.msra.mxu2 %v2682_v30 }
 0x598   :  { %799 = vmatpush.msra.mxu2 %v2681_v36 }
 0x609   :  { %v635_v42 = vpop.xlane.xlu1 %634 }
 0x60a   :  { %v636_v26 = vmul.f32 %v635_v42, %v3396_v24 }
 0x60c   :  { %v637_v43 = vadd.f32 1e-05, %v636_v26 }
 0x60e   :  { %2876 = vrsqrt.f32 %v637_v43  ;;  %vm644_vm4 = vweird.f32 %v637_v43 }
 0x614   :  { %v2877_v44 = vpop.eup %2876 }
 0x615   :  { %v639_v45 = vmul.f32 %v2877_v44, %v637_v43  ;;  %vm645_vm3 = vweird.f32 %v2877_v44  ;;  %v3543_v43 = vld [vmem:[%s4245_s3] sm:$0xff] }
 0x616   :  { %vm646_vm5 = vmor %vm644_vm4, %vm645_vm3  ;;  %vm852_vm3 = vcmask 15360  }
 0x617   :  { %v640_v46 = vmul.f32 %v2877_v44, %v639_v45  ;;  %v2680_v45 = vld [vmem:[%s4242_s8 + $0x50] sm:$0xff] }
 0x618   :  { %800 = vmatpush.msra.mxu2 %v2680_v45 }
 0x619   :  { %v641_v47 = vmul.f32 0.5, %v640_v46  ;;  %v2679_v46 = vld [vmem:[%s4242_s8 + $0x48] sm:$0xff] }
 0x61a   :  { %801 = vmatpush.msra.mxu2 %v2679_v46 }
 0x61b   :  { %v642_v48 = vsub.f32 1.5, %v641_v47  ;;  %v2678_v47 = vld [vmem:[%s4242_s8 + $0x40] sm:$0xff]  ;;  %s2975_s8 = smov 88  }
 0x61c   :  { %802 = vmatpush.msra.mxu2 %v2678_v47 }
 0x61d   :  { %v643_v49 = vmul.f32 %v2877_v44, %v642_v48  ;;  %v2866_v48 = vld [vmem:[%s4240_s10 + $0x1] ss:$0 sm:$0xff]  ;;  %s2976_s10 = smov 120  }
 0x61f   :  { %v647_v52 = vsel %vm646_vm5, %v2877_v44, %v643_v49  ;;  %v3550_v44 = vld [vmem:[%s4245_s3 + $0x8] sm:$0xff] }
 0x620   :  { %v648_v22 = vmul.f32 %v647_v52, %v631_v33 }
 0x622   :  { %v650_v55 = vmul.f32 %v649_v51, %v648_v22  ;;  %v951_v22 = vpop.permute.xlu0 %950 }
 0x624   :  { %v652_v56 = vadd.f32 %v651_v54, %v650_v55 }
 0x626   :  { %2666 = vmatmul.msk.f32.vlgmr.msrb.gmra.mxu3 %vm474_vm12, %v652_v56 }
 0x627   :  { %932 = vmatpush.msrb.mxu3 %v913_v8 }
 0x629   :  { %933 = vmatpush.msrb.mxu3 %v912_v9 }
 0x62b   :  { %934 = vmatpush.msrb.mxu3 %v911_v10 }
 0x62d   :  { %935 = vmatpush.msrb.mxu3 %v910_v14 }
 0x6a9   :  { %v681_v59 = vpop.f32.mrf.mxu3 }
 0x6aa   :  { %v682_v39 = vadd.f32 %v681_v59, %v660_v34 }
 0x6ac   :  { %2671 = vmatmul.msk.f32.vlgmr.msrb.gmra.mxu1 %vm474_vm12, %v682_v39 }
 0x729   :  { %v710_v62 = vpop.f32.mrf.mxu1 }
 0x72a   :  { %v711_v18 = vadd.f32 %v710_v62, %v689_v60  ;;  %v838_v62 = vadd.s32 1, %v3315_v31 }
 0x72c   :  { %v713_v63 = vadd.f32 %v711_v18, %v652_v56  ;;  %v846_v18 = vmul.u32 8, %v3310_v25 }
 0x72e   :  { %v714_v0 = vsel %vm527_vm13, %v713_v63, 0.0  ;;  %vm847_vm9 = vcmp.ge.s32.totalorder %v3315_v31, %v846_v18 }
 0x72f   :  { %715 = vadd.xlane.f32.xlu2 %v714_v0  ;;  %v835_v0 = vmul.u32 8, %v3315_v31 }
 0x731   :  { %vm836_vm15 = vcmp.ge.s32.totalorder %v3310_v25, %v835_v0 }
 0x7a2   :  { %v716_v50 = vpop.xlane.xlu2 %715 }
 0x7a3   :  { %v717_v13 = vmul.f32 %v716_v50, %v3396_v24  ;;  %v839_v50 = vmul.u32 8, %v838_v62 }
 0x7a5   :  { %v718_v1 = vsub.f32 %v713_v63, %v717_v13  ;;  %v848_v63 = vmul.u32 8, %v3313_v27  ;;  %vm840_vm0 = vcmp.lt.s32.totalorder %v3310_v25, %v839_v50 }
 0x7a6   :  { %vm842_vm1 = vmand %vm836_vm15, %vm840_vm0 }
 0x7a7   :  { %v719_v3 = vmul.f32 %v718_v1, %v718_v1  ;;  %vm849_vm10 = vcmp.lt.s32.totalorder %v3315_v31, %v848_v63  ;;  %v3607_v27 = vsel %vm842_vm1, 1.0, %v2971_v15 }
 0x7a8   :  { %vm850_vm11 = vmand %vm847_vm9, %vm849_vm10  ;;  %vm968_vm9 = vcmask 64512   ;;  %vm888_vm10 = vcmp.le.s32.totalorder %v3315_v31, %v3310_v25 }
 0x7a9   :  { %v720_v4 = vsel %vm527_vm13, %v719_v3, 0.0  ;;  %v851_v13 = vsel %vm850_vm11, 1.0, %v2971_v15 }
 0x7aa   :  { %721 = vadd.xlane.f32.xlu2 %v720_v4  ;;  %2687 = vmatpush.msk.msra.mxu1 %vm859_vm14, %v851_v13  ;;  %v891_v4 = vld [vmem:[%s4246_s4 + $0x8] sm:$0xff]  ;;  %s2978_s4 = smov 64  }
 0x7ab   :  { %2688 = vmatmul.msk.f32.vlgmr.msra.gmra.mxu1 %vm852_vm3, %v3607_v27 }
 0x81d   :  { %v722_v11 = vpop.xlane.xlu2 %721 }
 0x81e   :  { %v723_v12 = vmul.f32 %v722_v11, %v3396_v24 }
 0x820   :  { %v724_v16 = vadd.f32 1e-05, %v723_v12 }
 0x822   :  { %2878 = vrsqrt.f32 %v724_v16  ;;  %vm731_vm7 = vweird.f32 %v724_v16 }
 0x828   :  { %v2879_v61 = vpop.eup %2878  ;;  %v3635_v14 = vpop.f32.mrf.mxu1 }
 0x829   :  { %v726_v2 = vmul.f32 %v2879_v61, %v724_v16  ;;  %vm732_vm6 = vweird.f32 %v2879_v61 }
 0x82a   :  { %vm733_vm8 = vmor %vm731_vm7, %vm732_vm6  ;;  %vm893_vm7 = vcmp.gt.f32.partialorder %v891_v4, 0.5 }
 0x82b   :  { %v727_v21 = vmul.f32 %v2879_v61, %v726_v2  ;;  %v895_v6 = vsel %vm893_vm7, 1, %v2977_v5  ;;  %vm1006_vm7 = vcmask 130048  }
 0x82d   :  { %v728_v33 = vmul.f32 0.5, %v727_v21 }
 0x82f   :  { %v729_v35 = vsub.f32 1.5, %v728_v33 }
 0x831   :  { %v730_v37 = vmul.f32 %v2879_v61, %v729_v35 }
 0x833   :  { %v734_v28 = vsel %vm733_vm8, %v2879_v61, %v730_v37  ;;  %vm892_vm8 = vcmp.gt.f32.partialorder %v890_v7, 0.5 }
 0x834   :  { %v735_v40 = vmul.f32 %v734_v28, %v718_v1  ;;  %v834_v1 = vadd.s32 8, %v3310_v25 }
 0x836   :  { %v737_v42 = vmul.f32 %v736_v38, %v735_v40  ;;  %vm837_vm4 = vcmp.ge.s32.totalorder %v834_v1, %v835_v0  ;;  %vm841_vm5 = vcmp.lt.s32.totalorder %v834_v1, %v839_v50  ;;  %vm889_vm15 = vcmp.le.s32.totalorder %v3315_v31, %v834_v1 }
 0x837   :  { %vm843_vm6 = vmand %vm837_vm4, %vm841_vm5  ;;  %vm886_vm5 = vcmp.gt.f32.partialorder %v3635_v14, 0.5 }
 0x838   :  { %v3536_v26 = vadd.f32 %v738_v41, %v737_v42  ;;  %v3613_v3 = vsel %vm843_vm6, 1.0, %v2971_v15  ;;  %v894_v15 = vsel %vm892_vm8, 1, %v2977_v5  ;;  %v955_v41 = vperm.slane %v3515_v17, 2 }
 0x839   :  { %2689 = vmatmul.msk.f32.gmra.mxu1 %vm852_vm3, %v3613_v3 }
 0x83a   :  { %2677 = vmatmul.msk.f32.vlgmr.msra.gmra.mxu3 %vm474_vm12, %v3536_v26 }
 0x842   :  { %2690 = vmatmul.msk.f32.vlgmr.msrb.gmra.mxu3 %vm474_vm12, %v3543_v43 }
 0x84a   :  { %2691 = vmatmul.msk.f32.gmra.mxu3 %vm474_vm12, %v3550_v44 }
 0x8b6   :  { %v3642_v19 = vpop.f32.mrf.mxu1 }
 0x8b7   :  { %vm887_vm6 = vcmp.gt.f32.partialorder %v3642_v19, 0.5 }
 0x8bd   :  { %v770_v49 = vpop.f32.mrf.mxu3 }
 0x8be   :  { %v771_v51 = vadd.f32 %v2866_v48, %v770_v49 }
 0x8c0   :  { %v773_v52 = vmax.f32 %v771_v51, 0.0 }
 0x8c2   :  { %2686 = vmatmul.msk.f32.vlgmr.msra.gmra.mxu2 %vm602_vm2, %v773_v52 }
 0x8c5   :  { %v3567_v54 = vpop.f32.mrf.mxu3 }
 0x8c6   :  { %v3570_v55 = vadd.f32 %v951_v22, %v3567_v54  ;;  %v944_v34 = vadd.f32 %v943_v57, %v3567_v54 }
 0x8c8   :  { %964 = vrot.lane.b32.xlu2 %v3570_v55, %s2974_s27  ;;  %v3588_v39 = vmul.f32 0.35355338, %v944_v34 }
 0x8cd   :  { %v3574_v56 = vpop.f32.mrf.mxu3 }
 0x8ce   :  { %v3578_v20 = vadd.f32 %v951_v22, %v3574_v56  ;;  %v945_v59 = vadd.f32 %v943_v57, %v3574_v56 }
 0x8d0   :  { %1072 = vrot.lane.b32.xlu0 %v3578_v20, %s2975_s8  ;;  %966 = vrot.lane.b32.xlu1 %v3578_v20, %s2974_s27  ;;  %v3590_v60 = vmul.f32 0.35355338, %v945_v59 }
 0x8d1   :  { %1070 = vrot.lane.b32.xlu2 %v3570_v55, %s2975_s8 }
 0x8d8   :  { %1068 = vrot.lane.b32.xlu0 %v3590_v60, %s2976_s10  ;;  %1066 = vrot.lane.b32.xlu1 %v3588_v39, %s2976_s10 }
 0x8d9   :  { %897 = vperm.xlu2 %2822, %v894_v15  }
 0x8e0   :  { %900 = vperm.xlu1 %2823, %v895_v6  }
 0x922   :  { %v965_v53 = vpop.permute.xlu2 %964 }
 0x92b   :  { %v1071_v10 = vpop.permute.xlu2 %1070 }
 0x933   :  { %v898_v16 = vpop.permute.xlu2 %897 }
 0x934   :  { %vm902_vm11 = vcmp.eq.s32.totalorder %v898_v16, 1 }
 0x935   :  { %vm3644_vm1 = vmand %vm888_vm10, %vm902_vm11  ;;  %vm4266_vm11 = vcmask 195584  }
 0x942   :  { %v967_v8 = vpop.permute.xlu1 %966  ;;  %v1073_v9 = vpop.permute.xlu0 %1072 }
 0x943   :  { %2692 = vmatpush.xpose.msk.msrb.mxu2 %vm968_vm9, %v967_v8  ;;  %2797 = vmatpush.xpose.msk.msra.mxu3 %vm968_vm9, %v967_v8 }
 0x945   :  { %v3637_v61 = vpop.f32.mrf.mxu2 }
 0x947   :  { %2693 = vmatpush.xpose.msk.msrb.mxu2 %vm968_vm9, %v965_v53  ;;  %2798 = vmatpush.xpose.msk.msra.mxu3 %vm968_vm9, %v965_v53 }
 0x94a   :  { %2694 = vmatmul.msk.f32.vlgmr.msrb.gmra.mxu2 %vm968_vm9, %v3588_v39  ;;  %2695 = vmatmul.msk.f32.vlgmr.msra.gmra.mxu3 %vm968_vm9, %v3590_v60  ;;  %v1067_v11 = vpop.permute.xlu1 %1066  ;;  %v1069_v12 = vpop.permute.xlu0 %1068 }
 0x94b   :  { %2698 = vmatpush.xpose.msk.msrb.mxu3 %vm968_vm9, %v1073_v9 }
 0x94f   :  { %2699 = vmatpush.xpose.msk.msrb.mxu3 %vm968_vm9, %v1071_v10 }
 0x952   :  { %2700 = vmatmul.msk.f32.vlgmr.msrb.gmra.mxu3 %vm968_vm9, %v1067_v11  ;;  %v901_v2 = vpop.permute.xlu1 %900 }
 0x953   :  { %vm903_vm0 = vcmp.eq.s32.totalorder %v901_v2, 1 }
 0x954   :  { %vm3648_vm4 = vmand %vm889_vm15, %vm903_vm0 }
 0x95a   :  { %2701 = vmatmul.msk.f32.gmra.mxu3 %vm968_vm9, %v1069_v12 }
 0x9cd   :  { %v996_v29 = vpop.f32.mrf.mxu2  ;;  %v999_v25 = vpop.f32.mrf.mxu3 }
 0x9ce   :  { %v1002_v31 = vsel %vm3644_vm1, %v996_v29, -1e+09  ;;  %v1003_v32 = vsel %vm3648_vm4, %v999_v25, -1e+09 }
 0x9cf   :  { %v1005_v33 = vsel %vm887_vm6, %v1003_v32, -1e+30  ;;  %v1004_v30 = vsel %vm886_vm5, %v1002_v31, -1e+30 }
 0x9d0   :  { %v1010_v35 = vsel %vm1006_vm7, %v1005_v33, -inf  ;;  %v1007_v36 = vsel %vm1006_vm7, %v1004_v30, -inf }
 0x9d1   :  { %1011 = vmax.xlane.f32.xlu1 %v1010_v35  ;;  %1008 = vmax.xlane.f32.xlu0 %v1007_v36 }
 0x9d5   :  { %v1099_v37 = vpop.f32.mrf.mxu3 }
 0x9d6   :  { %v1105_v38 = vsel %vm3644_vm1, %v1099_v37, -1e+09 }
 0x9d7   :  { %v1107_v28 = vsel %vm886_vm5, %v1105_v38, -1e+30 }
 0x9d8   :  { %v1109_v40 = vsel %vm1006_vm7, %v1107_v28, -inf }
 0x9d9   :  { %1110 = vmax.xlane.f32.xlu2 %v1109_v40 }
 0x9dd   :  { %v1102_v57 = vpop.f32.mrf.mxu3 }
 0x9f1   :  { %957 = vrot.lane.b32.xlu2 %v955_v41, %s2978_s4 }
 0xa44   :  { %v1009_v49 = vpop.xlane.xlu0 %1008  ;;  %v1012_v22 = vpop.xlane.xlu1 %1011 }
 0xa45   :  { %v1013_v51 = vsub.f32 %v1004_v30, %v1009_v49  ;;  %v1014_v34 = vsub.f32 %v1005_v33, %v1012_v22 }
 0xa47   :  { %v1015_v52 = vmul.f32 1.442695, %v1013_v51  ;;  %v783_v51 = vperm.slane %v3479_v58, 4 }
 0xa49   :  { %2880 = vpow2.f32 %v1015_v52 }
 0xa4c   :  { %v1111_v42 = vpop.xlane.xlu2 %1110 }
 0xa4d   :  { %v1115_v18 = vsub.f32 %v1107_v28, %v1111_v42 }
 0xa4f   :  { %v2881_v59 = vpop.eup %2880  ;;  %v1117_v50 = vmul.f32 1.442695, %v1115_v18 }
 0xa50   :  { %v1019_v0 = vsel %vm1006_vm7, %v2881_v59, 0.0 }
 0xa54   :  { %v958_v45 = vpop.permute.xlu2 %957 }
 0xa55   :  { %v960_v46 = vadd.f32 %v958_v45, %v3567_v54  ;;  %v961_v47 = vadd.f32 %v958_v45, %v3574_v56  ;;  %v1106_v54 = vsel %vm3648_vm4, %v1102_v57, -1e+09  ;;  %v1017_v56 = vmul.f32 1.442695, %v1014_v34 }
 0xa56   :  { %v1108_v62 = vsel %vm887_vm6, %v1106_v54, -1e+30  ;;  %v805_v34 = vadd.f32 %v3637_v61, %v783_v51 }
 0xa57   :  { %v3673_v48 = vpack.i.bf16 %v960_v46, %v961_v47  ;;  %2882 = vpow2.f32 %v1017_v56  ;;  %v1112_v63 = vsel %vm1006_vm7, %v1108_v62, -inf }
 0xa58   :  { %2884 = vpow2.f32 %v1117_v50  ;;  %v807_v56 = vadd.f32 %v805_v34, %v3536_v26 }
 0xa59   :  { %2825 = vrot.lane.b32.xlu1 %v3673_v48, %s2978_s4  ;;  %2830 = vrot.lane.b32.xlu0 %v3673_v48, %s2979_s7 }
 0xa5d   :  { %v2883_v13 = vpop.eup %2882 }
 0xa5e   :  { %v1022_v1 = vsel %vm1006_vm7, %v2883_v13, 0.0  ;;  %v2885_v4 = vpop.eup %2884 }
 0xa5f   :  { %v1121_v5 = vsel %vm1006_vm7, %v2885_v4, 0.0 }
 0xa83   :  { %1113 = vmax.xlane.f32.xlu0 %v1112_v63  ;;  %1020 = vadd.xlane.f32.xlu1 %v1019_v0  ;;  %v808_v63 = vsel %vm527_vm13, %v807_v56, 0.0 }
 0xa8b   :  { %1023 = vadd.xlane.f32.xlu0 %v1022_v1 }
 0xa93   :  { %1122 = vadd.xlane.f32.xlu0 %v1121_v5 }
 0xa9c   :  { %1172 = vrot.lane.b32.xlu1 %v3578_v20, %s2980_s25 }
 0xaa4   :  { %1170 = vrot.lane.b32.xlu1 %v3570_v55, %s2980_s25 }
 0xaa7   :  { %1272 = vrot.lane.b32.xlu0 %v3578_v20, %s2981_s0 }
 0xaac   :  { %1166 = vrot.lane.b32.xlu1 %v3588_v39, %s2982_s6 }
 0xaaf   :  { %1270 = vrot.lane.b32.xlu0 %v3570_v55, %s2981_s0 }
 0xab4   :  { %1168 = vrot.lane.b32.xlu1 %v3590_v60, %s2982_s6 }
 0xab7   :  { %1266 = vrot.lane.b32.xlu0 %v3588_v39, %s2983_s1 }
 0xabf   :  { %1268 = vrot.lane.b32.xlu0 %v3590_v60, %s2983_s1 }
 0xacb   :  { %v2826_v6 = vpop.permute.xlu1 %2825  ;;  %v2831_v7 = vpop.permute.xlu0 %2830 }
 0xacc   :  { %v2827_v20 = vunpack.i.l.bf16 %v2826_v6  ;;  %v2832_v15 = vunpack.i.l.bf16 %v2831_v7  ;;  %v2828_v53 = vunpack.i.h.bf16 %v2826_v6  ;;  %v2833_v8 = vunpack.i.h.bf16 %v2831_v7 }
 0xace   :  { %1057 = vmatpush.msrb.mxu1 %v2827_v20  ;;  %1157 = vmatpush.msra.mxu2 %v2832_v15 }
 0xad0   :  { %1058 = vmatpush.msrb.mxu1 %v2828_v53  ;;  %1158 = vmatpush.msra.mxu2 %v2833_v8 }
 0xaf6   :  { %v1021_v55 = vpop.xlane.xlu1 %1020  ;;  %v1114_v9 = vpop.xlane.xlu0 %1113 }
 0xaf7   :  { %2886 = vrcp.f32 %v1021_v55  ;;  %v1116_v10 = vsub.f32 %v1108_v62, %v1114_v9 }
 0xaf9   :  { %v1119_v11 = vmul.f32 1.442695, %v1116_v10 }
 0xafb   :  { %2888 = vpow2.f32 %v1119_v11 }
 0xafd   :  { %v2887_v39 = vpop.eup %2886 }
 0xafe   :  { %v1027_v12 = vmul.f32 %v2887_v39, %v2881_v59  ;;  %v1024_v16 = vpop.xlane.xlu0 %1023 }
 0xaff   :  { %2890 = vrcp.f32 %v1024_v16 }
 0xb00   :  { %2696 = vmatmul.msk.f32.vlgmr.msrb.gmra.mxu1 %vm1006_vm7, %v1027_v12 }
 0xb01   :  { %v2889_v60 = vpop.eup %2888 }
 0xb02   :  { %v1124_v2 = vsel %vm1006_vm7, %v2889_v60, 0.0 }
 0xb03   :  { %1125 = vadd.xlane.f32.xlu2 %v1124_v2 }
 0xb05   :  { %v2891_v29 = vpop.eup %2890 }
 0xb06   :  { %v1123_v25 = vpop.xlane.xlu0 %1122  ;;  %v1028_v31 = vmul.f32 %v2891_v29, %v2883_v13 }
 0xb07   :  { %2892 = vrcp.f32 %v1123_v25 }
 0xb08   :  { %2697 = vmatmul.msk.f32.gmra.mxu1 %vm1006_vm7, %v1028_v31 }
 0xb0d   :  { %v2893_v32 = vpop.eup %2892 }
 0xb0e   :  { %v1129_v33 = vmul.f32 %v2893_v32, %v2885_v4  ;;  %v1173_v30 = vpop.permute.xlu1 %1172 }
 0xb0f   :  { %2704 = vmatpush.xpose.msk.msra.mxu1 %vm968_vm9, %v1173_v30 }
 0xb10   :  { %2702 = vmatmul.msk.f32.vlgmr.msra.gmra.mxu2 %vm1006_vm7, %v1129_v33 }
 0xb16   :  { %v1171_v35 = vpop.permute.xlu1 %1170 }
 0xb17   :  { %2705 = vmatpush.xpose.msk.msra.mxu1 %vm968_vm9, %v1171_v35 }
 0xb19   :  { %v1273_v36 = vpop.permute.xlu0 %1272 }
 0xb1a   :  { %2710 = vmatpush.xpose.msk.msrb.mxu2 %vm968_vm9, %v1273_v36 }
 0xb1e   :  { %v1167_v37 = vpop.permute.xlu1 %1166 }
 0xb1f   :  { %2706 = vmatmul.msk.f32.vlgmr.msra.gmra.mxu1 %vm968_vm9, %v1167_v37 }
 0xb21   :  { %v1271_v38 = vpop.permute.xlu0 %1270 }
 0xb22   :  { %2711 = vmatpush.xpose.msk.msrb.mxu2 %vm968_vm9, %v1271_v38 }
 0xb26   :  { %v1169_v28 = vpop.permute.xlu1 %1168 }
 0xb27   :  { %2707 = vmatmul.msk.f32.gmra.mxu1 %vm968_vm9, %v1169_v28 }
 0xb29   :  { %v1267_v45 = vpop.permute.xlu0 %1266 }
 0xb31   :  { %v1269_v47 = vpop.permute.xlu0 %1268 }
 0xb76   :  { %v1126_v40 = vpop.xlane.xlu2 %1125 }
 0xb77   :  { %2894 = vrcp.f32 %v1126_v40 }
 0xb7d   :  { %v2895_v41 = vpop.eup %2894  ;;  %v3715_v46 = vpop.f32.mrf.mxu1 }
 0xb7e   :  { %v1130_v42 = vmul.f32 %v2895_v41, %v2889_v60 }
 0xb80   :  { %2703 = vmatmul.msk.f32.gmra.mxu2 %vm1006_vm7, %v1130_v42 }
 0xb85   :  { %v3718_v49 = vpop.f32.mrf.mxu1 }
 0xb88   :  { %2712 = vmatmul.msk.f32.vlgmr.msrb.gmra.mxu2 %vm968_vm9, %v1267_v45 }
 0xb90   :  { %2713 = vmatmul.msk.f32.gmra.mxu2 %vm968_vm9, %v1269_v47 }
 0xb93   :  { %v1160_v50 = vpop.f32.mrf.mxu2 }
 0xb9c   :  { %v1199_v52 = vpop.f32.mrf.mxu1 }
 0xb9d   :  { %v1205_v22 = vsel %vm3644_vm1, %v1199_v52, -1e+09 }
 0xb9e   :  { %v1207_v57 = vsel %vm886_vm5, %v1205_v22, -1e+30 }
 0xb9f   :  { %v1209_v54 = vsel %vm1006_vm7, %v1207_v57, -inf }
 0xba0   :  { %1210 = vmax.xlane.f32.xlu2 %v1209_v54 }
 0xba4   :  { %v1202_v59 = vpop.f32.mrf.mxu1 }
 0xba5   :  { %v1206_v62 = vsel %vm3648_vm4, %v1202_v59, -1e+09 }
 0xba6   :  { %v1208_v18 = vsel %vm887_vm6, %v1206_v62, -1e+30  ;;  %v1486_v62 = vld [vmem:[%s4247_s13 + $0x18] sm:$0xff] }
 0xba7   :  { %v1212_v0 = vsel %vm1006_vm7, %v1208_v18, -inf  ;;  %1503 = vmatpush.msra.mxu2 %v1486_v62 }
 0xba8   :  { %809 = vadd.xlane.f32.xlu2 %v808_v63  ;;  %1213 = vmax.xlane.f32.xlu0 %v1212_v0  ;;  %v1485_v63 = vld [vmem:[%s4247_s13 + $0x10] sm:$0xff]  ;;  %v1484_v0 = vld [vmem:[%s4247_s13 + $0x8] sm:$0xff] }
 0xba9   :  { %1504 = vmatpush.msra.mxu2 %v1485_v63 }
 0xbab   :  { %1505 = vmatpush.msra.mxu2 %v1484_v0 }
 0xc03   :  { %v3734_v61 = vpop.f32.mrf.mxu2 }
 0xc0b   :  { %v1299_v13 = vpop.f32.mrf.mxu2 }
 0xc0c   :  { %v1305_v26 = vsel %vm3644_vm1, %v1299_v13, -1e+09 }
 0xc0d   :  { %v1307_v1 = vsel %vm886_vm5, %v1305_v26, -1e+30 }
 0xc0e   :  { %v1309_v4 = vsel %vm1006_vm7, %v1307_v1, -inf }
 0xc0f   :  { %1310 = vmax.xlane.f32.xlu1 %v1309_v4 }
 0xc13   :  { %v1302_v5 = vpop.f32.mrf.mxu2  ;;  %v1211_v10 = vpop.xlane.xlu2 %1210 }
 0xc14   :  { %v1306_v6 = vsel %vm3648_vm4, %v1302_v5, -1e+09  ;;  %v1215_v11 = vsub.f32 %v1207_v57, %v1211_v10 }
 0xc15   :  { %v1308_v7 = vsel %vm887_vm6, %v1306_v6, -1e+30 }
 0xc16   :  { %v1312_v20 = vsel %vm1006_vm7, %v1308_v7, -inf  ;;  %v1217_v39 = vmul.f32 1.442695, %v1215_v11  ;;  %v830_v11 = vperm.slane %v3479_v58, 5 }
 0xc17   :  { %1313 = vmax.xlane.f32.xlu2 %v1312_v20 }
 0xc1b   :  { %v1214_v15 = vpop.xlane.xlu0 %1213  ;;  %v810_v60 = vpop.xlane.xlu2 %809 }
 0xc1c   :  { %v1216_v53 = vsub.f32 %v1208_v18, %v1214_v15  ;;  %v811_v31 = vmul.f32 %v810_v60, %v3396_v24 }
 0xc1e   :  { %v1219_v8 = vmul.f32 1.442695, %v1216_v53  ;;  %v3753_v36 = vsub.f32 %v807_v56, %v811_v31  ;;  %v1513_v31 = vld [vmem:[%s4248_s14 + $0x10] sm:$0xff] }
 0xc20   :  { %2896 = vpow2.f32 %v1219_v8 }
 0xc21   :  { %2898 = vpow2.f32 %v1217_v39 }
 0xc26   :  { %v2897_v55 = vpop.eup %2896 }
 0xc27   :  { %v1224_v9 = vsel %vm1006_vm7, %v2897_v55, 0.0  ;;  %v2899_v12 = vpop.eup %2898 }
 0xc28   :  { %1225 = vadd.xlane.f32.xlu0 %v1224_v9  ;;  %v1221_v16 = vsel %vm1006_vm7, %v2899_v12, 0.0 }
 0xc2f   :  { %2835 = vrot.lane.b32.xlu2 %v3673_v48, %s2984_s26 }
 0xc58   :  { %1222 = vadd.xlane.f32.xlu2 %v1221_v16  ;;  %v832_v16 = vperm.slane %v3479_v58, 6  ;;  %v1514_v58 = vld [vmem:[%s4248_s14 + $0x18] sm:$0xff] }
 0xc70   :  { %2840 = vrot.lane.b32.xlu2 %v3673_v48, %s4261_s5  ;;  %v813_v48 = vmul.f32 %v3753_v36, %v3753_v36  ;;  %s4262_s5 = smov 16  }
 0xc72   :  { %v814_v42 = vsel %vm527_vm13, %v813_v48, 0.0 }
 0xc82   :  { %v1311_v2 = vpop.xlane.xlu1 %1310 }
 0xc83   :  { %v1315_v29 = vsub.f32 %v1307_v1, %v1311_v2 }
 0xc85   :  { %v1317_v25 = vmul.f32 1.442695, %v1315_v29 }
 0xc87   :  { %2900 = vpow2.f32 %v1317_v25 }
 0xc8a   :  { %v1314_v32 = vpop.xlane.xlu2 %1313 }
 0xc8b   :  { %v1316_v33 = vsub.f32 %v1308_v7, %v1314_v32 }
 0xc8d   :  { %v2901_v30 = vpop.eup %2900  ;;  %v1319_v35 = vmul.f32 1.442695, %v1316_v33  ;;  %v1511_v33 = vld [vmem:[%s4248_s14] sm:$0xff] }
 0xc8e   :  { %v1321_v37 = vsel %vm1006_vm7, %v2901_v30, 0.0 }
 0xc8f   :  { %2902 = vpow2.f32 %v1319_v35  ;;  %1322 = vadd.xlane.f32.xlu1 %v1321_v37  ;;  %v1400_v35 = vld [vmem:[%s4249_s12 + $0x18] sm:$0xff]  ;;  %v1398_v37 = vld [vmem:[%s4249_s12 + $0x8] sm:$0xff] }
 0xc92   :  { %v2836_v38 = vpop.permute.xlu2 %2835 }
 0xc93   :  { %v2837_v28 = vunpack.i.l.bf16 %v2836_v38  ;;  %v2838_v41 = vunpack.i.h.bf16 %v2836_v38  ;;  %v1487_v38 = vperm.slane %v3515_v17, 6 }
 0xc95   :  { %v2903_v40 = vpop.eup %2902  ;;  %1257 = vmatpush.msra.mxu3 %v2837_v28 }
 0xc96   :  { %v1324_v45 = vsel %vm1006_vm7, %v2903_v40, 0.0 }
 0xc97   :  { %815 = vadd.xlane.f32.xlu1 %v814_v42  ;;  %1325 = vadd.xlane.f32.xlu0 %v1324_v45 }
 0xc98   :  { %1258 = vmatpush.msra.mxu3 %v2838_v41 }
 0xc9a   :  { %1420 = vmatpush.msrb.mxu3 %v1400_v35  ;;  %v1477_v35 = vperm.slane %v3515_v17, 4 }
 0xc9b   :  { %v1226_v51 = vpop.xlane.xlu0 %1225 }
 0xcb0   :  { %1368 = vrot.lane.b32.xlu1 %v1160_v50, %s4264_s28  ;;  %v1483_v50 = vld [vmem:[%s4247_s13] sm:$0xff] }
 0xcb1   :  { %1506 = vmatpush.msra.mxu2 %v1483_v50 }
 0xccb   :  { %v1223_v47 = vpop.xlane.xlu2 %1222 }
 0xccc   :  { %2904 = vrcp.f32 %v1223_v47 }
 0xccd   :  { %2906 = vrcp.f32 %v1226_v51 }
 0xcd2   :  { %v2905_v52 = vpop.eup %2904 }
 0xcd3   :  { %v1229_v22 = vmul.f32 %v2905_v52, %v2899_v12  ;;  %v2841_v57 = vpop.permute.xlu2 %2840  ;;  %v2907_v56 = vpop.eup %2906 }
 0xcd4   :  { %v2842_v34 = vunpack.i.l.bf16 %v2841_v57  ;;  %v2843_v54 = vunpack.i.h.bf16 %v2841_v57  ;;  %v1230_v59 = vmul.f32 %v2907_v56, %v2897_v55 }
 0xcd5   :  { %2708 = vmatmul.msk.f32.vlgmr.msra.gmra.mxu3 %vm1006_vm7, %v1229_v22 }
 0xcd6   :  { %1357 = vmatpush.msrb.mxu1 %v2842_v34 }
 0xcd8   :  { %1358 = vmatpush.msrb.mxu1 %v2843_v54 }
 0xcda   :  { %1531 = vmatpush.msra.mxu1 %v1514_v58 }
 0xcdc   :  { %1532 = vmatpush.msra.mxu1 %v1513_v31 }
 0xcdd   :  { %2709 = vmatmul.msk.f32.gmra.mxu3 %vm1006_vm7, %v1230_v59 }
 0xd02   :  { %v1323_v18 = vpop.xlane.xlu1 %1322 }
 0xd03   :  { %2908 = vrcp.f32 %v1323_v18 }
 0xd09   :  { %v2909_v13 = vpop.eup %2908 }
 0xd0a   :  { %v1329_v26 = vmul.f32 %v2909_v13, %v2901_v30  ;;  %v816_v1 = vpop.xlane.xlu1 %815  ;;  %v1326_v4 = vpop.xlane.xlu0 %1325 }
 0xd0b   :  { %v817_v5 = vmul.f32 %v816_v1, %v3396_v24  ;;  %2910 = vrcp.f32 %v1326_v4 }
 0xd0c   :  { %2714 = vmatmul.msk.f32.vlgmr.msrb.gmra.mxu1 %vm1006_vm7, %v1329_v26 }
 0xd0d   :  { %v818_v6 = vadd.f32 1e-05, %v817_v5 }
 0xd0f   :  { %2912 = vrsqrt.f32 %v818_v6  ;;  %vm825_vm8 = vweird.f32 %v818_v6 }
 0xd11   :  { %v2911_v7 = vpop.eup %2910 }
 0xd12   :  { %v1330_v20 = vmul.f32 %v2911_v7, %v2903_v40  ;;  %v1397_v40 = vld [vmem:[%s4249_s12] sm:$0xff] }
 0xd14   :  { %2715 = vmatmul.msk.f32.gmra.mxu1 %vm1006_vm7, %v1330_v20 }
 0xd15   :  { %v2913_v15 = vpop.eup %2912 }
 0xd16   :  { %v820_v53 = vmul.f32 %v2913_v15, %v818_v6  ;;  %vm826_vm13 = vweird.f32 %v2913_v15 }
 0xd17   :  { %vm827_vm10 = vmor %vm825_vm8, %vm826_vm13 }
 0xd18   :  { %v821_v8 = vmul.f32 %v2913_v15, %v820_v53 }
 0xd1a   :  { %v822_v55 = vmul.f32 0.5, %v821_v8 }
 0xd1c   :  { %v823_v9 = vsub.f32 1.5, %v822_v55 }
 0xd1e   :  { %v824_v10 = vmul.f32 %v2913_v15, %v823_v9 }
 0xd20   :  { %v828_v39 = vsel %vm827_vm10, %v2913_v15, %v824_v10 }
 0xd21   :  { %v829_v12 = vmul.f32 %v828_v39, %v3753_v36  ;;  %v1399_v36 = vld [vmem:[%s4249_s12 + $0x10] sm:$0xff] }
 0xd22   :  { %1421 = vmatpush.msrb.mxu3 %v1399_v36  ;;  %v1369_v45 = vpop.permute.xlu1 %1368 }
 0xd23   :  { %v831_v60 = vmul.f32 %v830_v11, %v829_v12  ;;  %v1390_v47 = vsel %vm968_vm9, %v3715_v46, %v1369_v45  ;;  %v1515_v46 = vperm.slane %v3515_v17, 7 }
 0xd24   :  { %1422 = vmatpush.msrb.mxu3 %v1398_v37 }
 0xd25   :  { %v3781_v2 = vadd.f32 %v832_v16, %v831_v60 }
 0xd26   :  { %1423 = vmatpush.msrb.mxu3 %v1397_v40 }
 0xd27   :  { %2718 = vmatmul.msk.f32.vlgmr.msra.gmra.mxu2 %vm474_vm12, %v3781_v2 }
 0xd58   :  { %v1260_v29 = vpop.f32.mrf.mxu3 }
 0xd59   :  { %1376 = vrot.lane.b32.xlu2 %v1260_v29, %s4262_s5 }
 0xd60   :  { %v1263_v25 = vpop.f32.mrf.mxu3 }
 0xd61   :  { %1370 = vrot.lane.b32.xlu2 %v3734_v61, %s4264_s28  ;;  %v1512_v61 = vld [vmem:[%s4248_s14 + $0x8] sm:$0xff] }
 0xd62   :  { %1533 = vmatpush.msra.mxu1 %v1512_v61 }
 0xd64   :  { %1534 = vmatpush.msra.mxu1 %v1511_v33 }
 0xd69   :  { %1378 = vrot.lane.b32.xlu2 %v1263_v25, %s4262_s5 }
 0xd89   :  { %v1360_v32 = vpop.f32.mrf.mxu1 }
 0xd8a   :  { %1384 = vrot.lane.b32.xlu0 %v1360_v32, %s2988_s23 }
 0xd91   :  { %v1363_v30 = vpop.f32.mrf.mxu1 }
 0xd92   :  { %1386 = vrot.lane.b32.xlu1 %v1363_v30, %s2988_s23 }
 0xdaa   :  { %v1508_v48 = vpop.f32.mrf.mxu2 }
 0xdab   :  { %v1509_v28 = vadd.f32 %v1508_v48, %v1487_v38  ;;  %v1480_v48 = vperm.slane %v3515_v17, 5 }
 0xdad   :  { %2719 = vmatmul.msk.f32.vlgmr.msra.gmra.mxu1 %vm474_vm12, %v1509_v28 }
 0xdb3   :  { %v1377_v41 = vpop.permute.xlu2 %1376 }
 0xdb4   :  { %v1392_v51 = vsel %vm1006_vm7, %v1390_v47, %v1377_v41 }
 0xdbb   :  { %v1371_v42 = vpop.permute.xlu2 %1370 }
 0xdbc   :  { %v1391_v34 = vsel %vm968_vm9, %v3718_v49, %v1371_v42  ;;  %v1401_v49 = vperm.slane %v3515_v17, 3 }
 0xdc3   :  { %v1379_v57 = vpop.permute.xlu2 %1378 }
 0xdc4   :  { %v1393_v54 = vsel %vm1006_vm7, %v1391_v34, %v1379_v57 }
 0xdfc   :  { %v1385_v52 = vpop.permute.xlu0 %1384 }
 0xdfd   :  { %v1395_v22 = vsel %vm4266_vm11, %v1392_v51, %v1385_v52 }
 0xdfe   :  { %2716 = vmatmul.msk.f32.vlgmr.msrb.gmra.mxu3 %vm474_vm12, %v1395_v22 }
 0xe04   :  { %v1387_v56 = vpop.permute.xlu1 %1386 }
 0xe05   :  { %v1396_v59 = vsel %vm4266_vm11, %v1393_v54, %v1387_v56 }
 0xe06   :  { %2717 = vmatmul.msk.f32.gmra.mxu3 %vm474_vm12, %v1396_v59 }
 0xe2a   :  { %v1536_v62 = vpop.f32.mrf.mxu1 }
 0xe2b   :  { %v1537_v18 = vadd.f32 %v1536_v62, %v1515_v46 }
 0xe2d   :  { %2720 = vmatpush.msk.msra.mxu3 %vm859_vm14, %v1537_v18 }
 0xe2e   :  { %2721 = vmatmul.msk.f32.vlgmr.msra.gmra.mxu3 %vm852_vm3, %v3607_v27 }
 0xe36   :  { %2722 = vmatmul.msk.f32.gmra.mxu3 %vm852_vm3, %v3613_v3 }
 0xe81   :  { %v1425_v63 = vpop.f32.mrf.mxu3 }
 0xe82   :  { %v1426_v0 = vadd.f32 %v1425_v63, %v1401_v49 }
 0xe84   :  { %v1431_v50 = vadd.f32 %v1426_v0, %v3543_v43 }
 0xe86   :  { %v1433_v13 = vsel %vm474_vm12, %v1431_v50, 0.0 }
 0xe87   :  { %1434 = vadd.xlane.f32.xlu0 %v1433_v13 }
 0xe89   :  { %v1428_v26 = vpop.f32.mrf.mxu3 }
 0xe8a   :  { %v1429_v1 = vadd.f32 %v1428_v26, %v1401_v49 }
 0xe8c   :  { %v1432_v4 = vadd.f32 %v1429_v1, %v3550_v44 }
 0xe8e   :  { %v1436_v5 = vsel %vm474_vm12, %v1432_v4, 0.0 }
 0xe8f   :  { %1437 = vadd.xlane.f32.xlu2 %v1436_v5  ;;  %v1619_v5 = vld [vmem:[%s4251_s15 + $0x10] sm:$0xff] }
 0xeb1   :  { %v1559_v40 = vpop.f32.mrf.mxu3 }
 0xeb9   :  { %v1562_v54 = vpop.f32.mrf.mxu3 }
 0xefa   :  { %v1435_v6 = vpop.xlane.xlu0 %1434 }
 0xefb   :  { %v1439_v7 = vmul.f32 %v1435_v6, %v3396_v24  ;;  %v1618_v6 = vld [vmem:[%s4251_s15 + $0x8] sm:$0xff] }
 0xefd   :  { %v1441_v20 = vsub.f32 %v1431_v50, %v1439_v7  ;;  %v1617_v7 = vld [vmem:[%s4251_s15] sm:$0xff] }
 0xeff   :  { %v1443_v15 = vmul.f32 %v1441_v20, %v1441_v20 }
 0xf01   :  { %v1445_v53 = vsel %vm474_vm12, %v1443_v15, 0.0 }
 0xf02   :  { %v1438_v8 = vpop.xlane.xlu2 %1437  ;;  %1446 = vadd.xlane.f32.xlu1 %v1445_v53 }
 0xf03   :  { %v1440_v43 = vmul.f32 %v1438_v8, %v3396_v24  ;;  %v1663_v8 = vld [vmem:[%s4252_s16 + $0x38] sm:$0xff] }
 0xf04   :  { %1679 = vmatpush.msrb.mxu1 %v1663_v8 }
 0xf05   :  { %v1442_v55 = vsub.f32 %v1432_v4, %v1440_v43  ;;  %v1620_v4 = vld [vmem:[%s4251_s15 + $0x18] sm:$0xff]  ;;  %v1662_v43 = vld [vmem:[%s4252_s16 + $0x30] sm:$0xff] }
 0xf06   :  { %1643 = vmatpush.msrb.mxu2 %v1620_v4  ;;  %1680 = vmatpush.msrb.mxu1 %v1662_v43 }
 0xf07   :  { %v1444_v9 = vmul.f32 %v1442_v55, %v1442_v55 }
 0xf08   :  { %1644 = vmatpush.msrb.mxu2 %v1619_v5 }
 0xf09   :  { %v1448_v10 = vsel %vm474_vm12, %v1444_v9, 0.0 }
 0xf0a   :  { %1449 = vadd.xlane.f32.xlu0 %v1448_v10  ;;  %1645 = vmatpush.msrb.mxu2 %v1618_v6 }
 0xf0c   :  { %1646 = vmatpush.msrb.mxu2 %v1617_v7 }
 0xf75   :  { %v1447_v44 = vpop.xlane.xlu1 %1446 }
 0xf76   :  { %v1451_v11 = vmul.f32 %v1447_v44, %v3396_v24  ;;  %v1660_v44 = vld [vmem:[%s4252_s16 + $0x20] sm:$0xff] }
 0xf78   :  { %v1453_v39 = vadd.f32 1e-05, %v1451_v11 }
 0xf7a   :  { %2914 = vrsqrt.f32 %v1453_v39  ;;  %vm1461_vm0 = vweird.f32 %v1453_v39 }
 0xf7d   :  { %v1450_v12 = vpop.xlane.xlu0 %1449 }
 0xf7e   :  { %v1452_v16 = vmul.f32 %v1450_v12, %v3396_v24  ;;  %v1659_v12 = vld [vmem:[%s4252_s16 + $0x18] sm:$0xff] }
 0xf80   :  { %v2915_v60 = vpop.eup %2914  ;;  %v1454_v29 = vadd.f32 1e-05, %v1452_v16 }
 0xf81   :  { %v1456_v25 = vmul.f32 %v2915_v60, %v1453_v39  ;;  %vm1462_vm15 = vweird.f32 %v2915_v60 }
 0xf82   :  { %2916 = vrsqrt.f32 %v1454_v29  ;;  %vm1463_vm13 = vmor %vm1461_vm0, %vm1462_vm15  ;;  %vm1471_vm10 = vweird.f32 %v1454_v29 }
 0xf83   :  { %v1457_v58 = vmul.f32 %v2915_v60, %v1456_v25  ;;  %v3884_v25 = vld [vmem:[%s4244_s17 + $0x8] sm:$0x1f] }
 0xf85   :  { %v1458_v31 = vmul.f32 0.5, %v1457_v58 }
 0xf87   :  { %v1459_v32 = vsub.f32 1.5, %v1458_v31 }
 0xf88   :  { %v2917_v61 = vpop.eup %2916 }
 0xf89   :  { %v1460_v33 = vmul.f32 %v2915_v60, %v1459_v32  ;;  %v1466_v30 = vmul.f32 %v2917_v61, %v1454_v29  ;;  %vm1472_vm8 = vweird.f32 %v2917_v61 }
 0xf8a   :  { %vm1473_vm11 = vmor %vm1471_vm10, %vm1472_vm8 }
 0xf8b   :  { %v1467_v36 = vmul.f32 %v2917_v61, %v1466_v30  ;;  %v1464_v37 = vsel %vm1463_vm13, %v2915_v60, %v1460_v33  ;;  %v1611_v33 = vperm.slane %v3884_v25, 0 }
 0xf8c   :  { %v1475_v38 = vmul.f32 %v1464_v37, %v1441_v20  ;;  %v1614_v37 = vperm.slane %v3884_v25, 1 }
 0xf8d   :  { %v1468_v28 = vmul.f32 0.5, %v1467_v36 }
 0xf8e   :  { %v1478_v41 = vmul.f32 %v1477_v35, %v1475_v38 }
 0xf8f   :  { %v1469_v42 = vsub.f32 1.5, %v1468_v28 }
 0xf90   :  { %v1481_v45 = vadd.f32 %v1480_v48, %v1478_v41 }
 0xf91   :  { %v1470_v47 = vmul.f32 %v2917_v61, %v1469_v42 }
 0xf92   :  { %v1565_v51 = vadd.f32 %v1559_v40, %v1481_v45 }
 0xf93   :  { %v1474_v52 = vsel %vm1473_vm11, %v2917_v61, %v1470_v47 }
 0xf94   :  { %v1567_v22 = vsel %vm474_vm12, %v1565_v51, 0.0  ;;  %v1476_v57 = vmul.f32 %v1474_v52, %v1442_v55  ;;  %v1661_v55 = vld [vmem:[%s4252_s16 + $0x28] sm:$0xff]  ;;  %v1658_v52 = vld [vmem:[%s4252_s16 + $0x10] sm:$0xff] }
 0xf95   :  { %1568 = vadd.xlane.f32.xlu2 %v1567_v22  ;;  %1681 = vmatpush.msrb.mxu1 %v1661_v55  ;;  %v1657_v22 = vld [vmem:[%s4252_s16 + $0x8] sm:$0xff] }
 0xf96   :  { %v1479_v34 = vmul.f32 %v1477_v35, %v1476_v57  ;;  %v1656_v57 = vld [vmem:[%s4252_s16] sm:$0xff] }
 0xf97   :  { %1682 = vmatpush.msrb.mxu1 %v1660_v44  ;;  %v2731_v44 = vld [vmem:[%s4243_s11 + $0x30] sm:$0xff] }
 0xf98   :  { %v1482_v56 = vadd.f32 %v1480_v48, %v1479_v34  ;;  %v2867_v34 = vld [vmem:[%s4250_s18] ss:$0 sm:$0xff] }
 0xf99   :  { %1683 = vmatpush.msrb.mxu1 %v1659_v12 }
 0xf9a   :  { %v1566_v59 = vadd.f32 %v1562_v54, %v1482_v56 }
 0xf9b   :  { %1684 = vmatpush.msrb.mxu1 %v1658_v52 }
 0xf9c   :  { %v1570_v17 = vsel %vm474_vm12, %v1566_v59, 0.0 }
 0xf9d   :  { %1571 = vadd.xlane.f32.xlu1 %v1570_v17  ;;  %1685 = vmatpush.msrb.mxu1 %v1657_v22 }
 0xf9f   :  { %1686 = vmatpush.msrb.mxu1 %v1656_v57 }
0x1008   :  { %v1569_v46 = vpop.xlane.xlu2 %1568 }
0x1009   :  { %v1573_v62 = vmul.f32 %v1569_v46, %v3396_v24 }
0x100b   :  { %v1575_v18 = vsub.f32 %v1565_v51, %v1573_v62 }
0x100d   :  { %v1577_v49 = vmul.f32 %v1575_v18, %v1575_v18 }
0x100f   :  { %v1579_v63 = vsel %vm474_vm12, %v1577_v49, 0.0 }
0x1010   :  { %1580 = vadd.xlane.f32.xlu0 %v1579_v63  ;;  %v1572_v0 = vpop.xlane.xlu1 %1571 }
0x1011   :  { %v1574_v50 = vmul.f32 %v1572_v0, %v3396_v24 }
0x1013   :  { %v1576_v13 = vsub.f32 %v1566_v59, %v1574_v50 }
0x1015   :  { %v1578_v26 = vmul.f32 %v1576_v13, %v1576_v13 }
0x1017   :  { %v1582_v1 = vsel %vm474_vm12, %v1578_v26, 0.0 }
0x1018   :  { %1583 = vadd.xlane.f32.xlu2 %v1582_v1 }
0x1083   :  { %v1581_v20 = vpop.xlane.xlu0 %1580 }
0x1084   :  { %v1585_v15 = vmul.f32 %v1581_v20, %v3396_v24 }
0x1086   :  { %v1587_v53 = vadd.f32 1e-05, %v1585_v15 }
0x1088   :  { %2918 = vrsqrt.f32 %v1587_v53  ;;  %vm1595_vm15 = vweird.f32 %v1587_v53 }
0x108b   :  { %v1584_v9 = vpop.xlane.xlu2 %1583 }
0x108c   :  { %v1586_v10 = vmul.f32 %v1584_v9, %v3396_v24 }
0x108e   :  { %v2919_v11 = vpop.eup %2918  ;;  %v1588_v39 = vadd.f32 1e-05, %v1586_v10  ;;  %v2732_v10 = vld [vmem:[%s4243_s11 + $0x38] sm:$0xff] }
0x108f   :  { %v1590_v16 = vmul.f32 %v2919_v11, %v1587_v53  ;;  %vm1596_vm11 = vweird.f32 %v2919_v11  ;;  %1772 = vmatpush.msrb.mxu3 %v2732_v10 }
0x1090   :  { %2920 = vrsqrt.f32 %v1588_v39  ;;  %vm1597_vm0 = vmor %vm1595_vm15, %vm1596_vm11  ;;  %vm1605_vm8 = vweird.f32 %v1588_v39 }
0x1091   :  { %v1591_v60 = vmul.f32 %v2919_v11, %v1590_v16  ;;  %1773 = vmatpush.msrb.mxu3 %v2731_v44 }
0x1093   :  { %v1592_v29 = vmul.f32 0.5, %v1591_v60 }
0x1095   :  { %v1593_v58 = vsub.f32 1.5, %v1592_v29  ;;  %v3927_v29 = vld [vmem:[%s4244_s17 + $0x10] sm:$0xff] }
0x1096   :  { %v2921_v31 = vpop.eup %2920 }
0x1097   :  { %v1594_v32 = vmul.f32 %v2919_v11, %v1593_v58  ;;  %v1600_v61 = vmul.f32 %v2921_v31, %v1588_v39  ;;  %vm1606_vm13 = vweird.f32 %v2921_v31  ;;  %v2729_v39 = vld [vmem:[%s4243_s11 + $0x20] sm:$0xff]  ;;  %v1788_v58 = vperm.slane %v3927_v29, 1 }
0x1098   :  { %vm1607_vm10 = vmor %vm1605_vm8, %vm1606_vm13 }
0x1099   :  { %v1598_v30 = vsel %vm1597_vm0, %v2919_v11, %v1594_v32  ;;  %v1601_v35 = vmul.f32 %v2921_v31, %v1600_v61  ;;  %v2730_v11 = vld [vmem:[%s4243_s11 + $0x28] sm:$0xff] }
0x109a   :  { %v1609_v36 = vmul.f32 %v1598_v30, %v1575_v18  ;;  %v1664_v18 = vperm.slane %v3884_v25, 2  ;;  %1774 = vmatpush.msrb.mxu3 %v2730_v11 }
0x109b   :  { %v1602_v38 = vmul.f32 0.5, %v1601_v35 }
0x109c   :  { %v1612_v48 = vmul.f32 %v1611_v33, %v1609_v36  ;;  %1775 = vmatpush.msrb.mxu3 %v2729_v39 }
0x109d   :  { %v1603_v28 = vsub.f32 1.5, %v1602_v38 }
0x109e   :  { %v1615_v40 = vadd.f32 %v1614_v37, %v1612_v48 }
0x109f   :  { %v1604_v41 = vmul.f32 %v2921_v31, %v1603_v28 }
0x10a0   :  { %2723 = vmatmul.msk.f32.vlgmr.msrb.gmra.mxu2 %vm474_vm12, %v1615_v40 }
0x10a1   :  { %v1608_v42 = vsel %vm1607_vm10, %v2921_v31, %v1604_v41 }
0x10a2   :  { %v1610_v45 = vmul.f32 %v1608_v42, %v1576_v13 }
0x10a4   :  { %v1613_v47 = vmul.f32 %v1611_v33, %v1610_v45 }
0x10a6   :  { %v1616_v51 = vadd.f32 %v1614_v37, %v1613_v47  ;;  %v1743_v47 = vperm.slane %v3884_v25, 4 }
0x10a8   :  { %2724 = vmatmul.msk.f32.gmra.mxu2 %vm474_vm12, %v1616_v51 }
0x1123   :  { %v1648_v54 = vpop.f32.mrf.mxu2 }
0x1124   :  { %v1649_v56 = vadd.f32 %v2867_v34, %v1648_v54 }
0x1126   :  { %v1654_v59 = vmax.f32 %v1649_v56, 0.0 }
0x1128   :  { %2725 = vmatmul.msk.f32.vlgmr.msrb.gmra.mxu1 %vm602_vm2, %v1654_v59 }
0x112b   :  { %v1651_v17 = vpop.f32.mrf.mxu2 }
0x112c   :  { %v1652_v46 = vadd.f32 %v2867_v34, %v1651_v17 }
0x112e   :  { %v1655_v62 = vmax.f32 %v1652_v46, 0.0 }
0x1130   :  { %2726 = vmatmul.msk.f32.gmra.mxu1 %vm602_vm2, %v1655_v62  ;;  %v1783_v62 = vperm.slane %v3927_v29, 0 }
0x11a5   :  { %v1688_v49 = vpop.f32.mrf.mxu1 }
0x11a6   :  { %v1689_v63 = vadd.f32 %v1688_v49, %v1664_v18 }
0x11a8   :  { %v1694_v0 = vadd.f32 %v1689_v63, %v1615_v40  ;;  %v1740_v40 = vperm.slane %v3884_v25, 3 }
0x11aa   :  { %v1696_v50 = vsel %vm474_vm12, %v1694_v0, 0.0 }
0x11ab   :  { %1697 = vadd.xlane.f32.xlu1 %v1696_v50 }
0x11ad   :  { %v1691_v13 = vpop.f32.mrf.mxu1 }
0x11ae   :  { %v1692_v26 = vadd.f32 %v1691_v13, %v1664_v18 }
0x11b0   :  { %v1695_v1 = vadd.f32 %v1692_v26, %v1616_v51 }
0x11b2   :  { %v1699_v4 = vsel %vm474_vm12, %v1695_v1, 0.0 }
0x11b3   :  { %1700 = vadd.xlane.f32.xlu0 %v1699_v4 }
0x11c7   :  { %1790 = vrot.lane.b32.xlu0 %v1788_v58, %s2973_s9 }
0x121e   :  { %v1698_v5 = vpop.xlane.xlu1 %1697 }
0x121f   :  { %v1702_v6 = vmul.f32 %v1698_v5, %v3396_v24 }
0x1221   :  { %v1704_v7 = vsub.f32 %v1694_v0, %v1702_v6 }
0x1223   :  { %v1706_v20 = vmul.f32 %v1704_v7, %v1704_v7 }
0x1225   :  { %v1708_v15 = vsel %vm474_vm12, %v1706_v20, 0.0 }
0x1226   :  { %v1701_v53 = vpop.xlane.xlu0 %1700  ;;  %1709 = vadd.xlane.f32.xlu2 %v1708_v15 }
0x1227   :  { %v1703_v8 = vmul.f32 %v1701_v53, %v3396_v24 }
0x1229   :  { %v1705_v43 = vsub.f32 %v1695_v1, %v1703_v8 }
0x122b   :  { %v1707_v55 = vmul.f32 %v1705_v43, %v1705_v43 }
0x122d   :  { %v1711_v9 = vsel %vm474_vm12, %v1707_v55, 0.0 }
0x122e   :  { %1712 = vadd.xlane.f32.xlu1 %v1711_v9 }
0x1239   :  { %v1791_v25 = vpop.permute.xlu0 %1790 }
0x1299   :  { %v1710_v12 = vpop.xlane.xlu2 %1709 }
0x129a   :  { %v1714_v16 = vmul.f32 %v1710_v12, %v3396_v24 }
0x129c   :  { %v1716_v60 = vadd.f32 1e-05, %v1714_v16 }
0x129e   :  { %2922 = vrsqrt.f32 %v1716_v60  ;;  %vm1724_vm15 = vweird.f32 %v1716_v60 }
0x12a1   :  { %v1713_v31 = vpop.xlane.xlu1 %1712 }
0x12a2   :  { %v1715_v32 = vmul.f32 %v1713_v31, %v3396_v24 }
0x12a4   :  { %v2923_v61 = vpop.eup %2922  ;;  %v1717_v33 = vadd.f32 1e-05, %v1715_v32 }
0x12a5   :  { %v1719_v30 = vmul.f32 %v2923_v61, %v1716_v60  ;;  %vm1725_vm11 = vweird.f32 %v2923_v61  ;;  %v1795_v60 = vperm.slane %v3927_v29, 2 }
0x12a6   :  { %2924 = vrsqrt.f32 %v1717_v33  ;;  %vm1726_vm0 = vmor %vm1724_vm15, %vm1725_vm11  ;;  %vm1734_vm8 = vweird.f32 %v1717_v33 }
0x12a7   :  { %v1720_v35 = vmul.f32 %v2923_v61, %v1719_v30 }
0x12a9   :  { %v1721_v36 = vmul.f32 0.5, %v1720_v35 }
0x12ab   :  { %v1722_v37 = vsub.f32 1.5, %v1721_v36 }
0x12ac   :  { %v2925_v38 = vpop.eup %2924 }
0x12ad   :  { %v1723_v48 = vmul.f32 %v2923_v61, %v1722_v37  ;;  %v1729_v28 = vmul.f32 %v2925_v38, %v1717_v33  ;;  %vm1735_vm13 = vweird.f32 %v2925_v38 }
0x12ae   :  { %vm1736_vm10 = vmor %vm1734_vm8, %vm1735_vm13 }
0x12af   :  { %v1727_v41 = vsel %vm1726_vm0, %v2923_v61, %v1723_v48  ;;  %v1730_v42 = vmul.f32 %v2925_v38, %v1729_v28 }
0x12b0   :  { %v1738_v45 = vmul.f32 %v1727_v41, %v1704_v7 }
0x12b1   :  { %v1731_v51 = vmul.f32 0.5, %v1730_v42 }
0x12b2   :  { %v1741_v52 = vmul.f32 %v1740_v40, %v1738_v45 }
0x12b3   :  { %v1732_v22 = vsub.f32 1.5, %v1731_v51 }
0x12b4   :  { %v3934_v57 = vadd.f32 %v1743_v47, %v1741_v52 }
0x12b5   :  { %v1733_v34 = vmul.f32 %v2925_v38, %v1732_v22 }
0x12b6   :  { %2733 = vmatmul.msk.f32.vlgmr.msrb.gmra.mxu3 %vm474_vm12, %v3934_v57 }
0x12b7   :  { %v1737_v54 = vsel %vm1736_vm10, %v2925_v38, %v1733_v34 }
0x12b8   :  { %v1739_v56 = vmul.f32 %v1737_v54, %v1705_v43 }
0x12ba   :  { %v1742_v59 = vmul.f32 %v1740_v40, %v1739_v56 }
0x12bc   :  { %v3938_v17 = vadd.f32 %v1743_v47, %v1742_v59 }
0x12be   :  { %2734 = vmatmul.msk.f32.gmra.mxu3 %vm474_vm12, %v3938_v17 }
0x1339   :  { %v1777_v46 = vpop.f32.mrf.mxu3 }
0x133a   :  { %v3943_v18 = vadd.f32 %v1791_v25, %v1777_v46  ;;  %v1784_v49 = vadd.f32 %v1783_v62, %v1777_v46 }
0x133c   :  { %1804 = vrot.lane.b32.xlu0 %v3943_v18, %s2974_s27  ;;  %v3947_v0 = vmul.f32 0.35355338, %v1784_v49 }
0x1341   :  { %v1780_v63 = vpop.f32.mrf.mxu3 }
0x1342   :  { %v1794_v50 = vadd.f32 %v1791_v25, %v1780_v63  ;;  %v1785_v13 = vadd.f32 %v1783_v62, %v1780_v63 }
0x1344   :  { %1904 = vrot.lane.b32.xlu0 %v3947_v0, %s2976_s10  ;;  %1910 = vrot.lane.b32.xlu1 %v1794_v50, %s2975_s8  ;;  %v3953_v26 = vmul.f32 0.35355338, %v1785_v13 }
0x1345   :  { %1806 = vrot.lane.b32.xlu2 %v1794_v50, %s2974_s27 }
0x134c   :  { %1906 = vrot.lane.b32.xlu1 %v3953_v26, %s2976_s10 }
0x134d   :  { %1908 = vrot.lane.b32.xlu2 %v3943_v18, %s2975_s8 }
0x139f   :  { %v1807_v1 = vpop.permute.xlu2 %1806 }
0x13a0   :  { %2735 = vmatpush.xpose.msk.msra.mxu2 %vm968_vm9, %v1807_v1 }
0x13a7   :  { %v1909_v6 = vpop.permute.xlu2 %1908 }
0x13ae   :  { %v1805_v4 = vpop.permute.xlu0 %1804 }
0x13af   :  { %2736 = vmatpush.xpose.msk.msra.mxu2 %vm968_vm9, %v1805_v4 }
0x13b2   :  { %2737 = vmatmul.msk.f32.vlgmr.msra.gmra.mxu2 %vm968_vm9, %v3947_v0 }
0x13b6   :  { %v1911_v5 = vpop.permute.xlu1 %1910  ;;  %v1905_v7 = vpop.permute.xlu0 %1904 }
0x13b7   :  { %2741 = vmatpush.xpose.msk.msra.mxu3 %vm968_vm9, %v1911_v5 }
0x13ba   :  { %2738 = vmatmul.msk.f32.gmra.mxu2 %vm968_vm9, %v3953_v26 }
0x13bb   :  { %2742 = vmatpush.xpose.msk.msra.mxu3 %vm968_vm9, %v1909_v6 }
0x13be   :  { %2743 = vmatmul.msk.f32.vlgmr.msra.gmra.mxu3 %vm968_vm9, %v1905_v7  ;;  %v1907_v20 = vpop.permute.xlu1 %1906 }
0x13c6   :  { %2744 = vmatmul.msk.f32.gmra.mxu3 %vm968_vm9, %v1907_v20 }
0x1435   :  { %v1835_v15 = vpop.f32.mrf.mxu2 }
0x1436   :  { %v1841_v53 = vsel %vm3644_vm1, %v1835_v15, -1e+09 }
0x1437   :  { %v1843_v8 = vsel %vm886_vm5, %v1841_v53, -1e+30 }
0x1438   :  { %v1845_v43 = vsel %vm1006_vm7, %v1843_v8, -inf }
0x1439   :  { %1846 = vmax.xlane.f32.xlu2 %v1845_v43 }
0x143d   :  { %v1838_v38 = vpop.f32.mrf.mxu2 }
0x143e   :  { %v1842_v48 = vsel %vm3648_vm4, %v1838_v38, -1e+09  ;;  %v2772_v38 = vld [vmem:[%s4248_s14 + $0x30] sm:$0xff] }
0x143f   :  { %v1844_v28 = vsel %vm887_vm6, %v1842_v48, -1e+30 }
0x1440   :  { %v1848_v40 = vsel %vm1006_vm7, %v1844_v28, -inf }
0x1441   :  { %v1937_v55 = vpop.f32.mrf.mxu3 }
0x1442   :  { %v1943_v9 = vsel %vm3644_vm1, %v1937_v55, -1e+09 }
0x1443   :  { %v1945_v10 = vsel %vm886_vm5, %v1943_v9, -1e+30 }
0x1444   :  { %v1947_v44 = vsel %vm1006_vm7, %v1945_v10, -inf }
0x1445   :  { %1948 = vmax.xlane.f32.xlu0 %v1947_v44  ;;  %v2767_v44 = vld [vmem:[%s4247_s13 + $0x30] sm:$0xff] }
0x1449   :  { %v1940_v11 = vpop.f32.mrf.mxu3 }
0x144a   :  { %v1944_v39 = vsel %vm3648_vm4, %v1940_v11, -1e+09  ;;  %v2765_v11 = vld [vmem:[%s4247_s13 + $0x20] sm:$0xff] }
0x144b   :  { %v3983_v12 = vsel %vm887_vm6, %v1944_v39, -1e+30 }
0x144c   :  { %v1950_v16 = vsel %vm1006_vm7, %v3983_v12, -inf }
0x144d   :  { %1951 = vmax.xlane.f32.xlu2 %v1950_v16 }
0x1459   :  { %1797 = vrot.lane.b32.xlu0 %v1795_v60, %s2978_s4 }
0x1465   :  { %2110 = vrot.lane.b32.xlu2 %v1794_v50, %s2981_s0 }
0x14ac   :  { %v1847_v41 = vpop.xlane.xlu2 %1846 }
0x14ad   :  { %v1851_v45 = vsub.f32 %v1843_v8, %v1847_v41 }
0x14af   :  { %v1853_v47 = vmul.f32 1.442695, %v1851_v45 }
0x14b8   :  { %v1949_v58 = vpop.xlane.xlu0 %1948 }
0x14b9   :  { %v1953_v31 = vsub.f32 %v1945_v10, %v1949_v58  ;;  %v2768_v10 = vld [vmem:[%s4247_s13 + $0x38] sm:$0xff] }
0x14bb   :  { %v1955_v32 = vmul.f32 1.442695, %v1953_v31 }
0x14bd   :  { %2926 = vpow2.f32 %v1955_v32 }
0x14be   :  { %2928 = vpow2.f32 %v1853_v47 }
0x14c0   :  { %v1952_v42 = vpop.xlane.xlu2 %1951 }
0x14c1   :  { %v1954_v4 = vsub.f32 %v3983_v12, %v1952_v42 }
0x14c3   :  { %v2927_v61 = vpop.eup %2926  ;;  %v1957_v6 = vmul.f32 1.442695, %v1954_v4 }
0x14c4   :  { %v1959_v33 = vsel %vm1006_vm7, %v2927_v61, 0.0  ;;  %v2929_v52 = vpop.eup %2928 }
0x14c5   :  { %1960 = vadd.xlane.f32.xlu2 %v1959_v33  ;;  %v1857_v34 = vsel %vm1006_vm7, %v2929_v52, 0.0 }
0x14c8   :  { %v2111_v51 = vpop.permute.xlu2 %2110 }
0x14cb   :  { %v1798_v30 = vpop.permute.xlu0 %1797 }
0x14cc   :  { %v1800_v35 = vadd.f32 %v1798_v30, %v1777_v46  ;;  %v1801_v36 = vadd.f32 %v1798_v30, %v1780_v63 }
0x14ce   :  { %v3991_v37 = vpack.i.bf16 %v1800_v35, %v1801_v36  ;;  %v2773_v35 = vld [vmem:[%s4248_s14 + $0x38] sm:$0xff] }
0x14d0   :  { %2850 = vrot.lane.b32.xlu0 %v3991_v37, %s2979_s7  ;;  %2845 = vrot.lane.b32.xlu1 %v3991_v37, %s2978_s4 }
0x14d8   :  { %2010 = vrot.lane.b32.xlu0 %v1794_v50, %s2980_s25 }
0x14e0   :  { %2008 = vrot.lane.b32.xlu0 %v3943_v18, %s2980_s25 }
0x14e8   :  { %2004 = vrot.lane.b32.xlu0 %v3947_v0, %s2982_s6 }
0x14f0   :  { %2006 = vrot.lane.b32.xlu0 %v3953_v26, %s2982_s6 }
0x14fa   :  { %1849 = vmax.xlane.f32.xlu1 %v1848_v40 }
0x1513   :  { %2108 = vrot.lane.b32.xlu1 %v3943_v18, %s2981_s0 }
0x1538   :  { %v1961_v22 = vpop.xlane.xlu2 %1960 }
0x1539   :  { %2930 = vrcp.f32 %v1961_v22 }
0x153d   :  { %1858 = vadd.xlane.f32.xlu1 %v1857_v34 }
0x153f   :  { %v2931_v59 = vpop.eup %2930 }
0x1540   :  { %v1967_v18 = vmul.f32 %v2931_v59, %v2927_v61 }
0x1542   :  { %v2851_v54 = vpop.permute.xlu0 %2850  ;;  %v2846_v56 = vpop.permute.xlu1 %2845 }
0x1543   :  { %v2852_v25 = vunpack.i.l.bf16 %v2851_v54  ;;  %v2847_v46 = vunpack.i.l.bf16 %v2846_v56  ;;  %v2853_v62 = vunpack.i.h.bf16 %v2851_v54  ;;  %v2848_v49 = vunpack.i.h.bf16 %v2846_v56 }
0x1545   :  { %1895 = vmatpush.msra.mxu1 %v2847_v46  ;;  %1995 = vmatpush.msrb.mxu2 %v2852_v25 }
0x1547   :  { %1896 = vmatpush.msra.mxu1 %v2848_v49  ;;  %1996 = vmatpush.msrb.mxu2 %v2853_v62 }
0x1548   :  { %2745 = vmatmul.msk.f32.vlgmr.msrb.gmra.mxu2 %vm1006_vm7, %v1967_v18 }
0x1549   :  { %2753 = vmatpush.xpose.msk.msra.mxu2 %vm968_vm9, %v2111_v51 }
0x154a   :  { %v2011_v63 = vpop.permute.xlu0 %2010 }
0x154b   :  { %2747 = vmatpush.xpose.msk.msrb.mxu1 %vm968_vm9, %v2011_v63  ;;  %v2326_v63 = vperm.slane %v3927_v29, 6 }
0x1552   :  { %v2009_v50 = vpop.permute.xlu0 %2008 }
0x1553   :  { %2748 = vmatpush.xpose.msk.msrb.mxu1 %vm968_vm9, %v2009_v50 }
0x1556   :  { %2104 = vrot.lane.b32.xlu1 %v3947_v0, %s2983_s1 }
0x155a   :  { %v2005_v58 = vpop.permute.xlu0 %2004 }
0x1562   :  { %v2007_v32 = vpop.permute.xlu0 %2006 }
0x156d   :  { %v1850_v13 = vpop.xlane.xlu1 %1849 }
0x156e   :  { %v1852_v1 = vsub.f32 %v1844_v28, %v1850_v13  ;;  %v2771_v28 = vld [vmem:[%s4248_s14 + $0x28] sm:$0xff] }
0x1570   :  { %v1855_v5 = vmul.f32 1.442695, %v1852_v1 }
0x1572   :  { %2932 = vpow2.f32 %v1855_v5 }
0x1573   :  { %2934 = vpow2.f32 %v1957_v6 }
0x1578   :  { %v2933_v7 = vpop.eup %2932 }
0x1579   :  { %v1860_v20 = vsel %vm1006_vm7, %v2933_v7, 0.0  ;;  %v2935_v15 = vpop.eup %2934 }
0x157a   :  { %1861 = vadd.xlane.f32.xlu2 %v1860_v20  ;;  %v1962_v53 = vsel %vm1006_vm7, %v2935_v15, 0.0 }
0x1582   :  { %1963 = vadd.xlane.f32.xlu2 %v1962_v53 }
0x1585   :  { %v2109_v8 = vpop.permute.xlu1 %2108 }
0x1586   :  { %2754 = vmatpush.xpose.msk.msra.mxu2 %vm968_vm9, %v2109_v8 }
0x158a   :  { %2339 = vmatpush.msrb.mxu2 %v2768_v10 }
0x158c   :  { %2340 = vmatpush.msrb.mxu2 %v2767_v44 }
0x159a   :  { %2106 = vrot.lane.b32.xlu2 %v3953_v26, %s2983_s1  ;;  %v2766_v26 = vld [vmem:[%s4247_s13 + $0x28] sm:$0xff] }
0x159b   :  { %2341 = vmatpush.msrb.mxu2 %v2766_v26 }
0x159d   :  { %2342 = vmatpush.msrb.mxu2 %v2765_v11 }
0x15b0   :  { %v1859_v0 = vpop.xlane.xlu1 %1858 }
0x15b1   :  { %2936 = vrcp.f32 %v1859_v0 }
0x15b7   :  { %v2937_v43 = vpop.eup %2936 }
0x15b8   :  { %v1865_v55 = vmul.f32 %v2937_v43, %v2929_v52 }
0x15ba   :  { %2739 = vmatmul.msk.f32.vlgmr.msra.gmra.mxu1 %vm1006_vm7, %v1865_v55 }
0x15c8   :  { %v2105_v61 = vpop.permute.xlu1 %2104 }
0x15cb   :  { %v1998_v48 = vpop.f32.mrf.mxu2 }
0x15ed   :  { %v1862_v9 = vpop.xlane.xlu2 %1861 }
0x15ee   :  { %2938 = vrcp.f32 %v1862_v9 }
0x15f4   :  { %v2939_v39 = vpop.eup %2938 }
0x15f5   :  { %v1964_v12 = vpop.xlane.xlu2 %1963  ;;  %v1866_v16 = vmul.f32 %v2939_v39, %v2933_v7 }
0x15f6   :  { %2940 = vrcp.f32 %v1964_v12 }
0x15f7   :  { %2740 = vmatmul.msk.f32.gmra.mxu1 %vm1006_vm7, %v1866_v16 }
0x15fc   :  { %v2941_v60 = vpop.eup %2940 }
0x15fd   :  { %v1968_v31 = vmul.f32 %v2941_v60, %v2935_v15  ;;  %v2107_v33 = vpop.permute.xlu2 %2106 }
0x15ff   :  { %2746 = vmatmul.msk.f32.gmra.mxu2 %vm1006_vm7, %v1968_v31  ;;  %2749 = vmatmul.msk.f32.vlgmr.msrb.gmra.mxu1 %vm968_vm9, %v2005_v58 }
0x1607   :  { %2750 = vmatmul.msk.f32.gmra.mxu1 %vm968_vm9, %v2007_v32  ;;  %2755 = vmatmul.msk.f32.vlgmr.msra.gmra.mxu2 %vm968_vm9, %v2105_v61 }
0x1608   :  { %2368 = vmatpush.msra.mxu2 %v2773_v35 }
0x160a   :  { %2369 = vmatpush.msra.mxu2 %v2772_v38 }
0x160c   :  { %2370 = vmatpush.msra.mxu2 %v2771_v28 }
0x160f   :  { %2756 = vmatmul.msk.f32.gmra.mxu2 %vm968_vm9, %v2107_v33 }
0x1617   :  { %2769 = vmatmul.msk.f32.vlgmr.msrb.gmra.mxu2 %vm474_vm12, %v3781_v2  ;;  %v2770_v2 = vld [vmem:[%s4248_s14 + $0x20] sm:$0xff]  ;;  %s4283_s14 = smov 8  }
0x1618   :  { %2371 = vmatpush.msra.mxu2 %v2770_v2 }
0x1637   :  { %v4045_v30 = vpop.f32.mrf.mxu1 }
0x1674   :  { %v4050_v36 = vpop.f32.mrf.mxu1 }
0x167c   :  { %v2037_v40 = vpop.f32.mrf.mxu1 }
0x167d   :  { %v2043_v41 = vsel %vm3644_vm1, %v2037_v40, -1e+09 }
0x167e   :  { %v2045_v42 = vsel %vm886_vm5, %v2043_v41, -1e+30 }
0x167f   :  { %v2047_v45 = vsel %vm1006_vm7, %v2045_v42, -inf }
0x1680   :  { %2048 = vmax.xlane.f32.xlu1 %v2047_v45 }
0x1682   :  { %v2001_v47 = vpop.f32.mrf.mxu2 }
0x1684   :  { %v2040_v51 = vpop.f32.mrf.mxu1 }
0x1685   :  { %v2044_v52 = vsel %vm3648_vm4, %v2040_v51, -1e+09 }
0x1686   :  { %v2046_v22 = vsel %vm887_vm6, %v2044_v52, -1e+30 }
0x1687   :  { %v2050_v34 = vsel %vm1006_vm7, %v2046_v22, -inf }
0x1688   :  { %2051 = vmax.xlane.f32.xlu2 %v2050_v34 }
0x168a   :  { %v2137_v54 = vpop.f32.mrf.mxu2 }
0x168b   :  { %v2143_v56 = vsel %vm3644_vm1, %v2137_v54, -1e+09  ;;  %v2762_v54 = vld [vmem:[%s4249_s12 + $0x38] sm:$0xff] }
0x168c   :  { %v2145_v59 = vsel %vm886_vm5, %v2143_v56, -1e+30  ;;  %v2759_v56 = vld [vmem:[%s4249_s12 + $0x20] sm:$0xff] }
0x168d   :  { %v2147_v25 = vsel %vm1006_vm7, %v2145_v59, -inf }
0x168e   :  { %2148 = vmax.xlane.f32.xlu0 %v2147_v25 }
0x1692   :  { %v2140_v46 = vpop.f32.mrf.mxu2 }
0x1693   :  { %v2144_v62 = vsel %vm3648_vm4, %v2140_v46, -1e+09 }
0x1694   :  { %v2146_v49 = vsel %vm887_vm6, %v2144_v62, -1e+30 }
0x1695   :  { %v2150_v18 = vsel %vm1006_vm7, %v2146_v49, -inf }
0x1696   :  { %2151 = vmax.xlane.f32.xlu1 %v2150_v18 }
0x169a   :  { %v2344_v21 = vpop.f32.mrf.mxu2 }
0x169b   :  { %v2345_v50 = vadd.f32 %v2344_v21, %v2326_v63 }
0x169d   :  { %2774 = vmatmul.msk.f32.vlgmr.msra.gmra.mxu2 %vm474_vm12, %v2345_v50 }
0x16a2   :  { %2855 = vrot.lane.b32.xlu0 %v3991_v37, %s2984_s26  ;;  %s4284_s26 = smov 40  }
0x16aa   :  { %2206 = vrot.lane.b32.xlu0 %v1998_v48, %s4283_s14 }
0x16f3   :  { %v2049_v14 = vpop.xlane.xlu1 %2048 }
0x16f4   :  { %v2053_v23 = vsub.f32 %v2045_v42, %v2049_v14 }
0x16f6   :  { %v2055_v13 = vmul.f32 1.442695, %v2053_v23 }
0x16f8   :  { %2942 = vpow2.f32 %v2055_v13 }
0x16fb   :  { %v2052_v19 = vpop.xlane.xlu2 %2051 }
0x16fc   :  { %v2054_v1 = vsub.f32 %v2046_v22, %v2052_v19 }
0x16fe   :  { %v2943_v4 = vpop.eup %2942  ;;  %v2057_v5 = vmul.f32 1.442695, %v2054_v1 }
0x16ff   :  { %v2059_v6 = vsel %vm1006_vm7, %v2943_v4, 0.0 }
0x1700   :  { %2944 = vpow2.f32 %v2057_v5  ;;  %2060 = vadd.xlane.f32.xlu2 %v2059_v6 }
0x1701   :  { %v2149_v7 = vpop.xlane.xlu0 %2148 }
0x1702   :  { %v2153_v20 = vsub.f32 %v2145_v59, %v2149_v7 }
0x1704   :  { %v2155_v15 = vmul.f32 1.442695, %v2153_v20 }
0x1706   :  { %v2945_v53 = vpop.eup %2944  ;;  %2946 = vpow2.f32 %v2155_v15 }
0x1707   :  { %v2062_v8 = vsel %vm1006_vm7, %v2945_v53, 0.0 }
0x1708   :  { %2063 = vadd.xlane.f32.xlu2 %v2062_v8 }
0x1709   :  { %v2152_v0 = vpop.xlane.xlu1 %2151 }
0x170a   :  { %v2154_v43 = vsub.f32 %v2146_v49, %v2152_v0 }
0x170c   :  { %v2947_v55 = vpop.eup %2946  ;;  %v2157_v9 = vmul.f32 1.442695, %v2154_v43 }
0x170d   :  { %v2159_v10 = vsel %vm1006_vm7, %v2947_v55, 0.0 }
0x170e   :  { %2948 = vpow2.f32 %v2157_v9  ;;  %2160 = vadd.xlane.f32.xlu1 %v2159_v10 }
0x1714   :  { %v2949_v44 = vpop.eup %2948  ;;  %v2856_v26 = vpop.permute.xlu0 %2855 }
0x1715   :  { %v2857_v11 = vunpack.i.l.bf16 %v2856_v26  ;;  %v2162_v39 = vsel %vm1006_vm7, %v2949_v44, 0.0  ;;  %v2858_v12 = vunpack.i.h.bf16 %v2856_v26 }
0x1716   :  { %2163 = vadd.xlane.f32.xlu2 %v2162_v39 }
0x1717   :  { %2095 = vmatpush.msrb.mxu3 %v2857_v11 }
0x1719   :  { %2096 = vmatpush.msrb.mxu3 %v2858_v12 }
0x171b   :  { %2258 = vmatpush.msra.mxu3 %v2762_v54 }
0x171c   :  { %v2207_v59 = vpop.permute.xlu0 %2206 }
0x171d   :  { %v2228_v46 = vsel %vm968_vm9, %v4045_v30, %v2207_v59  ;;  %v2239_v30 = vperm.slane %v3927_v29, 3 }
0x1720   :  { %v2373_v2 = vpop.f32.mrf.mxu2 }
0x1727   :  { %2860 = vrot.lane.b32.xlu1 %v3991_v37, %s4284_s26  ;;  %v2352_v37 = vperm.slane %v3927_v29, 7 }
0x1729   :  { %v2374_v42 = vadd.f32 %v2373_v2, %v2352_v37 }
0x172f   :  { %2208 = vrot.lane.b32.xlu1 %v2001_v47, %s4283_s14 }
0x1773   :  { %v2061_v16 = vpop.xlane.xlu2 %2060 }
0x1774   :  { %2950 = vrcp.f32 %v2061_v16 }
0x177a   :  { %v2951_v60 = vpop.eup %2950 }
0x177b   :  { %v2067_v58 = vmul.f32 %v2951_v60, %v2943_v4  ;;  %v2064_v31 = vpop.xlane.xlu2 %2063 }
0x177c   :  { %2952 = vrcp.f32 %v2064_v31 }
0x177d   :  { %2751 = vmatmul.msk.f32.vlgmr.msrb.gmra.mxu3 %vm1006_vm7, %v2067_v58 }
0x1781   :  { %v2161_v33 = vpop.xlane.xlu1 %2160 }
0x1782   :  { %v2953_v32 = vpop.eup %2952  ;;  %2954 = vrcp.f32 %v2161_v33 }
0x1783   :  { %v2068_v61 = vmul.f32 %v2953_v32, %v2945_v53 }
0x1785   :  { %2752 = vmatmul.msk.f32.gmra.mxu3 %vm1006_vm7, %v2068_v61 }
0x1788   :  { %v2955_v48 = vpop.eup %2954 }
0x1789   :  { %v2164_v35 = vpop.xlane.xlu2 %2163  ;;  %v2167_v41 = vmul.f32 %v2955_v48, %v2947_v55  ;;  %v2315_v48 = vperm.slane %v3927_v29, 4 }
0x178a   :  { %2956 = vrcp.f32 %v2164_v35 }
0x1790   :  { %v2957_v45 = vpop.eup %2956 }
0x1791   :  { %v2168_v47 = vmul.f32 %v2957_v45, %v2949_v44 }
0x1799   :  { %v2861_v38 = vpop.permute.xlu1 %2860 }
0x179a   :  { %v2862_v28 = vunpack.i.l.bf16 %v2861_v38  ;;  %v2863_v40 = vunpack.i.h.bf16 %v2861_v38 }
0x179c   :  { %2195 = vmatpush.msra.mxu1 %v2862_v28 }
0x179e   :  { %2196 = vmatpush.msra.mxu1 %v2863_v40  ;;  %v2318_v40 = vperm.slane %v3927_v29, 5 }
0x179f   :  { %2757 = vmatmul.msk.f32.vlgmr.msra.gmra.mxu1 %vm1006_vm7, %v2167_v41 }
0x17a0   :  { %2775 = vmatpush.msk.msrb.mxu1 %vm859_vm14, %v2374_v42  ;;  %vm4286_vm14 = vcmask 195584  }
0x17a1   :  { %v2209_v62 = vpop.permute.xlu1 %2208 }
0x17a2   :  { %v2229_v21 = vsel %vm968_vm9, %v4050_v36, %v2209_v62 }
0x17a7   :  { %2758 = vmatmul.msk.f32.gmra.mxu1 %vm1006_vm7, %v2168_v47 }
0x17af   :  { %2776 = vmatmul.msk.f32.vlgmr.msrb.gmra.mxu1 %vm852_vm3, %v3607_v27  ;;  %v2761_v27 = vld [vmem:[%s4249_s12 + $0x30] sm:$0xff] }
0x17b0   :  { %2259 = vmatpush.msra.mxu3 %v2761_v27 }
0x17b7   :  { %2777 = vmatmul.msk.f32.gmra.mxu1 %vm852_vm3, %v3613_v3  ;;  %v2760_v3 = vld [vmem:[%s4249_s12 + $0x28] sm:$0xff]  ;;  %vm4287_vm3 = vmmov %vm4286_vm14 }
0x17b8   :  { %2260 = vmatpush.msra.mxu3 %v2760_v3 }
0x17ba   :  { %2261 = vmatpush.msra.mxu3 %v2759_v56 }
0x1800   :  { %v2098_v51 = vpop.f32.mrf.mxu3 }
0x1801   :  { %2214 = vrot.lane.b32.xlu2 %v2098_v51, %s4285_s30 }
0x1808   :  { %v2101_v22 = vpop.f32.mrf.mxu3 }
0x181c   :  { %v2198_v52 = vpop.f32.mrf.mxu1 }
0x181d   :  { %2222 = vrot.lane.b32.xlu0 %v2198_v52, %s2988_s23 }
0x1824   :  { %v2201_v34 = vpop.f32.mrf.mxu1 }
0x1825   :  { %2216 = vrot.lane.b32.xlu0 %v2101_v22, %s4285_s30  ;;  %2224 = vrot.lane.b32.xlu1 %v2201_v34, %s2988_s23 }
0x182c   :  { %v2396_v45 = vpop.f32.mrf.mxu1 }
0x1834   :  { %v2399_v56 = vpop.f32.mrf.mxu1 }
0x185b   :  { %v2215_v25 = vpop.permute.xlu2 %2214 }
0x185c   :  { %v2230_v49 = vsel %vm1006_vm7, %v2228_v46, %v2215_v25 }
0x188f   :  { %v2223_v18 = vpop.permute.xlu0 %2222 }
0x1890   :  { %v2232_v63 = vsel %vm4286_vm14, %v2230_v49, %v2223_v18 }
0x1891   :  { %2763 = vmatmul.msk.f32.vlgmr.msra.gmra.mxu3 %vm474_vm12, %v2232_v63 }
0x1897   :  { %v2217_v50 = vpop.permute.xlu0 %2216  ;;  %v2225_v14 = vpop.permute.xlu1 %2224 }
0x1898   :  { %v2231_v23 = vsel %vm1006_vm7, %v2229_v21, %v2217_v50 }
0x1899   :  { %v2233_v13 = vsel %vm4287_vm3, %v2231_v23, %v2225_v14 }
0x189a   :  { %2764 = vmatmul.msk.f32.gmra.mxu3 %vm474_vm12, %v2233_v13 }
0x1914   :  { %v2263_v19 = vpop.f32.mrf.mxu3 }
0x1915   :  { %v2264_v1 = vadd.f32 %v2263_v19, %v2239_v30  ;;  %v2780_v19 = vld [vmem:[%s4251_s15 + $0x30] sm:$0xff] }
0x1917   :  { %v2269_v4 = vadd.f32 %v2264_v1, %v3934_v57  ;;  %v2779_v1 = vld [vmem:[%s4251_s15 + $0x28] sm:$0xff] }
0x1919   :  { %v2271_v5 = vsel %vm474_vm12, %v2269_v4, 0.0 }
0x191a   :  { %2272 = vadd.xlane.f32.xlu0 %v2271_v5 }
0x191d   :  { %v2266_v6 = vpop.f32.mrf.mxu3 }
0x191e   :  { %v2267_v7 = vadd.f32 %v2266_v6, %v2239_v30  ;;  %v2781_v30 = vld [vmem:[%s4251_s15 + $0x38] sm:$0xff] }
0x191f   :  { %2482 = vmatpush.msrb.mxu3 %v2781_v30 }
0x1920   :  { %v2270_v36 = vadd.f32 %v2267_v7, %v3938_v17 }
0x1921   :  { %2483 = vmatpush.msrb.mxu3 %v2780_v19 }
0x1922   :  { %v2274_v20 = vsel %vm474_vm12, %v2270_v36, 0.0 }
0x1923   :  { %2275 = vadd.xlane.f32.xlu2 %v2274_v20  ;;  %2484 = vmatpush.msrb.mxu3 %v2779_v1  ;;  %v2791_v20 = vld [vmem:[%s4252_s16 + $0x70] sm:$0xff] }
0x198d   :  { %v2273_v15 = vpop.xlane.xlu0 %2272 }
0x198e   :  { %v2277_v53 = vmul.f32 %v2273_v15, %v3396_v24  ;;  %v2790_v15 = vld [vmem:[%s4252_s16 + $0x68] sm:$0xff] }
0x1990   :  { %v2279_v8 = vsub.f32 %v2269_v4, %v2277_v53  ;;  %v2778_v4 = vld [vmem:[%s4251_s15 + $0x20] sm:$0xff] }
0x1991   :  { %2485 = vmatpush.msrb.mxu3 %v2778_v4 }
0x1992   :  { %v2281_v0 = vmul.f32 %v2279_v8, %v2279_v8 }
0x1994   :  { %v2283_v43 = vsel %vm474_vm12, %v2281_v0, 0.0  ;;  %v2789_v0 = vld [vmem:[%s4252_s16 + $0x60] sm:$0xff] }
0x1995   :  { %2284 = vadd.xlane.f32.xlu1 %v2283_v43 }
0x1996   :  { %v2276_v55 = vpop.xlane.xlu2 %2275 }
0x1997   :  { %v2278_v57 = vmul.f32 %v2276_v55, %v3396_v24 }
0x1999   :  { %v2280_v9 = vsub.f32 %v2270_v36, %v2278_v57  ;;  %v2792_v36 = vld [vmem:[%s4252_s16 + $0x78] sm:$0xff] }
0x199a   :  { %2519 = vmatpush.msrb.mxu2 %v2792_v36  ;;  %v2586_v36 = vld [vmem:[%s4253_s19] sm:$0xff] }
0x199b   :  { %v2282_v10 = vmul.f32 %v2280_v9, %v2280_v9 }
0x199c   :  { %2520 = vmatpush.msrb.mxu2 %v2791_v20 }
0x199d   :  { %v2286_v44 = vsel %vm474_vm12, %v2282_v10, 0.0 }
0x199e   :  { %2287 = vadd.xlane.f32.xlu0 %v2286_v44  ;;  %2521 = vmatpush.msrb.mxu2 %v2790_v15 }
0x19a0   :  { %2522 = vmatpush.msrb.mxu2 %v2789_v0 }
0x1a08   :  { %v2285_v17 = vpop.xlane.xlu1 %2284 }
0x1a09   :  { %v2289_v26 = vmul.f32 %v2285_v17, %v3396_v24  ;;  %v4180_v17 = vld [vmem:[%s4244_s17 + $0x18] sm:$0x1f] }
0x1a0b   :  { %v2291_v11 = vadd.f32 1e-05, %v2289_v26 }
0x1a0d   :  { %2958 = vrsqrt.f32 %v2291_v11  ;;  %vm2299_vm1 = vweird.f32 %v2291_v11 }
0x1a11   :  { %v2288_v39 = vpop.xlane.xlu0 %2287 }
0x1a12   :  { %v2290_v12 = vmul.f32 %v2288_v39, %v3396_v24 }
0x1a13   :  { %v2959_v16 = vpop.eup %2958 }
0x1a14   :  { %v2294_v60 = vmul.f32 %v2959_v16, %v2291_v11  ;;  %v2292_v58 = vadd.f32 1e-05, %v2290_v12  ;;  %vm2300_vm9 = vweird.f32 %v2959_v16  ;;  %v2448_v12 = vperm.slane %v4180_v17, 0 }
0x1a15   :  { %vm2301_vm4 = vmor %vm2299_vm1, %vm2300_vm9 }
0x1a16   :  { %v2295_v31 = vmul.f32 %v2959_v16, %v2294_v60  ;;  %2960 = vrsqrt.f32 %v2292_v58  ;;  %vm2309_vm6 = vweird.f32 %v2292_v58 }
0x1a18   :  { %v2296_v32 = vmul.f32 0.5, %v2295_v31 }
0x1a1a   :  { %v2297_v61 = vsub.f32 1.5, %v2296_v32 }
0x1a1c   :  { %v2961_v33 = vpop.eup %2960  ;;  %v2298_v35 = vmul.f32 %v2959_v16, %v2297_v61 }
0x1a1d   :  { %v2304_v38 = vmul.f32 %v2961_v33, %v2292_v58  ;;  %vm2310_vm5 = vweird.f32 %v2961_v33  ;;  %v2451_v58 = vperm.slane %v4180_v17, 1 }
0x1a1e   :  { %v2302_v37 = vsel %vm2301_vm4, %v2959_v16, %v2298_v35  ;;  %vm2311_vm7 = vmor %vm2309_vm6, %vm2310_vm5 }
0x1a1f   :  { %v2305_v28 = vmul.f32 %v2961_v33, %v2304_v38  ;;  %v2313_v2 = vmul.f32 %v2302_v37, %v2279_v8 }
0x1a21   :  { %v2306_v41 = vmul.f32 0.5, %v2305_v28  ;;  %v2316_v42 = vmul.f32 %v2315_v48, %v2313_v2 }
0x1a23   :  { %v2307_v47 = vsub.f32 1.5, %v2306_v41  ;;  %v2319_v51 = vadd.f32 %v2318_v40, %v2316_v42  ;;  %v2787_v41 = vld [vmem:[%s4252_s16 + $0x50] sm:$0xff]  ;;  %v2786_v42 = vld [vmem:[%s4252_s16 + $0x48] sm:$0xff] }
0x1a25   :  { %v2308_v52 = vmul.f32 %v2961_v33, %v2307_v47  ;;  %v2402_v22 = vadd.f32 %v2396_v45, %v2319_v51  ;;  %v2785_v45 = vld [vmem:[%s4252_s16 + $0x40] sm:$0xff] }
0x1a26   :  { %v2868_v47 = vld [vmem:[%s4250_s18 + $0x1] ss:$0 sm:$0xff] }
0x1a27   :  { %v2404_v34 = vsel %vm474_vm12, %v2402_v22, 0.0  ;;  %v2312_v54 = vsel %vm2311_vm7, %v2961_v33, %v2308_v52 }
0x1a28   :  { %2405 = vadd.xlane.f32.xlu2 %v2404_v34  ;;  %v2314_v27 = vmul.f32 %v2312_v54, %v2280_v9  ;;  %v2788_v9 = vld [vmem:[%s4252_s16 + $0x58] sm:$0xff] }
0x1a29   :  { %2523 = vmatpush.msrb.mxu2 %v2788_v9 }
0x1a2a   :  { %v2317_v3 = vmul.f32 %v2315_v48, %v2314_v27 }
0x1a2b   :  { %2524 = vmatpush.msrb.mxu2 %v2787_v41 }
0x1a2c   :  { %v2320_v59 = vadd.f32 %v2318_v40, %v2317_v3  ;;  %v2589_v3 = vld [vmem:[%s4253_s19 + $0x18] sm:$0xff] }
0x1a2d   :  { %2525 = vmatpush.msrb.mxu2 %v2786_v42  ;;  %2612 = vmatpush.msrb.mxu0 %v2589_v3 }
0x1a2e   :  { %v2403_v25 = vadd.f32 %v2399_v56, %v2320_v59  ;;  %2799 = vmatpush.msra.mxu1 %v2589_v3  ;;  %v2504_v56 = vperm.slane %v4180_v17, 2 }
0x1a2f   :  { %2526 = vmatpush.msrb.mxu2 %v2785_v45 }
0x1a30   :  { %v2407_v29 = vsel %vm474_vm12, %v2403_v25, 0.0 }
0x1a31   :  { %2408 = vadd.xlane.f32.xlu1 %v2407_v29 }
0x1a9b   :  { %v2406_v46 = vpop.xlane.xlu2 %2405 }
0x1a9c   :  { %v2410_v62 = vmul.f32 %v2406_v46, %v3396_v24 }
0x1a9e   :  { %v2412_v49 = vsub.f32 %v2402_v22, %v2410_v62 }
0x1aa0   :  { %v2414_v18 = vmul.f32 %v2412_v49, %v2412_v49 }
0x1aa2   :  { %v2416_v63 = vsel %vm474_vm12, %v2414_v18, 0.0 }
0x1aa3   :  { %2417 = vadd.xlane.f32.xlu0 %v2416_v63 }
0x1aa4   :  { %v2409_v21 = vpop.xlane.xlu1 %2408 }
0x1aa5   :  { %v2411_v50 = vmul.f32 %v2409_v21, %v3396_v24  ;;  %v2588_v21 = vld [vmem:[%s4253_s19 + $0x10] sm:$0xff] }
0x1aa6   :  { %2613 = vmatpush.msrb.mxu0 %v2588_v21  ;;  %2800 = vmatpush.msra.mxu1 %v2588_v21 }
0x1aa7   :  { %v2413_v14 = vsub.f32 %v2403_v25, %v2411_v50  ;;  %v2587_v50 = vld [vmem:[%s4253_s19 + $0x8] sm:$0xff] }
0x1aa8   :  { %2614 = vmatpush.msrb.mxu0 %v2587_v50  ;;  %2801 = vmatpush.msra.mxu1 %v2587_v50 }
0x1aa9   :  { %v2415_v23 = vmul.f32 %v2413_v14, %v2413_v14 }
0x1aaa   :  { %2615 = vmatpush.msrb.mxu0 %v2586_v36  ;;  %2802 = vmatpush.msra.mxu1 %v2586_v36 }
0x1aab   :  { %v2419_v13 = vsel %vm474_vm12, %v2415_v23, 0.0 }
0x1aac   :  { %2420 = vadd.xlane.f32.xlu2 %v2419_v13 }
0x1b16   :  { %v2418_v5 = vpop.xlane.xlu0 %2417 }
0x1b17   :  { %v2422_v6 = vmul.f32 %v2418_v5, %v3396_v24 }
0x1b19   :  { %v2424_v7 = vadd.f32 1e-05, %v2422_v6 }
0x1b1b   :  { %2962 = vrsqrt.f32 %v2424_v7  ;;  %vm2432_vm15 = vweird.f32 %v2424_v7 }
0x1b1f   :  { %v2421_v53 = vpop.xlane.xlu2 %2420 }
0x1b20   :  { %v2423_v8 = vmul.f32 %v2421_v53, %v3396_v24 }
0x1b21   :  { %v2963_v43 = vpop.eup %2962 }
0x1b22   :  { %v2427_v55 = vmul.f32 %v2963_v43, %v2424_v7  ;;  %v2425_v57 = vadd.f32 1e-05, %v2423_v8  ;;  %vm2433_vm11 = vweird.f32 %v2963_v43 }
0x1b23   :  { %vm2434_vm0 = vmor %vm2432_vm15, %vm2433_vm11 }
0x1b24   :  { %v2428_v10 = vmul.f32 %v2963_v43, %v2427_v55  ;;  %2964 = vrsqrt.f32 %v2425_v57  ;;  %vm2442_vm8 = vweird.f32 %v2425_v57 }
0x1b26   :  { %v2429_v44 = vmul.f32 0.5, %v2428_v10 }
0x1b28   :  { %v2430_v26 = vsub.f32 1.5, %v2429_v44 }
0x1b2a   :  { %v2965_v11 = vpop.eup %2964  ;;  %v2431_v39 = vmul.f32 %v2963_v43, %v2430_v26 }
0x1b2b   :  { %v2437_v16 = vmul.f32 %v2965_v11, %v2425_v57  ;;  %vm2443_vm13 = vweird.f32 %v2965_v11 }
0x1b2c   :  { %v2435_v60 = vsel %vm2434_vm0, %v2963_v43, %v2431_v39  ;;  %vm2444_vm10 = vmor %vm2442_vm8, %vm2443_vm13  ;;  %v2580_v39 = vperm.slane %v4180_v17, 3 }
0x1b2d   :  { %v2446_v31 = vmul.f32 %v2435_v60, %v2412_v49  ;;  %v2438_v32 = vmul.f32 %v2965_v11, %v2437_v16 }
0x1b2f   :  { %v2449_v61 = vmul.f32 %v2448_v12, %v2446_v31  ;;  %v2439_v33 = vmul.f32 0.5, %v2438_v32 }
0x1b31   :  { %v2452_v35 = vadd.f32 %v2451_v58, %v2449_v61  ;;  %v2440_v38 = vsub.f32 1.5, %v2439_v33 }
0x1b33   :  { %v2441_v48 = vmul.f32 %v2965_v11, %v2440_v38  ;;  %2783 = vmatmul.msk.f32.vlgmr.msrb.gmra.mxu3 %vm474_vm12, %v2452_v35 }
0x1b35   :  { %v2445_v37 = vsel %vm2444_vm10, %v2965_v11, %v2441_v48 }
0x1b36   :  { %v2447_v28 = vmul.f32 %v2445_v37, %v2413_v14 }
0x1b38   :  { %v2450_v2 = vmul.f32 %v2448_v12, %v2447_v28 }
0x1b3a   :  { %v2453_v40 = vadd.f32 %v2451_v58, %v2450_v2 }
0x1b3c   :  { %2784 = vmatmul.msk.f32.gmra.mxu3 %vm474_vm12, %v2453_v40 }
0x1bb6   :  { %v2487_v51 = vpop.f32.mrf.mxu3 }
0x1bb7   :  { %v2488_v52 = vadd.f32 %v2868_v47, %v2487_v51 }
0x1bb9   :  { %v2493_v22 = vmax.f32 %v2488_v52, 0.0 }
0x1bbb   :  { %2793 = vmatmul.msk.f32.vlgmr.msrb.gmra.mxu2 %vm602_vm2, %v2493_v22 }
0x1bbf   :  { %v2490_v34 = vpop.f32.mrf.mxu3 }
0x1bc0   :  { %v2491_v54 = vadd.f32 %v2868_v47, %v2490_v34 }
0x1bc2   :  { %v2494_v27 = vmax.f32 %v2491_v54, 0.0 }
0x1bc4   :  { %2794 = vmatmul.msk.f32.gmra.mxu2 %vm602_vm2, %v2494_v27 }
0x1c3e   :  { %v2528_v59 = vpop.f32.mrf.mxu2 }
0x1c3f   :  { %v2529_v25 = vadd.f32 %v2528_v59, %v2504_v56 }
0x1c41   :  { %v2534_v29 = vadd.f32 %v2529_v25, %v2452_v35 }
0x1c43   :  { %v2536_v46 = vsel %vm474_vm12, %v2534_v29, 0.0 }
0x1c44   :  { %2537 = vadd.xlane.f32.xlu1 %v2536_v46 }
0x1c47   :  { %v2531_v62 = vpop.f32.mrf.mxu2 }
0x1c48   :  { %v2532_v49 = vadd.f32 %v2531_v62, %v2504_v56 }
0x1c4a   :  { %v2535_v18 = vadd.f32 %v2532_v49, %v2453_v40 }
0x1c4c   :  { %v2539_v63 = vsel %vm474_vm12, %v2535_v18, 0.0 }
0x1c4d   :  { %2540 = vadd.xlane.f32.xlu0 %v2539_v63 }
0x1cb7   :  { %v2538_v14 = vpop.xlane.xlu1 %2537 }
0x1cb8   :  { %v2542_v23 = vmul.f32 %v2538_v14, %v3396_v24 }
0x1cba   :  { %v2544_v13 = vsub.f32 %v2534_v29, %v2542_v23 }
0x1cbc   :  { %v2546_v30 = vmul.f32 %v2544_v13, %v2544_v13 }
0x1cbe   :  { %v2548_v19 = vsel %vm474_vm12, %v2546_v30, 0.0 }
0x1cbf   :  { %2549 = vadd.xlane.f32.xlu2 %v2548_v19 }
0x1cc0   :  { %v2541_v1 = vpop.xlane.xlu0 %2540 }
0x1cc1   :  { %v2543_v4 = vmul.f32 %v2541_v1, %v3396_v24 }
0x1cc3   :  { %v2545_v5 = vsub.f32 %v2535_v18, %v2543_v4 }
0x1cc5   :  { %v2547_v6 = vmul.f32 %v2545_v5, %v2545_v5 }
0x1cc7   :  { %v2551_v7 = vsel %vm474_vm12, %v2547_v6, 0.0 }
0x1cc8   :  { %2552 = vadd.xlane.f32.xlu1 %v2551_v7 }
0x1d32   :  { %v2550_v20 = vpop.xlane.xlu2 %2549 }
0x1d33   :  { %v2554_v15 = vmul.f32 %v2550_v20, %v3396_v24 }
0x1d35   :  { %v2556_v53 = vadd.f32 1e-05, %v2554_v15 }
0x1d37   :  { %2966 = vrsqrt.f32 %v2556_v53  ;;  %vm2564_vm14 = vweird.f32 %v2556_v53 }
0x1d3b   :  { %v2553_v8 = vpop.xlane.xlu1 %2552 }
0x1d3c   :  { %v2555_v0 = vmul.f32 %v2553_v8, %v3396_v24  ;;  %v2583_v24 = vperm.slane %v4180_v17, 4  ;;  %v2869_v17 = vld [vmem:[%s4254_s20] ss:$0 sm:$0xff] }
0x1d3d   :  { %v2967_v43 = vpop.eup %2966 }
0x1d3e   :  { %v2559_v55 = vmul.f32 %v2967_v43, %v2556_v53  ;;  %v2557_v57 = vadd.f32 1e-05, %v2555_v0  ;;  %vm2565_vm2 = vweird.f32 %v2967_v43 }
0x1d3f   :  { %vm2566_vm3 = vmor %vm2564_vm14, %vm2565_vm2 }
0x1d40   :  { %v2560_v9 = vmul.f32 %v2967_v43, %v2559_v55  ;;  %2968 = vrsqrt.f32 %v2557_v57  ;;  %vm2574_vm1 = vweird.f32 %v2557_v57 }
0x1d42   :  { %v2561_v10 = vmul.f32 0.5, %v2560_v9 }
0x1d44   :  { %v2562_v44 = vsub.f32 1.5, %v2561_v10 }
0x1d46   :  { %v2969_v26 = vpop.eup %2968  ;;  %v2563_v11 = vmul.f32 %v2967_v43, %v2562_v44 }
0x1d47   :  { %v2569_v12 = vmul.f32 %v2969_v26, %v2557_v57  ;;  %vm2575_vm9 = vweird.f32 %v2969_v26 }
0x1d48   :  { %v2567_v16 = vsel %vm2566_vm3, %v2967_v43, %v2563_v11  ;;  %vm2576_vm4 = vmor %vm2574_vm1, %vm2575_vm9 }
0x1d49   :  { %v2578_v60 = vmul.f32 %v2567_v16, %v2544_v13  ;;  %v2570_v58 = vmul.f32 %v2969_v26, %v2569_v12 }
0x1d4b   :  { %v2581_v31 = vmul.f32 %v2580_v39, %v2578_v60  ;;  %v2571_v32 = vmul.f32 0.5, %v2570_v58 }
0x1d4d   :  { %v2572_v61 = vsub.f32 1.5, %v2571_v32  ;;  %v2584_v33 = vadd.f32 %v2583_v24, %v2581_v31 }
0x1d4f   :  { %v2573_v35 = vmul.f32 %v2969_v26, %v2572_v61  ;;  %2795 = vmatmul.msk.f32.vlgmr.msrb.gmra.mxu0 %vm474_vm12, %v2584_v33 }
0x1d51   :  { %v2577_v38 = vsel %vm2576_vm4, %v2969_v26, %v2573_v35 }
0x1d52   :  { %v2579_v48 = vmul.f32 %v2577_v38, %v2545_v5 }
0x1d54   :  { %v2582_v37 = vmul.f32 %v2580_v39, %v2579_v48 }
0x1d56   :  { %v2585_v28 = vadd.f32 %v2583_v24, %v2582_v37 }
0x1d58   :  { %2796 = vmatmul.msk.f32.vlgmr.msra.gmra.mxu1 %vm474_vm12, %v2585_v28 }
0x1dcc   :  { %v2617_v2 = vpop.f32.mrf.mxu0 }
0x1dcd   :  { %v2618_v40 = vadd.f32 %v2869_v17, %v2617_v2 }
0x1dcf   :  { %2623 = vst [vmem:[%s4255_s21] sm:$0xff] %v2618_v40 }
0x1dd5   :  { %v2620_v41 = vpop.f32.mrf.mxu1 }
0x1dd6   :  { %v2621_v42 = vadd.f32 %v2869_v17, %v2620_v41 }
0x1dd8   :  { %2624 = vst [vmem:[%s4255_s21 + $0x8] sm:$0xff] %v2621_v42 }

</bundles_post_ra>
